<compile_context>
chip_gen: v7x
topology: tpu7x:2x2x1
jax: 0.10.0
libtpu: 0.0.40
codegen_flags: <defaults>
</compile_context>

<pallas_src>
import jax
import jax.numpy as jnp
import numpy as np
from jax.experimental import pallas as pl
from jax.experimental.pallas import tpu as pltpu

# ---------------- problem sizes (small, consistent with the module) ----------
BATCH = 2
SEQ = 8
INPUT_SIZE = 4
HIDDEN = 32
NUM_LAYERS = 2      # kernel below is written for exactly 2 LSTM layers
LANES = 128         # TPU lane width; head outputs are padded to this

_HI = jax.lax.Precision.HIGHEST


def _dot(a, b):
    return jnp.dot(a, b, precision=_HI, preferred_element_type=jnp.float32)


# ---------------------------- Pallas kernel ----------------------------------
def meta_learner_kernel(
    xf_ref,       # (T*Bp, I)   time-major flattened input
    wih0T_ref,    # (I, 4H)     pre-transposed
    whh0T_ref,    # (H, 4H)
    b0_ref,       # (1, 4H)     (= b_ih_l0 + b_hh_l0)
    wih1T_ref,    # (H, 4H)
    whh1T_ref,    # (H, 4H)
    b1_ref,       # (1, 4H)     (= b_ih_l1 + b_hh_l1)
    wcT_ref,      # (H, 128)    classifier weight, transposed + zero-padded cols
    bc_ref,       # (1, 128)
    wa1T_ref,     # (H, H)
    ba1_ref,      # (1, H)
    wa2T_ref,     # (H, 128)    second adaptation weight, transposed + padded
    ba2_ref,      # (1, 128)
    regime_ref,   # out (Bp, 128)   lanes [0:3] valid
    adapt_ref,    # out (Bp, 128)   lanes [0:H] valid
):
    H = whh0T_ref.shape[0]
    H4 = whh0T_ref.shape[1]
    Bp = regime_ref.shape[0]
    T = xf_ref.shape[0] // Bp
    f32 = jnp.float32

    # Loop-invariant weights loaded once (already transposed by the wrapper).
    whh0T = whh0T_ref[...]
    wih1T = wih1T_ref[...]
    whh1T = whh1T_ref[...]
    b1b = jnp.broadcast_to(b1_ref[...], (Bp, H4))        # hoisted broadcast

    # Whole-sequence input->hidden projection for layer 0 (single matmul),
    # bias folded in, so the recurrence has one dependent matmul per step.
    xproj0 = _dot(xf_ref[...], wih0T_ref[...]) + b0_ref[...]   # (T*Bp, 4H)

    def lstm_cell(gates, c):
        # 4H == 128 lanes: whole-vreg EUP activations, then lane slices.
        sig = jax.nn.sigmoid(gates)
        tnh = jnp.tanh(gates)
        i = sig[:, 0 * H:1 * H]
        f = sig[:, 1 * H:2 * H]
        g = tnh[:, 2 * H:3 * H]
        o = sig[:, 3 * H:4 * H]
        c_new = f * c + i * g
        h_new = o * jnp.tanh(c_new)
        return h_new, c_new

    h0 = jnp.zeros((Bp, H), f32)
    c0 = jnp.zeros((Bp, H), f32)
    h1 = jnp.zeros((Bp, H), f32)
    c1 = jnp.zeros((Bp, H), f32)

    # Cross-layer software pipeline: at iteration t, layer-0 step t and
    # layer-1 step t-1 are data-independent, so their matmuls can overlap.
    for t in range(T + 1):          # static unroll; T is known at trace time
        h0_new = c0_new = None
        if t < T:
            gates0 = xproj0[t * Bp:(t + 1) * Bp, :] + _dot(h0, whh0T)
            h0_new, c0_new = lstm_cell(gates0, c0)
        if t >= 1:
            # h0 here is still layer-0's output of step t-1.
            gates1 = _dot(h0, wih1T) + _dot(h1, whh1T) + b1b
            h1, c1 = lstm_cell(gates1, c1)
        if t < T:
            h0, c0 = h0_new, c0_new

    h_last = h1                     # == features[:, -1, :]   (Bp, H)

    # market_classifier: Linear(H -> 3), output lane-padded to 128
    regime_ref[...] = _dot(h_last, wcT_ref[...]) + bc_ref[...]

    # adaptation_network: Linear -> ReLU -> Linear (second layer lane-padded)
    a = jnp.maximum(_dot(h_last, wa1T_ref[...]) + ba1_ref[...], 0.0)
    adapt_ref[...] = _dot(a, wa2T_ref[...]) + ba2_ref[...]


# ------------------------------ wrapper ---------------------------------------
def market_meta_learner_forward(x, market_data, params):
    """x: (B, T, I) float32.  market_data is unused (matches PyTorch forward)."""
    del market_data  # unused by the reference forward()
    B, T, I = x.shape
    H = params["whh0"].shape[1]
    Bp = ((B + 7) // 8) * 8           # pad batch to a full sublane group

    # ---- wrapper-side layout plumbing (free): pad batch, go time-major ------
    x_p = jnp.pad(x, ((0, Bp - B), (0, 0), (0, 0)))
    x_tb = jnp.transpose(x_p, (1, 0, 2)).reshape(T * Bp, I)      # (T*Bp, I)

    # ---- pre-transpose weights; lane-pad the two head outputs to 128 --------
    wih0T = params["wih0"].T                     # (I, 4H)
    whh0T = params["whh0"].T                     # (H, 4H)
    wih1T = params["wih1"].T                     # (H, 4H)
    whh1T = params["whh1"].T                     # (H, 4H)

    wcT = jnp.zeros((H, LANES), jnp.float32).at[:, :3].set(params["wc"].T)
    bc = jnp.zeros((1, LANES), jnp.float32).at[:, :3].set(params["bc"])
    wa1T = params["wa1"].T                       # (H, H)
    wa2T = jnp.zeros((H, LANES), jnp.float32).at[:, :H].set(params["wa2"].T)
    ba2 = jnp.zeros((1, LANES), jnp.float32).at[:, :H].set(params["ba2"])

    vmem = pl.BlockSpec(memory_space=pltpu.MemorySpace.VMEM)
    args = (x_tb, wih0T, whh0T, params["b0"], wih1T, whh1T, params["b1"],
            wcT, bc, wa1T, params["ba1"], wa2T, ba2)

    regime_pad, adapt_pad = pl.pallas_call(
        meta_learner_kernel,
        out_shape=(jax.ShapeDtypeStruct((Bp, LANES), jnp.float32),
                   jax.ShapeDtypeStruct((Bp, LANES), jnp.float32)),
        in_specs=[vmem] * len(args),
        out_specs=(vmem, vmem),
    )(*args)

    # Slice the real batch rows / valid lanes back out (pure layout).
    return regime_pad[:B, :3], adapt_pad[:B, :H]


# ------------------------ deterministic parameter init -------------------------
def init_params(key, input_size, hidden):
    bound = 1.0 / np.sqrt(hidden)
    keys = jax.random.split(key, 16)

    def u(k, shape):
        return jax.random.uniform(k, shape, jnp.float32, -bound, bound)

    H4 = 4 * hidden
    params = {
        # LSTM layer 0
        "wih0": u(keys[0], (H4, input_size)),
        "whh0": u(keys[1], (H4, hidden)),
        "b0": (u(keys[2], (1, H4)) + u(keys[3], (1, H4))),   # b_ih + b_hh
        # LSTM layer 1
        "wih1": u(keys[4], (H4, hidden)),
        "whh1": u(keys[5], (H4, hidden)),
        "b1": (u(keys[6], (1, H4)) + u(keys[7], (1, H4))),
        # market_classifier
        "wc": u(keys[8], (3, hidden)),
        "bc": u(keys[9], (1, 3)),
        # adaptation_network
        "wa1": u(keys[10], (hidden, hidden)),
        "ba1": u(keys[11], (1, hidden)),
        "wa2": u(keys[12], (hidden, hidden)),
        "ba2": u(keys[13], (1, hidden)),
    }
    return params


# --------------------------- pure-JAX reference --------------------------------
def reference_forward(x, params):
    B, T, _ = x.shape
    H = params["whh0"].shape[1]

    def layer(seq_in, wih, whh, b):
        h = jnp.zeros((B, H), jnp.float32)
        c = jnp.zeros((B, H), jnp.float32)
        outs = []
        for t in range(T):
            gates = _dot(seq_in[t], wih.T) + _dot(h, whh.T) + b
            i = jax.nn.sigmoid(gates[:, :H])
            f = jax.nn.sigmoid(gates[:, H:2 * H])
            g = jnp.tanh(gates[:, 2 * H:3 * H])
            o = jax.nn.sigmoid(gates[:, 3 * H:])
            c = f * c + i * g
            h = o * jnp.tanh(c)
            outs.append(h)
        return outs

    xs = [x[:, t, :] for t in range(T)]
    s0 = layer(xs, params["wih0"], params["whh0"], params["b0"])
    s1 = layer(s0, params["wih1"], params["whh1"], params["b1"])
    h_last = s1[-1]
    regime = _dot(h_last, params["wc"].T) + params["bc"]
    a = jnp.maximum(_dot(h_last, params["wa1"].T) + params["ba1"], 0.0)
    adapt = _dot(a, params["wa2"].T) + params["ba2"]
    return regime, adapt


# ---------------------------------- main ---------------------------------------
if __name__ == "__main__":
    key = jax.random.PRNGKey(0)
    k_x, k_m, k_p = jax.random.split(key, 3)

    x = jax.random.normal(k_x, (BATCH, SEQ, INPUT_SIZE), jnp.float32)
    market_data = jax.random.normal(k_m, (BATCH, SEQ, INPUT_SIZE), jnp.float32)
    params = init_params(k_p, INPUT_SIZE, HIDDEN)

    regime, adapt = market_meta_learner_forward(x, market_data, params)
    jax.block_until_ready((regime, adapt))

    ref_regime, ref_adapt = reference_forward(x, params)
    np.testing.assert_allclose(np.asarray(regime), np.asarray(ref_regime),
                               rtol=1e-4, atol=1e-4)
    np.testing.assert_allclose(np.asarray(adapt), np.asarray(ref_adapt),
                               rtol=1e-4, atol=1e-4)

    print("KERNEL_OK")
</pallas_src>

<mosaic_0001>
module attributes {stable_mosaic.version = 11 : i64} {
  func.func @meta_learner_kernel(%arg0: memref<64x4xf32, #tpu.memory_space<vmem>>, %arg1: memref<4x128xf32, #tpu.memory_space<vmem>>, %arg2: memref<32x128xf32, #tpu.memory_space<vmem>>, %arg3: memref<1x128xf32, #tpu.memory_space<vmem>>, %arg4: memref<32x128xf32, #tpu.memory_space<vmem>>, %arg5: memref<32x128xf32, #tpu.memory_space<vmem>>, %arg6: memref<1x128xf32, #tpu.memory_space<vmem>>, %arg7: memref<32x128xf32, #tpu.memory_space<vmem>>, %arg8: memref<1x128xf32, #tpu.memory_space<vmem>>, %arg9: memref<32x32xf32, #tpu.memory_space<vmem>>, %arg10: memref<1x32xf32, #tpu.memory_space<vmem>>, %arg11: memref<32x128xf32, #tpu.memory_space<vmem>>, %arg12: memref<1x128xf32, #tpu.memory_space<vmem>>, %arg13: memref<8x128xf32, #tpu.memory_space<vmem>>, %arg14: memref<8x128xf32, #tpu.memory_space<vmem>>) attributes {dimension_semantics = [], scalar_prefetch = 0 : i64, scratch_operands = 0 : i64, tpu.core_type = #tpu.core_type<tc>} {
    %c0 = arith.constant 0 : index
    %c0_0 = arith.constant 0 : index
    %0 = vector.load %arg2[%c0, %c0_0] : memref<32x128xf32, #tpu.memory_space<vmem>>, vector<32x128xf32>
    %c0_1 = arith.constant 0 : index
    %c0_2 = arith.constant 0 : index
    %1 = vector.load %arg4[%c0_1, %c0_2] : memref<32x128xf32, #tpu.memory_space<vmem>>, vector<32x128xf32>
    %c0_3 = arith.constant 0 : index
    %c0_4 = arith.constant 0 : index
    %2 = vector.load %arg5[%c0_3, %c0_4] : memref<32x128xf32, #tpu.memory_space<vmem>>, vector<32x128xf32>
    %c0_5 = arith.constant 0 : index
    %c0_6 = arith.constant 0 : index
    %3 = vector.load %arg6[%c0_5, %c0_6] : memref<1x128xf32, #tpu.memory_space<vmem>>, vector<1x128xf32>
    %4 = vector.shape_cast %3 : vector<1x128xf32> to vector<1x128xf32>
    %5 = vector.broadcast %4 : vector<1x128xf32> to vector<8x128xf32>
    %c0_7 = arith.constant 0 : index
    %c0_8 = arith.constant 0 : index
    %6 = vector.load %arg0[%c0_7, %c0_8] : memref<64x4xf32, #tpu.memory_space<vmem>>, vector<64x4xf32>
    %c0_9 = arith.constant 0 : index
    %c0_10 = arith.constant 0 : index
    %7 = vector.load %arg1[%c0_9, %c0_10] : memref<4x128xf32, #tpu.memory_space<vmem>>, vector<4x128xf32>
    %cst = arith.constant dense<0.000000e+00> : vector<64x128xf32>
    %8 = tpu.matmul %6, %7, %cst {dimension_numbers = #tpu.dot_dimension_numbers<[1], [0], [0], [1], [0, 0, 1, 1], [], []>, precision = #tpu.contract_precision<fp32>} : vector<64x4xf32>, vector<4x128xf32>, vector<64x128xf32> -> vector<64x128xf32>
    %c0_11 = arith.constant 0 : index
    %c0_12 = arith.constant 0 : index
    %9 = vector.load %arg3[%c0_11, %c0_12] : memref<1x128xf32, #tpu.memory_space<vmem>>, vector<1x128xf32>
    %10 = vector.broadcast %9 : vector<1x128xf32> to vector<64x128xf32>
    %11 = arith.addf %8, %10 : vector<64x128xf32>
    %cst_13 = arith.constant 0.000000e+00 : f32
    %12 = vector.broadcast %cst_13 : f32 to vector<8x32xf32>
    %cst_14 = arith.constant 0.000000e+00 : f32
    %13 = vector.broadcast %cst_14 : f32 to vector<8x32xf32>
    %cst_15 = arith.constant 0.000000e+00 : f32
    %14 = vector.broadcast %cst_15 : f32 to vector<8x32xf32>
    %cst_16 = arith.constant 0.000000e+00 : f32
    %15 = vector.broadcast %cst_16 : f32 to vector<8x32xf32>
    %16 = vector.extract_strided_slice %11 {offsets = [0, 0], sizes = [8, 128], strides = [1, 1]} : vector<64x128xf32> to vector<8x128xf32>
    %cst_17 = arith.constant dense<0.000000e+00> : vector<8x128xf32>
    %17 = tpu.matmul %12, %0, %cst_17 {dimension_numbers = #tpu.dot_dimension_numbers<[1], [0], [0], [1], [0, 0, 1, 1], [], []>, precision = #tpu.contract_precision<fp32>} : vector<8x32xf32>, vector<32x128xf32>, vector<8x128xf32> -> vector<8x128xf32>
    %18 = arith.addf %16, %17 : vector<8x128xf32>
    %19 = arith.negf %18 : vector<8x128xf32>
    %20 = math.exp %19 : vector<8x128xf32>
    %cst_18 = arith.constant 1.000000e+00 : f32
    %21 = vector.broadcast %cst_18 : f32 to vector<8x128xf32>
    %22 = arith.addf %21, %20 : vector<8x128xf32>
    %23 = arith.divf %21, %22 : vector<8x128xf32>
    %24 = math.tanh %18 : vector<8x128xf32>
    %25 = vector.extract_strided_slice %23 {offsets = [0, 0], sizes = [8, 32], strides = [1, 1]} : vector<8x128xf32> to vector<8x32xf32>
    %26 = vector.extract_strided_slice %23 {offsets = [0, 32], sizes = [8, 32], strides = [1, 1]} : vector<8x128xf32> to vector<8x32xf32>
    %27 = vector.extract_strided_slice %24 {offsets = [0, 64], sizes = [8, 32], strides = [1, 1]} : vector<8x128xf32> to vector<8x32xf32>
    %28 = vector.extract_strided_slice %23 {offsets = [0, 96], sizes = [8, 32], strides = [1, 1]} : vector<8x128xf32> to vector<8x32xf32>
    %29 = arith.mulf %26, %13 : vector<8x32xf32>
    %30 = arith.mulf %25, %27 : vector<8x32xf32>
    %31 = arith.addf %29, %30 : vector<8x32xf32>
    %32 = math.tanh %31 : vector<8x32xf32>
    %33 = arith.mulf %28, %32 : vector<8x32xf32>
    %34 = vector.extract_strided_slice %11 {offsets = [8, 0], sizes = [8, 128], strides = [1, 1]} : vector<64x128xf32> to vector<8x128xf32>
    %cst_19 = arith.constant dense<0.000000e+00> : vector<8x128xf32>
    %35 = tpu.matmul %33, %0, %cst_19 {dimension_numbers = #tpu.dot_dimension_numbers<[1], [0], [0], [1], [0, 0, 1, 1], [], []>, precision = #tpu.contract_precision<fp32>} : vector<8x32xf32>, vector<32x128xf32>, vector<8x128xf32> -> vector<8x128xf32>
    %36 = arith.addf %34, %35 : vector<8x128xf32>
    %37 = arith.negf %36 : vector<8x128xf32>
    %38 = math.exp %37 : vector<8x128xf32>
    %cst_20 = arith.constant 1.000000e+00 : f32
    %39 = vector.broadcast %cst_20 : f32 to vector<8x128xf32>
    %40 = arith.addf %39, %38 : vector<8x128xf32>
    %41 = arith.divf %39, %40 : vector<8x128xf32>
    %42 = math.tanh %36 : vector<8x128xf32>
    %43 = vector.extract_strided_slice %41 {offsets = [0, 0], sizes = [8, 32], strides = [1, 1]} : vector<8x128xf32> to vector<8x32xf32>
    %44 = vector.extract_strided_slice %41 {offsets = [0, 32], sizes = [8, 32], strides = [1, 1]} : vector<8x128xf32> to vector<8x32xf32>
    %45 = vector.extract_strided_slice %42 {offsets = [0, 64], sizes = [8, 32], strides = [1, 1]} : vector<8x128xf32> to vector<8x32xf32>
    %46 = vector.extract_strided_slice %41 {offsets = [0, 96], sizes = [8, 32], strides = [1, 1]} : vector<8x128xf32> to vector<8x32xf32>
    %47 = arith.mulf %44, %31 : vector<8x32xf32>
    %48 = arith.mulf %43, %45 : vector<8x32xf32>
    %49 = arith.addf %47, %48 : vector<8x32xf32>
    %50 = math.tanh %49 : vector<8x32xf32>
    %51 = arith.mulf %46, %50 : vector<8x32xf32>
    %cst_21 = arith.constant dense<0.000000e+00> : vector<8x128xf32>
    %52 = tpu.matmul %33, %1, %cst_21 {dimension_numbers = #tpu.dot_dimension_numbers<[1], [0], [0], [1], [0, 0, 1, 1], [], []>, precision = #tpu.contract_precision<fp32>} : vector<8x32xf32>, vector<32x128xf32>, vector<8x128xf32> -> vector<8x128xf32>
    %cst_22 = arith.constant dense<0.000000e+00> : vector<8x128xf32>
    %53 = tpu.matmul %14, %2, %cst_22 {dimension_numbers = #tpu.dot_dimension_numbers<[1], [0], [0], [1], [0, 0, 1, 1], [], []>, precision = #tpu.contract_precision<fp32>} : vector<8x32xf32>, vector<32x128xf32>, vector<8x128xf32> -> vector<8x128xf32>
    %54 = arith.addf %52, %53 : vector<8x128xf32>
    %55 = arith.addf %54, %5 : vector<8x128xf32>
    %56 = arith.negf %55 : vector<8x128xf32>
    %57 = math.exp %56 : vector<8x128xf32>
    %cst_23 = arith.constant 1.000000e+00 : f32
    %58 = vector.broadcast %cst_23 : f32 to vector<8x128xf32>
    %59 = arith.addf %58, %57 : vector<8x128xf32>
    %60 = arith.divf %58, %59 : vector<8x128xf32>
    %61 = math.tanh %55 : vector<8x128xf32>
    %62 = vector.extract_strided_slice %60 {offsets = [0, 0], sizes = [8, 32], strides = [1, 1]} : vector<8x128xf32> to vector<8x32xf32>
    %63 = vector.extract_strided_slice %60 {offsets = [0, 32], sizes = [8, 32], strides = [1, 1]} : vector<8x128xf32> to vector<8x32xf32>
    %64 = vector.extract_strided_slice %61 {offsets = [0, 64], sizes = [8, 32], strides = [1, 1]} : vector<8x128xf32> to vector<8x32xf32>
    %65 = vector.extract_strided_slice %60 {offsets = [0, 96], sizes = [8, 32], strides = [1, 1]} : vector<8x128xf32> to vector<8x32xf32>
    %66 = arith.mulf %63, %15 : vector<8x32xf32>
    %67 = arith.mulf %62, %64 : vector<8x32xf32>
    %68 = arith.addf %66, %67 : vector<8x32xf32>
    %69 = math.tanh %68 : vector<8x32xf32>
    %70 = arith.mulf %65, %69 : vector<8x32xf32>
    %71 = vector.extract_strided_slice %11 {offsets = [16, 0], sizes = [8, 128], strides = [1, 1]} : vector<64x128xf32> to vector<8x128xf32>
    %cst_24 = arith.constant dense<0.000000e+00> : vector<8x128xf32>
    %72 = tpu.matmul %51, %0, %cst_24 {dimension_numbers = #tpu.dot_dimension_numbers<[1], [0], [0], [1], [0, 0, 1, 1], [], []>, precision = #tpu.contract_precision<fp32>} : vector<8x32xf32>, vector<32x128xf32>, vector<8x128xf32> -> vector<8x128xf32>
    %73 = arith.addf %71, %72 : vector<8x128xf32>
    %74 = arith.negf %73 : vector<8x128xf32>
    %75 = math.exp %74 : vector<8x128xf32>
    %cst_25 = arith.constant 1.000000e+00 : f32
    %76 = vector.broadcast %cst_25 : f32 to vector<8x128xf32>
    %77 = arith.addf %76, %75 : vector<8x128xf32>
    %78 = arith.divf %76, %77 : vector<8x128xf32>
    %79 = math.tanh %73 : vector<8x128xf32>
    %80 = vector.extract_strided_slice %78 {offsets = [0, 0], sizes = [8, 32], strides = [1, 1]} : vector<8x128xf32> to vector<8x32xf32>
    %81 = vector.extract_strided_slice %78 {offsets = [0, 32], sizes = [8, 32], strides = [1, 1]} : vector<8x128xf32> to vector<8x32xf32>
    %82 = vector.extract_strided_slice %79 {offsets = [0, 64], sizes = [8, 32], strides = [1, 1]} : vector<8x128xf32> to vector<8x32xf32>
    %83 = vector.extract_strided_slice %78 {offsets = [0, 96], sizes = [8, 32], strides = [1, 1]} : vector<8x128xf32> to vector<8x32xf32>
    %84 = arith.mulf %81, %49 : vector<8x32xf32>
    %85 = arith.mulf %80, %82 : vector<8x32xf32>
    %86 = arith.addf %84, %85 : vector<8x32xf32>
    %87 = math.tanh %86 : vector<8x32xf32>
    %88 = arith.mulf %83, %87 : vector<8x32xf32>
    %cst_26 = arith.constant dense<0.000000e+00> : vector<8x128xf32>
    %89 = tpu.matmul %51, %1, %cst_26 {dimension_numbers = #tpu.dot_dimension_numbers<[1], [0], [0], [1], [0, 0, 1, 1], [], []>, precision = #tpu.contract_precision<fp32>} : vector<8x32xf32>, vector<32x128xf32>, vector<8x128xf32> -> vector<8x128xf32>
    %cst_27 = arith.constant dense<0.000000e+00> : vector<8x128xf32>
    %90 = tpu.matmul %70, %2, %cst_27 {dimension_numbers = #tpu.dot_dimension_numbers<[1], [0], [0], [1], [0, 0, 1, 1], [], []>, precision = #tpu.contract_precision<fp32>} : vector<8x32xf32>, vector<32x128xf32>, vector<8x128xf32> -> vector<8x128xf32>
    %91 = arith.addf %89, %90 : vector<8x128xf32>
    %92 = arith.addf %91, %5 : vector<8x128xf32>
    %93 = arith.negf %92 : vector<8x128xf32>
    %94 = math.exp %93 : vector<8x128xf32>
    %cst_28 = arith.constant 1.000000e+00 : f32
    %95 = vector.broadcast %cst_28 : f32 to vector<8x128xf32>
    %96 = arith.addf %95, %94 : vector<8x128xf32>
    %97 = arith.divf %95, %96 : vector<8x128xf32>
    %98 = math.tanh %92 : vector<8x128xf32>
    %99 = vector.extract_strided_slice %97 {offsets = [0, 0], sizes = [8, 32], strides = [1, 1]} : vector<8x128xf32> to vector<8x32xf32>
    %100 = vector.extract_strided_slice %97 {offsets = [0, 32], sizes = [8, 32], strides = [1, 1]} : vector<8x128xf32> to vector<8x32xf32>
    %101 = vector.extract_strided_slice %98 {offsets = [0, 64], sizes = [8, 32], strides = [1, 1]} : vector<8x128xf32> to vector<8x32xf32>
    %102 = vector.extract_strided_slice %97 {offsets = [0, 96], sizes = [8, 32], strides = [1, 1]} : vector<8x128xf32> to vector<8x32xf32>
    %103 = arith.mulf %100, %68 : vector<8x32xf32>
    %104 = arith.mulf %99, %101 : vector<8x32xf32>
    %105 = arith.addf %103, %104 : vector<8x32xf32>
    %106 = math.tanh %105 : vector<8x32xf32>
    %107 = arith.mulf %102, %106 : vector<8x32xf32>
    %108 = vector.extract_strided_slice %11 {offsets = [24, 0], sizes = [8, 128], strides = [1, 1]} : vector<64x128xf32> to vector<8x128xf32>
    %cst_29 = arith.constant dense<0.000000e+00> : vector<8x128xf32>
    %109 = tpu.matmul %88, %0, %cst_29 {dimension_numbers = #tpu.dot_dimension_numbers<[1], [0], [0], [1], [0, 0, 1, 1], [], []>, precision = #tpu.contract_precision<fp32>} : vector<8x32xf32>, vector<32x128xf32>, vector<8x128xf32> -> vector<8x128xf32>
    %110 = arith.addf %108, %109 : vector<8x128xf32>
    %111 = arith.negf %110 : vector<8x128xf32>
    %112 = math.exp %111 : vector<8x128xf32>
    %cst_30 = arith.constant 1.000000e+00 : f32
    %113 = vector.broadcast %cst_30 : f32 to vector<8x128xf32>
    %114 = arith.addf %113, %112 : vector<8x128xf32>
    %115 = arith.divf %113, %114 : vector<8x128xf32>
    %116 = math.tanh %110 : vector<8x128xf32>
    %117 = vector.extract_strided_slice %115 {offsets = [0, 0], sizes = [8, 32], strides = [1, 1]} : vector<8x128xf32> to vector<8x32xf32>
    %118 = vector.extract_strided_slice %115 {offsets = [0, 32], sizes = [8, 32], strides = [1, 1]} : vector<8x128xf32> to vector<8x32xf32>
    %119 = vector.extract_strided_slice %116 {offsets = [0, 64], sizes = [8, 32], strides = [1, 1]} : vector<8x128xf32> to vector<8x32xf32>
    %120 = vector.extract_strided_slice %115 {offsets = [0, 96], sizes = [8, 32], strides = [1, 1]} : vector<8x128xf32> to vector<8x32xf32>
    %121 = arith.mulf %118, %86 : vector<8x32xf32>
    %122 = arith.mulf %117, %119 : vector<8x32xf32>
    %123 = arith.addf %121, %122 : vector<8x32xf32>
    %124 = math.tanh %123 : vector<8x32xf32>
    %125 = arith.mulf %120, %124 : vector<8x32xf32>
    %cst_31 = arith.constant dense<0.000000e+00> : vector<8x128xf32>
    %126 = tpu.matmul %88, %1, %cst_31 {dimension_numbers = #tpu.dot_dimension_numbers<[1], [0], [0], [1], [0, 0, 1, 1], [], []>, precision = #tpu.contract_precision<fp32>} : vector<8x32xf32>, vector<32x128xf32>, vector<8x128xf32> -> vector<8x128xf32>
    %cst_32 = arith.constant dense<0.000000e+00> : vector<8x128xf32>
    %127 = tpu.matmul %107, %2, %cst_32 {dimension_numbers = #tpu.dot_dimension_numbers<[1], [0], [0], [1], [0, 0, 1, 1], [], []>, precision = #tpu.contract_precision<fp32>} : vector<8x32xf32>, vector<32x128xf32>, vector<8x128xf32> -> vector<8x128xf32>
    %128 = arith.addf %126, %127 : vector<8x128xf32>
    %129 = arith.addf %128, %5 : vector<8x128xf32>
    %130 = arith.negf %129 : vector<8x128xf32>
    %131 = math.exp %130 : vector<8x128xf32>
    %cst_33 = arith.constant 1.000000e+00 : f32
    %132 = vector.broadcast %cst_33 : f32 to vector<8x128xf32>
    %133 = arith.addf %132, %131 : vector<8x128xf32>
    %134 = arith.divf %132, %133 : vector<8x128xf32>
    %135 = math.tanh %129 : vector<8x128xf32>
    %136 = vector.extract_strided_slice %134 {offsets = [0, 0], sizes = [8, 32], strides = [1, 1]} : vector<8x128xf32> to vector<8x32xf32>
    %137 = vector.extract_strided_slice %134 {offsets = [0, 32], sizes = [8, 32], strides = [1, 1]} : vector<8x128xf32> to vector<8x32xf32>
    %138 = vector.extract_strided_slice %135 {offsets = [0, 64], sizes = [8, 32], strides = [1, 1]} : vector<8x128xf32> to vector<8x32xf32>
    %139 = vector.extract_strided_slice %134 {offsets = [0, 96], sizes = [8, 32], strides = [1, 1]} : vector<8x128xf32> to vector<8x32xf32>
    %140 = arith.mulf %137, %105 : vector<8x32xf32>
    %141 = arith.mulf %136, %138 : vector<8x32xf32>
    %142 = arith.addf %140, %141 : vector<8x32xf32>
    %143 = math.tanh %142 : vector<8x32xf32>
    %144 = arith.mulf %139, %143 : vector<8x32xf32>
    %145 = vector.extract_strided_slice %11 {offsets = [32, 0], sizes = [8, 128], strides = [1, 1]} : vector<64x128xf32> to vector<8x128xf32>
    %cst_34 = arith.constant dense<0.000000e+00> : vector<8x128xf32>
    %146 = tpu.matmul %125, %0, %cst_34 {dimension_numbers = #tpu.dot_dimension_numbers<[1], [0], [0], [1], [0, 0, 1, 1], [], []>, precision = #tpu.contract_precision<fp32>} : vector<8x32xf32>, vector<32x128xf32>, vector<8x128xf32> -> vector<8x128xf32>
    %147 = arith.addf %145, %146 : vector<8x128xf32>
    %148 = arith.negf %147 : vector<8x128xf32>
    %149 = math.exp %148 : vector<8x128xf32>
    %cst_35 = arith.constant 1.000000e+00 : f32
    %150 = vector.broadcast %cst_35 : f32 to vector<8x128xf32>
    %151 = arith.addf %150, %149 : vector<8x128xf32>
    %152 = arith.divf %150, %151 : vector<8x128xf32>
    %153 = math.tanh %147 : vector<8x128xf32>
    %154 = vector.extract_strided_slice %152 {offsets = [0, 0], sizes = [8, 32], strides = [1, 1]} : vector<8x128xf32> to vector<8x32xf32>
    %155 = vector.extract_strided_slice %152 {offsets = [0, 32], sizes = [8, 32], strides = [1, 1]} : vector<8x128xf32> to vector<8x32xf32>
    %156 = vector.extract_strided_slice %153 {offsets = [0, 64], sizes = [8, 32], strides = [1, 1]} : vector<8x128xf32> to vector<8x32xf32>
    %157 = vector.extract_strided_slice %152 {offsets = [0, 96], sizes = [8, 32], strides = [1, 1]} : vector<8x128xf32> to vector<8x32xf32>
    %158 = arith.mulf %155, %123 : vector<8x32xf32>
    %159 = arith.mulf %154, %156 : vector<8x32xf32>
    %160 = arith.addf %158, %159 : vector<8x32xf32>
    %161 = math.tanh %160 : vector<8x32xf32>
    %162 = arith.mulf %157, %161 : vector<8x32xf32>
    %cst_36 = arith.constant dense<0.000000e+00> : vector<8x128xf32>
    %163 = tpu.matmul %125, %1, %cst_36 {dimension_numbers = #tpu.dot_dimension_numbers<[1], [0], [0], [1], [0, 0, 1, 1], [], []>, precision = #tpu.contract_precision<fp32>} : vector<8x32xf32>, vector<32x128xf32>, vector<8x128xf32> -> vector<8x128xf32>
    %cst_37 = arith.constant dense<0.000000e+00> : vector<8x128xf32>
    %164 = tpu.matmul %144, %2, %cst_37 {dimension_numbers = #tpu.dot_dimension_numbers<[1], [0], [0], [1], [0, 0, 1, 1], [], []>, precision = #tpu.contract_precision<fp32>} : vector<8x32xf32>, vector<32x128xf32>, vector<8x128xf32> -> vector<8x128xf32>
    %165 = arith.addf %163, %164 : vector<8x128xf32>
    %166 = arith.addf %165, %5 : vector<8x128xf32>
    %167 = arith.negf %166 : vector<8x128xf32>
    %168 = math.exp %167 : vector<8x128xf32>
    %cst_38 = arith.constant 1.000000e+00 : f32
    %169 = vector.broadcast %cst_38 : f32 to vector<8x128xf32>
    %170 = arith.addf %169, %168 : vector<8x128xf32>
    %171 = arith.divf %169, %170 : vector<8x128xf32>
    %172 = math.tanh %166 : vector<8x128xf32>
    %173 = vector.extract_strided_slice %171 {offsets = [0, 0], sizes = [8, 32], strides = [1, 1]} : vector<8x128xf32> to vector<8x32xf32>
    %174 = vector.extract_strided_slice %171 {offsets = [0, 32], sizes = [8, 32], strides = [1, 1]} : vector<8x128xf32> to vector<8x32xf32>
    %175 = vector.extract_strided_slice %172 {offsets = [0, 64], sizes = [8, 32], strides = [1, 1]} : vector<8x128xf32> to vector<8x32xf32>
    %176 = vector.extract_strided_slice %171 {offsets = [0, 96], sizes = [8, 32], strides = [1, 1]} : vector<8x128xf32> to vector<8x32xf32>
    %177 = arith.mulf %174, %142 : vector<8x32xf32>
    %178 = arith.mulf %173, %175 : vector<8x32xf32>
    %179 = arith.addf %177, %178 : vector<8x32xf32>
    %180 = math.tanh %179 : vector<8x32xf32>
    %181 = arith.mulf %176, %180 : vector<8x32xf32>
    %182 = vector.extract_strided_slice %11 {offsets = [40, 0], sizes = [8, 128], strides = [1, 1]} : vector<64x128xf32> to vector<8x128xf32>
    %cst_39 = arith.constant dense<0.000000e+00> : vector<8x128xf32>
    %183 = tpu.matmul %162, %0, %cst_39 {dimension_numbers = #tpu.dot_dimension_numbers<[1], [0], [0], [1], [0, 0, 1, 1], [], []>, precision = #tpu.contract_precision<fp32>} : vector<8x32xf32>, vector<32x128xf32>, vector<8x128xf32> -> vector<8x128xf32>
    %184 = arith.addf %182, %183 : vector<8x128xf32>
    %185 = arith.negf %184 : vector<8x128xf32>
    %186 = math.exp %185 : vector<8x128xf32>
    %cst_40 = arith.constant 1.000000e+00 : f32
    %187 = vector.broadcast %cst_40 : f32 to vector<8x128xf32>
    %188 = arith.addf %187, %186 : vector<8x128xf32>
    %189 = arith.divf %187, %188 : vector<8x128xf32>
    %190 = math.tanh %184 : vector<8x128xf32>
    %191 = vector.extract_strided_slice %189 {offsets = [0, 0], sizes = [8, 32], strides = [1, 1]} : vector<8x128xf32> to vector<8x32xf32>
    %192 = vector.extract_strided_slice %189 {offsets = [0, 32], sizes = [8, 32], strides = [1, 1]} : vector<8x128xf32> to vector<8x32xf32>
    %193 = vector.extract_strided_slice %190 {offsets = [0, 64], sizes = [8, 32], strides = [1, 1]} : vector<8x128xf32> to vector<8x32xf32>
    %194 = vector.extract_strided_slice %189 {offsets = [0, 96], sizes = [8, 32], strides = [1, 1]} : vector<8x128xf32> to vector<8x32xf32>
    %195 = arith.mulf %192, %160 : vector<8x32xf32>
    %196 = arith.mulf %191, %193 : vector<8x32xf32>
    %197 = arith.addf %195, %196 : vector<8x32xf32>
    %198 = math.tanh %197 : vector<8x32xf32>
    %199 = arith.mulf %194, %198 : vector<8x32xf32>
    %cst_41 = arith.constant dense<0.000000e+00> : vector<8x128xf32>
    %200 = tpu.matmul %162, %1, %cst_41 {dimension_numbers = #tpu.dot_dimension_numbers<[1], [0], [0], [1], [0, 0, 1, 1], [], []>, precision = #tpu.contract_precision<fp32>} : vector<8x32xf32>, vector<32x128xf32>, vector<8x128xf32> -> vector<8x128xf32>
    %cst_42 = arith.constant dense<0.000000e+00> : vector<8x128xf32>
    %201 = tpu.matmul %181, %2, %cst_42 {dimension_numbers = #tpu.dot_dimension_numbers<[1], [0], [0], [1], [0, 0, 1, 1], [], []>, precision = #tpu.contract_precision<fp32>} : vector<8x32xf32>, vector<32x128xf32>, vector<8x128xf32> -> vector<8x128xf32>
    %202 = arith.addf %200, %201 : vector<8x128xf32>
    %203 = arith.addf %202, %5 : vector<8x128xf32>
    %204 = arith.negf %203 : vector<8x128xf32>
    %205 = math.exp %204 : vector<8x128xf32>
    %cst_43 = arith.constant 1.000000e+00 : f32
    %206 = vector.broadcast %cst_43 : f32 to vector<8x128xf32>
    %207 = arith.addf %206, %205 : vector<8x128xf32>
    %208 = arith.divf %206, %207 : vector<8x128xf32>
    %209 = math.tanh %203 : vector<8x128xf32>
    %210 = vector.extract_strided_slice %208 {offsets = [0, 0], sizes = [8, 32], strides = [1, 1]} : vector<8x128xf32> to vector<8x32xf32>
    %211 = vector.extract_strided_slice %208 {offsets = [0, 32], sizes = [8, 32], strides = [1, 1]} : vector<8x128xf32> to vector<8x32xf32>
    %212 = vector.extract_strided_slice %209 {offsets = [0, 64], sizes = [8, 32], strides = [1, 1]} : vector<8x128xf32> to vector<8x32xf32>
    %213 = vector.extract_strided_slice %208 {offsets = [0, 96], sizes = [8, 32], strides = [1, 1]} : vector<8x128xf32> to vector<8x32xf32>
    %214 = arith.mulf %211, %179 : vector<8x32xf32>
    %215 = arith.mulf %210, %212 : vector<8x32xf32>
    %216 = arith.addf %214, %215 : vector<8x32xf32>
    %217 = math.tanh %216 : vector<8x32xf32>
    %218 = arith.mulf %213, %217 : vector<8x32xf32>
    %219 = vector.extract_strided_slice %11 {offsets = [48, 0], sizes = [8, 128], strides = [1, 1]} : vector<64x128xf32> to vector<8x128xf32>
    %cst_44 = arith.constant dense<0.000000e+00> : vector<8x128xf32>
    %220 = tpu.matmul %199, %0, %cst_44 {dimension_numbers = #tpu.dot_dimension_numbers<[1], [0], [0], [1], [0, 0, 1, 1], [], []>, precision = #tpu.contract_precision<fp32>} : vector<8x32xf32>, vector<32x128xf32>, vector<8x128xf32> -> vector<8x128xf32>
    %221 = arith.addf %219, %220 : vector<8x128xf32>
    %222 = arith.negf %221 : vector<8x128xf32>
    %223 = math.exp %222 : vector<8x128xf32>
    %cst_45 = arith.constant 1.000000e+00 : f32
    %224 = vector.broadcast %cst_45 : f32 to vector<8x128xf32>
    %225 = arith.addf %224, %223 : vector<8x128xf32>
    %226 = arith.divf %224, %225 : vector<8x128xf32>
    %227 = math.tanh %221 : vector<8x128xf32>
    %228 = vector.extract_strided_slice %226 {offsets = [0, 0], sizes = [8, 32], strides = [1, 1]} : vector<8x128xf32> to vector<8x32xf32>
    %229 = vector.extract_strided_slice %226 {offsets = [0, 32], sizes = [8, 32], strides = [1, 1]} : vector<8x128xf32> to vector<8x32xf32>
    %230 = vector.extract_strided_slice %227 {offsets = [0, 64], sizes = [8, 32], strides = [1, 1]} : vector<8x128xf32> to vector<8x32xf32>
    %231 = vector.extract_strided_slice %226 {offsets = [0, 96], sizes = [8, 32], strides = [1, 1]} : vector<8x128xf32> to vector<8x32xf32>
    %232 = arith.mulf %229, %197 : vector<8x32xf32>
    %233 = arith.mulf %228, %230 : vector<8x32xf32>
    %234 = arith.addf %232, %233 : vector<8x32xf32>
    %235 = math.tanh %234 : vector<8x32xf32>
    %236 = arith.mulf %231, %235 : vector<8x32xf32>
    %cst_46 = arith.constant dense<0.000000e+00> : vector<8x128xf32>
    %237 = tpu.matmul %199, %1, %cst_46 {dimension_numbers = #tpu.dot_dimension_numbers<[1], [0], [0], [1], [0, 0, 1, 1], [], []>, precision = #tpu.contract_precision<fp32>} : vector<8x32xf32>, vector<32x128xf32>, vector<8x128xf32> -> vector<8x128xf32>
    %cst_47 = arith.constant dense<0.000000e+00> : vector<8x128xf32>
    %238 = tpu.matmul %218, %2, %cst_47 {dimension_numbers = #tpu.dot_dimension_numbers<[1], [0], [0], [1], [0, 0, 1, 1], [], []>, precision = #tpu.contract_precision<fp32>} : vector<8x32xf32>, vector<32x128xf32>, vector<8x128xf32> -> vector<8x128xf32>
    %239 = arith.addf %237, %238 : vector<8x128xf32>
    %240 = arith.addf %239, %5 : vector<8x128xf32>
    %241 = arith.negf %240 : vector<8x128xf32>
    %242 = math.exp %241 : vector<8x128xf32>
    %cst_48 = arith.constant 1.000000e+00 : f32
    %243 = vector.broadcast %cst_48 : f32 to vector<8x128xf32>
    %244 = arith.addf %243, %242 : vector<8x128xf32>
    %245 = arith.divf %243, %244 : vector<8x128xf32>
    %246 = math.tanh %240 : vector<8x128xf32>
    %247 = vector.extract_strided_slice %245 {offsets = [0, 0], sizes = [8, 32], strides = [1, 1]} : vector<8x128xf32> to vector<8x32xf32>
    %248 = vector.extract_strided_slice %245 {offsets = [0, 32], sizes = [8, 32], strides = [1, 1]} : vector<8x128xf32> to vector<8x32xf32>
    %249 = vector.extract_strided_slice %246 {offsets = [0, 64], sizes = [8, 32], strides = [1, 1]} : vector<8x128xf32> to vector<8x32xf32>
    %250 = vector.extract_strided_slice %245 {offsets = [0, 96], sizes = [8, 32], strides = [1, 1]} : vector<8x128xf32> to vector<8x32xf32>
    %251 = arith.mulf %248, %216 : vector<8x32xf32>
    %252 = arith.mulf %247, %249 : vector<8x32xf32>
    %253 = arith.addf %251, %252 : vector<8x32xf32>
    %254 = math.tanh %253 : vector<8x32xf32>
    %255 = arith.mulf %250, %254 : vector<8x32xf32>
    %256 = vector.extract_strided_slice %11 {offsets = [56, 0], sizes = [8, 128], strides = [1, 1]} : vector<64x128xf32> to vector<8x128xf32>
    %cst_49 = arith.constant dense<0.000000e+00> : vector<8x128xf32>
    %257 = tpu.matmul %236, %0, %cst_49 {dimension_numbers = #tpu.dot_dimension_numbers<[1], [0], [0], [1], [0, 0, 1, 1], [], []>, precision = #tpu.contract_precision<fp32>} : vector<8x32xf32>, vector<32x128xf32>, vector<8x128xf32> -> vector<8x128xf32>
    %258 = arith.addf %256, %257 : vector<8x128xf32>
    %259 = arith.negf %258 : vector<8x128xf32>
    %260 = math.exp %259 : vector<8x128xf32>
    %cst_50 = arith.constant 1.000000e+00 : f32
    %261 = vector.broadcast %cst_50 : f32 to vector<8x128xf32>
    %262 = arith.addf %261, %260 : vector<8x128xf32>
    %263 = arith.divf %261, %262 : vector<8x128xf32>
    %264 = math.tanh %258 : vector<8x128xf32>
    %265 = vector.extract_strided_slice %263 {offsets = [0, 0], sizes = [8, 32], strides = [1, 1]} : vector<8x128xf32> to vector<8x32xf32>
    %266 = vector.extract_strided_slice %263 {offsets = [0, 32], sizes = [8, 32], strides = [1, 1]} : vector<8x128xf32> to vector<8x32xf32>
    %267 = vector.extract_strided_slice %264 {offsets = [0, 64], sizes = [8, 32], strides = [1, 1]} : vector<8x128xf32> to vector<8x32xf32>
    %268 = vector.extract_strided_slice %263 {offsets = [0, 96], sizes = [8, 32], strides = [1, 1]} : vector<8x128xf32> to vector<8x32xf32>
    %269 = arith.mulf %266, %234 : vector<8x32xf32>
    %270 = arith.mulf %265, %267 : vector<8x32xf32>
    %271 = arith.addf %269, %270 : vector<8x32xf32>
    %272 = math.tanh %271 : vector<8x32xf32>
    %273 = arith.mulf %268, %272 : vector<8x32xf32>
    %cst_51 = arith.constant dense<0.000000e+00> : vector<8x128xf32>
    %274 = tpu.matmul %236, %1, %cst_51 {dimension_numbers = #tpu.dot_dimension_numbers<[1], [0], [0], [1], [0, 0, 1, 1], [], []>, precision = #tpu.contract_precision<fp32>} : vector<8x32xf32>, vector<32x128xf32>, vector<8x128xf32> -> vector<8x128xf32>
    %cst_52 = arith.constant dense<0.000000e+00> : vector<8x128xf32>
    %275 = tpu.matmul %255, %2, %cst_52 {dimension_numbers = #tpu.dot_dimension_numbers<[1], [0], [0], [1], [0, 0, 1, 1], [], []>, precision = #tpu.contract_precision<fp32>} : vector<8x32xf32>, vector<32x128xf32>, vector<8x128xf32> -> vector<8x128xf32>
    %276 = arith.addf %274, %275 : vector<8x128xf32>
    %277 = arith.addf %276, %5 : vector<8x128xf32>
    %278 = arith.negf %277 : vector<8x128xf32>
    %279 = math.exp %278 : vector<8x128xf32>
    %cst_53 = arith.constant 1.000000e+00 : f32
    %280 = vector.broadcast %cst_53 : f32 to vector<8x128xf32>
    %281 = arith.addf %280, %279 : vector<8x128xf32>
    %282 = arith.divf %280, %281 : vector<8x128xf32>
    %283 = math.tanh %277 : vector<8x128xf32>
    %284 = vector.extract_strided_slice %282 {offsets = [0, 0], sizes = [8, 32], strides = [1, 1]} : vector<8x128xf32> to vector<8x32xf32>
    %285 = vector.extract_strided_slice %282 {offsets = [0, 32], sizes = [8, 32], strides = [1, 1]} : vector<8x128xf32> to vector<8x32xf32>
    %286 = vector.extract_strided_slice %283 {offsets = [0, 64], sizes = [8, 32], strides = [1, 1]} : vector<8x128xf32> to vector<8x32xf32>
    %287 = vector.extract_strided_slice %282 {offsets = [0, 96], sizes = [8, 32], strides = [1, 1]} : vector<8x128xf32> to vector<8x32xf32>
    %288 = arith.mulf %285, %253 : vector<8x32xf32>
    %289 = arith.mulf %284, %286 : vector<8x32xf32>
    %290 = arith.addf %288, %289 : vector<8x32xf32>
    %291 = math.tanh %290 : vector<8x32xf32>
    %292 = arith.mulf %287, %291 : vector<8x32xf32>
    %cst_54 = arith.constant dense<0.000000e+00> : vector<8x128xf32>
    %293 = tpu.matmul %273, %1, %cst_54 {dimension_numbers = #tpu.dot_dimension_numbers<[1], [0], [0], [1], [0, 0, 1, 1], [], []>, precision = #tpu.contract_precision<fp32>} : vector<8x32xf32>, vector<32x128xf32>, vector<8x128xf32> -> vector<8x128xf32>
    %cst_55 = arith.constant dense<0.000000e+00> : vector<8x128xf32>
    %294 = tpu.matmul %292, %2, %cst_55 {dimension_numbers = #tpu.dot_dimension_numbers<[1], [0], [0], [1], [0, 0, 1, 1], [], []>, precision = #tpu.contract_precision<fp32>} : vector<8x32xf32>, vector<32x128xf32>, vector<8x128xf32> -> vector<8x128xf32>
    %295 = arith.addf %293, %294 : vector<8x128xf32>
    %296 = arith.addf %295, %5 : vector<8x128xf32>
    %297 = arith.negf %296 : vector<8x128xf32>
    %298 = math.exp %297 : vector<8x128xf32>
    %cst_56 = arith.constant 1.000000e+00 : f32
    %299 = vector.broadcast %cst_56 : f32 to vector<8x128xf32>
    %300 = arith.addf %299, %298 : vector<8x128xf32>
    %301 = arith.divf %299, %300 : vector<8x128xf32>
    %302 = math.tanh %296 : vector<8x128xf32>
    %303 = vector.extract_strided_slice %301 {offsets = [0, 0], sizes = [8, 32], strides = [1, 1]} : vector<8x128xf32> to vector<8x32xf32>
    %304 = vector.extract_strided_slice %301 {offsets = [0, 32], sizes = [8, 32], strides = [1, 1]} : vector<8x128xf32> to vector<8x32xf32>
    %305 = vector.extract_strided_slice %302 {offsets = [0, 64], sizes = [8, 32], strides = [1, 1]} : vector<8x128xf32> to vector<8x32xf32>
    %306 = vector.extract_strided_slice %301 {offsets = [0, 96], sizes = [8, 32], strides = [1, 1]} : vector<8x128xf32> to vector<8x32xf32>
    %307 = arith.mulf %304, %290 : vector<8x32xf32>
    %308 = arith.mulf %303, %305 : vector<8x32xf32>
    %309 = arith.addf %307, %308 : vector<8x32xf32>
    %310 = math.tanh %309 : vector<8x32xf32>
    %311 = arith.mulf %306, %310 : vector<8x32xf32>
    %c0_57 = arith.constant 0 : index
    %c0_58 = arith.constant 0 : index
    %312 = vector.load %arg7[%c0_57, %c0_58] : memref<32x128xf32, #tpu.memory_space<vmem>>, vector<32x128xf32>
    %cst_59 = arith.constant dense<0.000000e+00> : vector<8x128xf32>
    %313 = tpu.matmul %311, %312, %cst_59 {dimension_numbers = #tpu.dot_dimension_numbers<[1], [0], [0], [1], [0, 0, 1, 1], [], []>, precision = #tpu.contract_precision<fp32>} : vector<8x32xf32>, vector<32x128xf32>, vector<8x128xf32> -> vector<8x128xf32>
    %c0_60 = arith.constant 0 : index
    %c0_61 = arith.constant 0 : index
    %314 = vector.load %arg8[%c0_60, %c0_61] : memref<1x128xf32, #tpu.memory_space<vmem>>, vector<1x128xf32>
    %315 = vector.broadcast %314 : vector<1x128xf32> to vector<8x128xf32>
    %316 = arith.addf %313, %315 : vector<8x128xf32>
    %c0_62 = arith.constant 0 : index
    %c0_63 = arith.constant 0 : index
    %317 = vector.load %arg13[%c0_62, %c0_63] : memref<8x128xf32, #tpu.memory_space<vmem>>, vector<8x128xf32>
    tpu.vector_store %arg13[%c0_62, %c0_63], %316 {strides = array<i32>} : memref<8x128xf32, #tpu.memory_space<vmem>>, vector<8x128xf32>,
    %c0_64 = arith.constant 0 : index
    %c0_65 = arith.constant 0 : index
    %318 = vector.load %arg9[%c0_64, %c0_65] : memref<32x32xf32, #tpu.memory_space<vmem>>, vector<32x32xf32>
    %cst_66 = arith.constant dense<0.000000e+00> : vector<8x32xf32>
    %319 = tpu.matmul %311, %318, %cst_66 {dimension_numbers = #tpu.dot_dimension_numbers<[1], [0], [0], [1], [0, 0, 1, 1], [], []>, precision = #tpu.contract_precision<fp32>} : vector<8x32xf32>, vector<32x32xf32>, vector<8x32xf32> -> vector<8x32xf32>
    %c0_67 = arith.constant 0 : index
    %c0_68 = arith.constant 0 : index
    %320 = vector.load %arg10[%c0_67, %c0_68] : memref<1x32xf32, #tpu.memory_space<vmem>>, vector<1x32xf32>
    %321 = vector.broadcast %320 : vector<1x32xf32> to vector<8x32xf32>
    %322 = arith.addf %319, %321 : vector<8x32xf32>
    %cst_69 = arith.constant 0.000000e+00 : f32
    %323 = vector.broadcast %cst_69 : f32 to vector<8x32xf32>
    %324 = arith.maximumf %322, %323 : vector<8x32xf32>
    %c0_70 = arith.constant 0 : index
    %c0_71 = arith.constant 0 : index
    %325 = vector.load %arg11[%c0_70, %c0_71] : memref<32x128xf32, #tpu.memory_space<vmem>>, vector<32x128xf32>
    %cst_72 = arith.constant dense<0.000000e+00> : vector<8x128xf32>
    %326 = tpu.matmul %324, %325, %cst_72 {dimension_numbers = #tpu.dot_dimension_numbers<[1], [0], [0], [1], [0, 0, 1, 1], [], []>, precision = #tpu.contract_precision<fp32>} : vector<8x32xf32>, vector<32x128xf32>, vector<8x128xf32> -> vector<8x128xf32>
    %c0_73 = arith.constant 0 : index
    %c0_74 = arith.constant 0 : index
    %327 = vector.load %arg12[%c0_73, %c0_74] : memref<1x128xf32, #tpu.memory_space<vmem>>, vector<1x128xf32>
    %328 = vector.broadcast %327 : vector<1x128xf32> to vector<8x128xf32>
    %329 = arith.addf %326, %328 : vector<8x128xf32>
    %c0_75 = arith.constant 0 : index
    %c0_76 = arith.constant 0 : index
    %330 = vector.load %arg14[%c0_75, %c0_76] : memref<8x128xf32, #tpu.memory_space<vmem>>, vector<8x128xf32>
    tpu.vector_store %arg14[%c0_75, %c0_76], %329 {strides = array<i32>} : memref<8x128xf32, #tpu.memory_space<vmem>>, vector<8x128xf32>,
    return
  }
}

</mosaic_0001>

<bundles_post_ra>
// kernel: tpu_custom_call.1
= control target key start
LH: loop header
LB: loop body
LE: loop exit
PB: predicated region body
PF: predicated region fallthrough
CT: control target
= control target key end

     0   :  { %20 = vsyncpa [#allocation3], 0  ;;  %s20604_s0 = inlined_call_operand.vmem [shape: f32[64,4], index: 0, kind: input, shape index: {}]   ;;  %s20605_s1 = inlined_call_operand.hbm [shape: f32[4,128], index: 1, kind: input, shape index: {}]   ;;  %s20606_s2 = inlined_call_operand.vmem [shape: f32[32,128], index: 2, kind: input, shape index: {}]   ;;  %s20607_s3 = inlined_call_operand.vmem [shape: f32[1,128], index: 3, kind: input, shape index: {}]   ;;  %s20608_s4 = inlined_call_operand.vmem [shape: f32[32,128], index: 4, kind: input, shape index: {}]   ;;  %s20609_s5 = inlined_call_operand.hbm [shape: f32[32,128], index: 5, kind: input, shape index: {}]   ;;  %s20610_s6 = inlined_call_operand.vmem [shape: f32[1,128], index: 6, kind: input, shape index: {}]   ;;  %s20611_s7 = inlined_call_operand.hbm [shape: f32[32,128], index: 7, kind: input, shape index: {}]   ;;  %s20612_s8 = inlined_call_operand.hbm [shape: f32[1,128], index: 8, kind: input, shape index: {}]   ;;  %s20613_s9 = inlined_call_operand.vmem [shape: f32[32,32], index: 9, kind: input, shape index: {}]   ;;  %s20614_s10 = inlined_call_operand.vmem [shape: f32[1,32], index: 10, kind: input, shape index: {}]   ;;  %s20615_s11 = inlined_call_operand.hbm [shape: f32[32,128], index: 11, kind: input, shape index: {}]   ;;  %s20616_s12 = inlined_call_operand.vmem [shape: f32[1,128], index: 12, kind: input, shape index: {}]   ;;  %s20617_s13 = inlined_call_operand.hbm [shape: f32[8,128], index: 13, kind: output, shape index: {0}]   ;;  %s20618_s14 = inlined_call_operand.hbm [shape: f32[8,128], index: 14, kind: output, shape index: {1}]  }
   0x1   :  { %21 = vsyncpa [#allocation6], 0 }
   0x2   :  { %22 = vsyncpa [#allocation9], 0 }
   0x3   :  { %23 = vsyncpa [#allocation4], 0 }
   0x4   :  { %24 = vsyncpa [#allocation13], 0  ;;  %s18766_s29 = smov [#allocation5]   ;;  %s18602_s17 = scalar_lea.hbm %s20609_s5, 512 }
   0x5   :  { %s48_s30 = sshll.u32 %s18766_s29, 4  ;;  %p18603_p0 = scmp.ne.s32.totalorder %s20609_s5, %s18602_s17  ;;  %s49_s30 = int_to_ptr.vmem [resolvable:$true] %s48_s30 }
   0x6   :  { %p18606_p1 = scmp.lt.u32.totalorder %s18602_s17, %s20609_s5 }
   0x8   :  { %p18608_p2 = pnand %p18606_p1, %p18603_p0 }
   0xa   :  { %18611 = shalt.err (!%p18608_p2)
}
   0xb   :  { %s18612_s22 = scalar_lea.vmem %s49_s30, 512  ;;  %p18617_p4 = scmp.lt.s32.totalorder %s49_s30, %s49_s30 }
   0xc   :  { %p18613_p3 = scmp.ne.s32.totalorder %s49_s30, %s18612_s22  ;;  %p18618_p5 = scmp.lt.s32.totalorder %s18612_s22, %s18612_s22 }
   0xe   :  { %p18619_p6 = por %p18618_p5, %p18617_p4 }
  0x10   :  { %p18620_p7 = pnand %p18619_p6, %p18613_p3 }
  0x12   :  { %18623 = shalt.err (!%p18620_p7)
}
  0x13   :  { %s18767_s23 = smov 128   ;;  %s18768_s24 = smov 8  }
  0x14   :  { %54 = dma.hbm_to_vmem [thread:$0]  %s20609_s5, 512, %s49_s30, [#allocation6], %s18767_s23, %s18767_s23, %s18768_s24  }
  0x15   :  { %s18769_s27 = smov [#allocation8]   ;;  %s18770_s29 = smov [#allocation2]  }
  0x16   :  { %s75_s28 = sshll.u32 %s18769_s27, 4  ;;  %s33_s15 = sshll.u32 %s18770_s29, 4  ;;  %s76_s28 = int_to_ptr.vmem [resolvable:$true] %s75_s28  ;;  %s34_s15 = int_to_ptr.vmem [resolvable:$true] %s33_s15 }
  0x17   :  { %s18624_s18 = scalar_lea.hbm %s20612_s8, 16 }
  0x18   :  { %p18625_p8 = scmp.ne.s32.totalorder %s20612_s8, %s18624_s18  ;;  %p18628_p9 = scmp.lt.u32.totalorder %s18624_s18, %s20612_s8 }
  0x1a   :  { %p18630_p10 = pnand %p18628_p9, %p18625_p8 }
  0x1c   :  { %18633 = shalt.err (!%p18630_p10)
}
  0x1d   :  { %s18634_s5 = scalar_lea.vmem %s76_s28, 16  ;;  %s18638_s30 = scalar_lea.vmem %s76_s28, 32 }
  0x1e   :  { %p18635_p11 = scmp.ne.s32.totalorder %s76_s28, %s18634_s5  ;;  %p18639_p12 = scmp.lt.s32.totalorder %s76_s28, %s76_s28 }
  0x1f   :  { %p18640_p13 = scmp.lt.s32.totalorder %s18638_s30, %s18634_s5 }
  0x21   :  { %p18641_p0 = por %p18640_p13, %p18639_p12 }
  0x23   :  { %p18642_p1 = pnand %p18641_p0, %p18635_p11 }
  0x25   :  { %18645 = shalt.err (!%p18642_p1)
}
  0x26   :  { %78 = dma.hbm_to_vmem [thread:$0]  %s20612_s8, 16, %s76_s28, [#allocation9]  }
  0x27   :  { %s18646_s16 = scalar_lea.hbm %s20605_s1, 64 }
  0x28   :  { %p18647_p2 = scmp.ne.s32.totalorder %s20605_s1, %s18646_s16  ;;  %p18650_p3 = scmp.lt.u32.totalorder %s18646_s16, %s20605_s1 }
  0x2a   :  { %p18652_p4 = pnand %p18650_p3, %p18647_p2 }
  0x2c   :  { %18655 = shalt.err (!%p18652_p4)
}
  0x2d   :  { %s18656_s21 = scalar_lea.vmem %s34_s15, 64  ;;  %p18661_p6 = scmp.lt.s32.totalorder %s34_s15, %s34_s15 }
  0x2e   :  { %p18657_p5 = scmp.ne.s32.totalorder %s34_s15, %s18656_s21  ;;  %p18662_p7 = scmp.lt.s32.totalorder %s18656_s21, %s18656_s21 }
  0x30   :  { %p18663_p8 = por %p18662_p7, %p18661_p6 }
  0x32   :  { %p18664_p9 = pnand %p18663_p8, %p18657_p5 }
  0x34   :  { %18667 = shalt.err (!%p18664_p9)
}
  0x35   :  { %36 = dma.hbm_to_vmem [thread:$0]  %s20605_s1, 64, %s34_s15, [#allocation3]  }
  0x36   :  { %s18771_s22 = smov [#allocation7]   ;;  %s18772_s30 = smov [#allocation10]  }
  0x37   :  { %s62_s5 = sshll.u32 %s18771_s22, 4  ;;  %s88_s25 = sshll.u32 %s18772_s30, 4  ;;  %s63_s5 = int_to_ptr.vmem [resolvable:$true] %s62_s5  ;;  %s89_s25 = int_to_ptr.vmem [resolvable:$true] %s88_s25 }
  0x38   :  { %s18668_s29 = scalar_lea.hbm %s20611_s7, 512 }
  0x39   :  { %p18669_p10 = scmp.ne.s32.totalorder %s20611_s7, %s18668_s29  ;;  %p18672_p11 = scmp.lt.u32.totalorder %s18668_s29, %s20611_s7 }
  0x3b   :  { %p18674_p12 = pnand %p18672_p11, %p18669_p10 }
  0x3d   :  { %18677 = shalt.err (!%p18674_p12)
}
  0x3e   :  { %s18678_s1 = scalar_lea.vmem %s63_s5, 512  ;;  %p18683_p0 = scmp.lt.s32.totalorder %s63_s5, %s63_s5 }
  0x3f   :  { %p18679_p13 = scmp.ne.s32.totalorder %s63_s5, %s18678_s1  ;;  %p18684_p1 = scmp.lt.s32.totalorder %s18678_s1, %s18678_s1 }
  0x41   :  { %p18685_p2 = por %p18684_p1, %p18683_p0 }
  0x43   :  { %p18686_p3 = pnand %p18685_p2, %p18679_p13 }
  0x45   :  { %18689 = shalt.err (!%p18686_p3)
}
  0x46   :  { %68 = dma.hbm_to_vmem [thread:$0]  %s20611_s7, 512, %s63_s5, [#allocation6], %s18767_s23, %s18767_s23, %s18768_s24  }
  0x47   :  { %s18690_s28 = scalar_lea.hbm %s20615_s11, 512 }
  0x48   :  { %p18691_p4 = scmp.ne.s32.totalorder %s20615_s11, %s18690_s28  ;;  %p18694_p5 = scmp.lt.u32.totalorder %s18690_s28, %s20615_s11 }
  0x4a   :  { %p18696_p6 = pnand %p18694_p5, %p18691_p4 }
  0x4c   :  { %18699 = shalt.err (!%p18696_p6)
}
  0x4d   :  { %s18700_s29 = scalar_lea.vmem %s89_s25, 512  ;;  %p18705_p8 = scmp.lt.s32.totalorder %s89_s25, %s89_s25 }
  0x4e   :  { %p18701_p7 = scmp.ne.s32.totalorder %s89_s25, %s18700_s29  ;;  %p18706_p9 = scmp.lt.s32.totalorder %s18700_s29, %s18700_s29 }
  0x50   :  { %p18707_p10 = por %p18706_p9, %p18705_p8 }
  0x52   :  { %p18708_p11 = pnand %p18707_p10, %p18701_p7 }
  0x54   :  { %18711 = shalt.err (!%p18708_p11)
}
  0x55   :  { %94 = dma.hbm_to_vmem [thread:$0]  %s20615_s11, 512, %s89_s25, [#allocation9], %s18767_s23, %s18767_s23, %s18768_s24  }
  0x56   :  { %18756 = dma.done.wait [#allocation3], 64  }
  0x57   :  { %18757 = vsyncadd [#allocation3], 4294967232 }
  0x58   :  { %18758 = dma.done.wait [#allocation6], 1024  }
  0x59   :  { %18759 = vsyncadd [#allocation6], 4294966272 }
  0x5a   :  { %18760 = dma.done.wait [#allocation9], 528  }
  0x5b   :  { %18761 = vsyncadd [#allocation9], 4294966768  ;;  %vm172_vm0 = vcmask 1043456   ;;  %vm147_vm1 = vcmask 31744   ;;  %v139_v0 = vld [vmem:[#allocation2] sm:$0xf] }
  0x5c   :  { %v131_v1 = vld [vmem:[%s20604_s0] sm:$0xff]  ;;  %v132_v2 = vld [vmem:[%s20604_s0 + $0x8] sm:$0xff]  ;;  %v174_v3 = vsel %vm172_vm0, %v139_v0, 0  ;;  %v133_v6 = vld [vmem:[%s20604_s0 + $0x10] sm:$0xff]  ;;  %vm18774_vm2 = vmmov 0   ;;  %s18777_s19 = smov 32  }
  0x5d   :  { %v149_v4 = vsel %vm147_vm1, %v131_v1, 0  ;;  %v152_v5 = vsel %vm147_vm1, %v132_v2, 0  ;;  %v134_v7 = vld [vmem:[%s20604_s0 + $0x18] sm:$0xff]  ;;  %v135_v8 = vld [vmem:[%s20604_s0 + $0x20] sm:$0xff]  ;;  %v18941_v9 = vand.u32 4294901760, %v174_v3  ;;  %v155_v12 = vsel %vm147_vm1, %v133_v6, 0 }
  0x5e   :  { %v18943_v10 = vand.u32 4294901760, %v149_v4  ;;  %v18945_v11 = vand.u32 4294901760, %v152_v5  ;;  %v136_v13 = vld [vmem:[%s20604_s0 + $0x28] sm:$0xff]  ;;  %v137_v14 = vld [vmem:[%s20604_s0 + $0x30] sm:$0xff]  ;;  %v18954_v15 = vand.u32 4294901760, %v155_v12  ;;  %v158_v16 = vsel %vm147_vm1, %v134_v7, 0 }
  0x5f   :  { %v161_v17 = vsel %vm147_vm1, %v135_v8, 0  ;;  %v164_v18 = vsel %vm147_vm1, %v136_v13, 0  ;;  %15457 = vmatprep.subr.mxu1 %v18941_v9  ;;  %v324_v20 = vsub.f32 %v174_v3, %v18941_v9  ;;  %v18968_v22 = vand.u32 4294901760, %v158_v16  ;;  %v138_v43 = vld [vmem:[%s20604_s0 + $0x38] sm:$0xff]  ;;  %v112_v51 = vld [vmem:[%s20606_s2] sm:$0xff]  ;;  %v113_v52 = vld [vmem:[%s20606_s2 + $0x8] sm:$0xff] }
  0x60   :  { %v18961_v19 = vsub.f32 %v149_v4, %v18943_v10  ;;  %v18965_v21 = vsub.f32 %v152_v5, %v18945_v11  ;;  %15473 = vmatprep.mubr.f32.mxu0 %v18943_v10  ;;  %15458 = vmatpush3.msra.mxu1 %v18941_v9  ;;  %v18972_v23 = vsub.f32 %v155_v12, %v18954_v15  ;;  %v18974_v24 = vand.u32 4294901760, %v161_v17  ;;  %v114_v61 = vld [vmem:[%s20606_s2 + $0x10] sm:$0xff]  ;;  %v115_v63 = vld [vmem:[%s20606_s2 + $0x18] sm:$0xff] }
  0x61   :  { %v18976_v25 = vand.u32 4294901760, %v164_v18  ;;  %v167_v26 = vsel %vm147_vm1, %v137_v14, 0  ;;  %v18980_v28 = vand.u32 4294901760, %v324_v20  ;;  %v18984_v30 = vsub.f32 %v158_v16, %v18968_v22 }
  0x62   :  { %v244_v27 = vand.u32 4294901760, %v18961_v19  ;;  %v254_v29 = vand.u32 4294901760, %v18965_v21  ;;  %v264_v31 = vand.u32 4294901760, %v18972_v23  ;;  %v18988_v32 = vsub.f32 %v161_v17, %v18974_v24 }
  0x63   :  { %v18991_v33 = vsub.f32 %v164_v18, %v18976_v25  ;;  %v18993_v34 = vand.u32 4294901760, %v167_v26  ;;  %v326_v36 = vsub.f32 %v324_v20, %v18980_v28  ;;  %v274_v38 = vand.u32 4294901760, %v18984_v30 }
  0x64   :  { %v245_v35 = vsub.f32 %v18961_v19, %v244_v27  ;;  %v255_v37 = vsub.f32 %v18965_v21, %v254_v29  ;;  %v265_v39 = vsub.f32 %v18972_v23, %v264_v31  ;;  %v284_v40 = vand.u32 4294901760, %v18988_v32 }
  0x65   :  { %v294_v41 = vand.u32 4294901760, %v18991_v33  ;;  %v19009_v42 = vsub.f32 %v167_v26, %v18993_v34  ;;  %v327_v45 = vand.u32 4294901760, %v326_v36  ;;  %v275_v47 = vsub.f32 %v18984_v30, %v274_v38 }
  0x66   :  { %v246_v44 = vand.u32 4294901760, %v245_v35  ;;  %v256_v46 = vand.u32 4294901760, %v255_v37  ;;  %v266_v48 = vand.u32 4294901760, %v265_v39  ;;  %v285_v49 = vsub.f32 %v18988_v32, %v284_v40 }
  0x67   :  { %v304_v50 = vand.u32 4294901760, %v19009_v42  ;;  %15471 = vmatprep.subr.mxu0 %v327_v45  ;;  %v170_v53 = vsel %vm147_vm1, %v138_v43, 0  ;;  %18295 = vmatprep.subr.mxu1 %v327_v45  ;;  %v276_v54 = vand.u32 4294901760, %v275_v47  ;;  %v295_v55 = vsub.f32 %v18991_v33, %v294_v41 }
  0x68   :  { %15459 = vmatprep.mubr.f32.mxu1 %v246_v44  ;;  %v19031_v56 = vand.u32 4294901760, %v170_v53  ;;  %15472 = vmatpush3.msra.mxu0 %v327_v45  ;;  %v286_v57 = vand.u32 4294901760, %v285_v49  ;;  %v928_v59 = vand.u32 4294901760, %v112_v51  ;;  %v931_v60 = vand.u32 4294901760, %v113_v52 }
  0x69   :  { %15460 = vmatmul.mubr.f32.vlgmr.msra.gmra.mrb[0].mxu1 %v256_v46  ;;  %v305_v58 = vsub.f32 %v19009_v42, %v304_v50  ;;  %15474 = vmatmul.mubr.f32.vlgmr.msra.gmra.mrb[0].mxu0 %v18945_v11  ;;  %v296_v0 = vand.u32 4294901760, %v295_v55  ;;  %v934_v2 = vand.u32 4294901760, %v114_v61  ;;  %v937_v4 = vand.u32 4294901760, %v115_v63 }
  0x6a   :  { %18296 = vmatpush3.msra.mxu1 %v327_v45  ;;  %15462 = vmatprep.mubr.f32.mxu1 %v266_v48  ;;  %v19041_v62 = vsub.f32 %v170_v53, %v19031_v56  ;;  %v19049_v5 = vsub.f32 %v112_v51, %v928_v59  ;;  %v19051_v6 = vsub.f32 %v113_v52, %v931_v60  ;;  %v18773_v8 = vmov 0.0|0.0  }
  0x6b   :  { %15476 = vmatprep.mubr.f32.mxu0 %v18954_v15  ;;  %15485 = vmatprep.subr.mxu0 %v324_v20  ;;  %v306_v3 = vand.u32 4294901760, %v305_v58  ;;  %v19061_v16 = vsub.f32 %v114_v61, %v934_v2  ;;  %v19063_v17 = vsub.f32 %v115_v63, %v937_v4  ;;  %v19068_v18 = vpack.c.bf16 %v931_v60, %v928_v59 }
  0x6c   :  { %15486 = vmatpush3.msra.mxu0 %v324_v20  ;;  %v314_v1 = vand.u32 4294901760, %v19041_v62  ;;  %17323 = vmatprep.subr.bf16.mxu1 %v18773_v8  ;;  %v1009_v13 = vand.u32 4294901760, %v19049_v5  ;;  %v1016_v14 = vand.u32 4294901760, %v19051_v6  ;;  %v19083_v37 = vpack.c.bf16 %v937_v4, %v934_v2 }
  0x6d   :  { %15463 = vmatmul.mubr.f32.gmra.mrb[2].mxu1 %v276_v54  ;;  %15499 = vmatprep.subr.mxu0 %v18941_v9  ;;  %v1023_v35 = vand.u32 4294901760, %v19061_v16  ;;  %v1030_v36 = vand.u32 4294901760, %v19063_v17  ;;  %v18775_v46 = vmov 0.0   ;;  %vm923_vm3 = vcmask 261120  }
  0x6e   :  { %15465 = vmatprep.mubr.f32.mxu1 %v286_v57  ;;  %15477 = vmatmul.mubr.f32.gmra.mrb[2].mxu0 %v18968_v22  ;;  %v315_v7 = vsub.f32 %v19041_v62, %v314_v1  ;;  %v1010_v20 = vsub.f32 %v19049_v5, %v1009_v13  ;;  %v1017_v26 = vsub.f32 %v19051_v6, %v1016_v14 }
  0x6f   :  { %15487 = vmatprep.mubr.f32.mxu0 %v18961_v19  ;;  %v1024_v44 = vsub.f32 %v19061_v16, %v1023_v35  ;;  %v1031_v45 = vsub.f32 %v19063_v17, %v1030_v36  ;;  %v19122_v19 = vpack.c.bf16 %v19051_v6, %v19049_v5 }
  0x70   :  { %v316_v12 = vand.u32 4294901760, %v315_v7  ;;  %v1011_v39 = vand.u32 4294901760, %v1010_v20  ;;  %v1018_v43 = vand.u32 4294901760, %v1017_v26 }
  0x71   :  { %15466 = vmatmul.mubr.f32.gmra.mrb[4].mxu1 %v296_v0  ;;  %v1025_v48 = vand.u32 4294901760, %v1024_v44  ;;  %v1032_v49 = vand.u32 4294901760, %v1031_v45  ;;  %v123_v45 = vld [vmem:[#allocation5 + $0x18] sm:$0xff] }
  0x72   :  { %15468 = vmatprep.mubr.f32.mxu1 %v306_v3  ;;  %15488 = vmatmul.mubr.f32.vlgmr.msra.gmra.mrb[0].mxu0 %v18965_v21  ;;  %v19100_v47 = vpack.c.bf16 %v1018_v43, %v1011_v39  ;;  %v19133_v21 = vpack.c.bf16 %v19063_v17, %v19061_v16  ;;  %v122_v39 = vld [vmem:[#allocation5 + $0x10] sm:$0xff] }
  0x73   :  { %15490 = vmatprep.mubr.f32.mxu0 %v18972_v23  ;;  %15500 = vmatpush3.msra.mxu0 %v18941_v9  ;;  %v19108_v51 = vpack.c.bf16 %v1032_v49, %v1025_v48  ;;  %v19161_v23 = vpack.c.bf16 %v1016_v14, %v1009_v13  ;;  %v1959_v48 = vand.u32 4294901760, %v122_v39  ;;  %v1962_v49 = vand.u32 4294901760, %v123_v45 }
  0x74   :  { %15513 = vmatprep.subr.mxu0 %v18980_v28 }
  0x75   :  { %15469 = vmatmul.mubr.f32.gmra.mrb[6].mxu1 %v316_v12 }
  0x76   :  { %15479 = vmatprep.mubr.f32.mxu1 %v18974_v24  ;;  %15491 = vmatmul.mubr.f32.gmra.mrb[2].mxu0 %v18984_v30 }
  0x77   :  { %15493 = vmatprep.mubr.f32.mxu0 %v18988_v32 }
  0x79   :  { %15480 = vmatmul.mubr.f32.vlgmr.msra.gmra.mrb[4].mxu1 %v18976_v25 }
  0x7a   :  { %17325 = vmatpush3.bf16.msra.mxu1 %v19068_v18  ;;  %15482 = vmatprep.mubr.f32.mxu1 %v18993_v34 }
  0x7b   :  { %15494 = vmatmul.mubr.f32.gmra.mrb[4].mxu0 %v18991_v33  ;;  %17326 = vmatprep.subr.bf16.mxu1 %v18773_v8 }
  0x7c   :  { %15496 = vmatprep.mubr.f32.mxu0 %v19009_v42 }
  0x7d   :  { %15483 = vmatmul.mubr.f32.gmra.mrb[6].mxu1 %v19031_v56 }
  0x7e   :  { %17328 = vmatpush3.bf16.msra.mxu1 %v19083_v37  ;;  %15549 = vmatprep.mubr.msk.f32.mxu1 %vm18774_vm2, %v18775_v46 }
  0x7f   :  { %15497 = vmatmul.mubr.f32.gmra.mrb[6].mxu0 %v19041_v62  ;;  %17329 = vmatprep.subr.bf16.mxu1 %v18773_v8 }
  0x80   :  { %15501 = vmatprep.mubr.f32.mxu0 %v244_v27 }
  0x81   :  { %15550 = vmatmul.mubr.f32.vlgmr.msra.gmra.mrb[8].mxu1 %v18775_v46 }
  0x82   :  { %17331 = vmatpush3.bf16.msra.mxu1 %v19100_v47  ;;  %15560 = vmatprep.mubr.msk.f32.mxu1 %vm18774_vm2, %v18775_v46 }
  0x83   :  { %15502 = vmatmul.mubr.f32.vlgmr.msra.gmra.mrb[0].mxu0 %v254_v29  ;;  %17332 = vmatprep.subr.bf16.mxu1 %v18773_v8 }
  0x84   :  { %15504 = vmatprep.mubr.f32.mxu0 %v264_v31  ;;  %15514 = vmatpush3.msra.mxu0 %v18980_v28 }
  0x85   :  { %15527 = vmatprep.subr.mxu0 %v18941_v9 }
  0x86   :  { %17334 = vmatpush3.bf16.msra.mxu1 %v19108_v51 }
  0x87   :  { %15505 = vmatmul.mubr.f32.gmra.mrb[2].mxu0 %v274_v38  ;;  %17335 = vmatprep.subr.bf16.mxu1 %v18773_v8 }
  0x88   :  { %15507 = vmatprep.mubr.f32.mxu0 %v284_v40 }
  0x89   :  { %15561 = vmatmul.mubr.f32.vlgmr.msra.gmra.mrb[8].mxu1 %v18775_v46 }
  0x8a   :  { %17337 = vmatpush3.bf16.msra.mxu1 %v19122_v19  ;;  %15571 = vmatprep.mubr.msk.f32.mxu1 %vm18774_vm2, %v18775_v46 }
  0x8b   :  { %15508 = vmatmul.mubr.f32.gmra.mrb[4].mxu0 %v294_v41  ;;  %17338 = vmatprep.subr.bf16.mxu1 %v18773_v8 }
  0x8c   :  { %15510 = vmatprep.mubr.f32.mxu0 %v304_v50 }
  0x8e   :  { %17340 = vmatpush3.bf16.msra.mxu1 %v19133_v21 }
  0x8f   :  { %15511 = vmatmul.mubr.f32.gmra.mrb[6].mxu0 %v314_v1  ;;  %17341 = vmatprep.subr.bf16.mxu1 %v18773_v8 }
  0x90   :  { %15515 = vmatprep.mubr.f32.mxu0 %v18943_v10 }
  0x91   :  { %15572 = vmatmul.mubr.f32.vlgmr.msra.gmra.mrb[8].mxu1 %v18775_v46 }
  0x92   :  { %17343 = vmatpush3.bf16.msra.mxu1 %v19068_v18  ;;  %15582 = vmatprep.mubr.msk.f32.mxu1 %vm18774_vm2, %v18775_v46 }
  0x93   :  { %15516 = vmatmul.mubr.f32.vlgmr.msra.gmra.mrb[0].mxu0 %v18945_v11  ;;  %17344 = vmatprep.subr.bf16.mxu1 %v18773_v8 }
  0x94   :  { %15518 = vmatprep.mubr.f32.mxu0 %v18954_v15  ;;  %15528 = vmatpush3.msra.mxu0 %v18941_v9  ;;  %v19172_v9 = vpack.c.bf16 %v1030_v36, %v1023_v35  ;;  %v120_v35 = vld [vmem:[#allocation5] sm:$0xff]  ;;  %v121_v36 = vld [vmem:[#allocation5 + $0x8] sm:$0xff] }
  0x95   :  { %17395 = vmatprep.subr.bf16.mxu0 %v18773_v8  ;;  %v1953_v43 = vand.u32 4294901760, %v120_v35  ;;  %v1956_v44 = vand.u32 4294901760, %v121_v36 }
  0x96   :  { %17346 = vmatpush3.bf16.msra.mxu1 %v19083_v37 }
  0x97   :  { %15519 = vmatmul.mubr.f32.gmra.mrb[2].mxu0 %v18968_v22  ;;  %17347 = vmatprep.subr.bf16.mxu1 %v18773_v8 }
  0x98   :  { %15521 = vmatprep.mubr.f32.mxu0 %v18974_v24 }
  0x99   :  { %15583 = vmatmul.mubr.f32.vlgmr.msra.gmra.mrb[8].mxu1 %v18775_v46 }
  0x9a   :  { %17349 = vmatpush3.bf16.msra.mxu1 %v19161_v23  ;;  %15593 = vmatprep.mubr.msk.f32.mxu1 %vm18774_vm2, %v18775_v46 }
  0x9b   :  { %15522 = vmatmul.mubr.f32.gmra.mrb[4].mxu0 %v18976_v25  ;;  %17350 = vmatprep.subr.bf16.mxu1 %v18773_v8 }
  0x9c   :  { %15524 = vmatprep.mubr.f32.mxu0 %v18993_v34 }
  0x9e   :  { %17352 = vmatpush3.bf16.msra.mxu1 %v19172_v9 }
  0x9f   :  { %15525 = vmatmul.mubr.f32.gmra.mrb[6].mxu0 %v19031_v56  ;;  %17353 = vmatprep.subr.bf16.mxu1 %v18773_v8 }
  0xa0   :  { %15529 = vmatprep.mubr.f32.mxu0 %v18943_v10  ;;  %v14573_v10 = vld [vmem:[%s20607_s3] ss:$0 sm:$0xff]  ;;  %s18776_s3 = smov 64  }
  0xa1   :  { %15594 = vmatmul.mubr.f32.vlgmr.msra.gmra.mrb[8].mxu1 %v18775_v46 }
  0xa2   :  { %17355 = vmatpush3.bf16.msra.mxu1 %v19068_v18  ;;  %15604 = vmatprep.mubr.msk.f32.mxu1 %vm18774_vm2, %v18775_v46 }
  0xa3   :  { %15530 = vmatmul.mubr.f32.vlgmr.msra.gmra.mrb[0].mxu0 %v18945_v11  ;;  %17356 = vmatprep.subr.bf16.mxu1 %v18773_v8 }
  0xa4   :  { %15532 = vmatprep.mubr.f32.mxu0 %v18954_v15 }
  0xa6   :  { %17358 = vmatpush3.bf16.msra.mxu1 %v19083_v37 }
  0xa7   :  { %15533 = vmatmul.mubr.f32.gmra.mrb[2].mxu0 %v18968_v22  ;;  %17359 = vmatprep.subr.bf16.mxu1 %v18773_v8 }
  0xa8   :  { %15535 = vmatprep.mubr.f32.mxu0 %v18974_v24 }
  0xa9   :  { %15605 = vmatmul.mubr.f32.vlgmr.msra.gmra.mrb[8].mxu1 %v18775_v46 }
  0xaa   :  { %17361 = vmatpush3.bf16.msra.mxu1 %v19068_v18  ;;  %15615 = vmatprep.mubr.msk.f32.mxu1 %vm18774_vm2, %v18775_v46 }
  0xab   :  { %15536 = vmatmul.mubr.f32.gmra.mrb[4].mxu0 %v18976_v25  ;;  %17362 = vmatprep.subr.bf16.mxu1 %v18773_v8 }
  0xac   :  { %15538 = vmatprep.mubr.f32.mxu0 %v18993_v34 }
  0xae   :  { %17364 = vmatpush3.bf16.msra.mxu1 %v19083_v37 }
  0xaf   :  { %15539 = vmatmul.mubr.f32.gmra.mrb[6].mxu0 %v19031_v56  ;;  %17365 = vmatprep.subr.bf16.mxu1 %v18773_v8 }
  0xb0   :  { %15681 = vmatprep.mubr.msk.f32.mxu0 %vm18774_vm2, %v18775_v46 }
 0x13c   :  { %v15461_v11 = vpop.f32.mrb[0].mxu1 }
 0x13d   :  { %v259_v15 = vadd.f32 %v15461_v11, %v14573_v10  ;;  %v248_v22 = vpop.f32.mrb[1].mxu1  ;;  %v19235_v11 = vpack.c.bf16 %v1962_v49, %v1959_v48 }
 0x13e   :  { %v249_v41 = vadd.f32 %v14573_v10, %v248_v22  ;;  %v19239_v22 = vsub.f32 %v121_v36, %v1956_v44 }
 0x140   :  { %v15464_v24 = vpop.f32.mrb[2].mxu1 }
 0x141   :  { %v279_v25 = vadd.f32 %v15464_v24, %v14573_v10  ;;  %v268_v27 = vpop.f32.mrb[3].mxu1 }
 0x142   :  { %v269_v28 = vadd.f32 %v14573_v10, %v268_v27  ;;  %v19249_v27 = vsub.f32 %v123_v45, %v1962_v49 }
 0x14c   :  { %v15481_v29 = vpop.f32.mrb[4].mxu1 }
 0x14d   :  { %v18305_v30 = vadd.f32 %v15481_v29, %v14573_v10  ;;  %v418_v31 = vpop.f32.mrb[5].mxu1 }
 0x14e   :  { %v18307_v32 = vadd.f32 %v14573_v10, %v418_v31  ;;  %v2041_v31 = vand.u32 4294901760, %v19239_v22 }
 0x150   :  { %v15484_v33 = vpop.f32.mrb[6].mxu1 }
 0x151   :  { %v18309_v34 = vadd.f32 %v15484_v33, %v14573_v10  ;;  %v430_v38 = vpop.f32.mrb[7].mxu1 }
 0x152   :  { %v18311_v40 = vadd.f32 %v14573_v10, %v430_v38  ;;  %v19232_v10 = vpack.c.bf16 %v1956_v44, %v1953_v43 }
 0x154   :  { %17397 = vmatpush3.bf16.msra.mxu0 %v19232_v10 }
 0x155   :  { %17398 = vmatprep.subr.bf16.mxu0 %v18773_v8 }
 0x158   :  { %17400 = vmatpush3.bf16.msra.mxu0 %v19235_v11 }
 0x159   :  { %17407 = vmatprep.subr.bf16.mxu0 %v18773_v8 }
 0x15b   :  { %15682 = vmatmul.mubr.f32.vlgmr.msra.gmra.mrb[8].mxu0 %v18775_v46 }
 0x15c   :  { %15703 = vmatprep.mubr.msk.f32.mxu0 %vm18774_vm2, %v18775_v46 }
 0x176   :  { %v15531_v42 = vpop.f32.mrb[0].mxu0 }
 0x177   :  { %v19209_v50 = vadd.f32 %v15531_v42, %v259_v15  ;;  %v877_v52 = vpop.f32.mrb[1].mxu0  ;;  %v19237_v15 = vsub.f32 %v120_v35, %v1953_v43 }
 0x178   :  { %v18300_v53 = vadd.f32 %v877_v52, %v249_v41  ;;  %v117_v41 = vld [vmem:[%s20608_s4 + $0x8] sm:$0xff] }
 0x179   :  { %v19245_v24 = vpack.c.bf16 %v19239_v22, %v19237_v15  ;;  %v2441_v52 = vand.u32 4294901760, %v117_v41 }
 0x17a   :  { %v15534_v54 = vpop.f32.mrb[2].mxu0 }
 0x17b   :  { %v19211_v55 = vadd.f32 %v15534_v54, %v279_v25  ;;  %v889_v56 = vpop.f32.mrb[3].mxu0  ;;  %v19247_v25 = vsub.f32 %v122_v39, %v1959_v48  ;;  %17409 = vmatpush3.bf16.msra.mxu0 %v19245_v24  ;;  %v118_v54 = vld [vmem:[%s20608_s4 + $0x10] sm:$0xff] }
 0x17c   :  { %v19213_v57 = vadd.f32 %v889_v56, %v269_v28  ;;  %v1408_v58 = vpop.f32.mrb[8].mxu1  ;;  %17410 = vmatprep.subr.bf16.mxu0 %v18773_v8  ;;  %v119_v56 = vld [vmem:[%s20608_s4 + $0x18] sm:$0xff] }
 0x17d   :  { %v1412_v59 = vadd.f32 %v18300_v53, %v1408_v58  ;;  %v15606_v60 = vpop.f32.mrb[9].mxu1  ;;  %v19257_v29 = vpack.c.bf16 %v19249_v27, %v19247_v25  ;;  %v2048_v33 = vand.u32 4294901760, %v19247_v25  ;;  %v2444_v58 = vand.u32 4294901760, %v118_v54 }
 0x17e   :  { %v15537_v61 = vpop.f32.mrb[4].mxu0 }
 0x17f   :  { %18472 = vtanh.f32 %v1412_v59  ;;  %v19215_v62 = vadd.f32 %v18305_v30, %v15537_v61  ;;  %v901_v63 = vpop.f32.mrb[5].mxu0  ;;  %v14574_v6 = vmul.f32 -1.442695, %v1412_v59  ;;  %v2034_v30 = vand.u32 4294901760, %v19237_v15  ;;  %17412 = vmatpush3.bf16.msra.mxu0 %v19257_v29 }
 0x180   :  { %v19217_v0 = vadd.f32 %v18307_v32, %v901_v63  ;;  %17419 = vmatprep.subr.bf16.mxu0 %v18773_v8  ;;  %v2447_v59 = vand.u32 4294901760, %v119_v56  ;;  %v2525_v63 = vsub.f32 %v117_v41, %v2441_v52 }
 0x181   :  { %18474 = vpow2.f32 %v14574_v6  ;;  %v19269_v32 = vpack.c.bf16 %v2041_v31, %v2034_v30  ;;  %v2532_v6 = vsub.f32 %v118_v54, %v2444_v58 }
 0x182   :  { %v15540_v1 = vpop.f32.mrb[6].mxu0  ;;  %15704 = vmatmul.mubr.f32.vlgmr.msra.gmra.mrb[10].mxu0 %v18775_v46  ;;  %v19306_v60 = vpack.c.bf16 %v2447_v59, %v2444_v58 }
 0x183   :  { %v19219_v2 = vadd.f32 %v18309_v34, %v15540_v1  ;;  %v913_v3 = vpop.f32.mrb[7].mxu0  ;;  %v2055_v34 = vand.u32 4294901760, %v19249_v27  ;;  %17421 = vmatpush3.bf16.msra.mxu0 %v19269_v32  ;;  %15725 = vmatprep.mubr.msk.f32.mxu0 %vm18774_vm2, %v18775_v46 }
 0x184   :  { %v19221_v4 = vadd.f32 %v18311_v40, %v913_v3  ;;  %17422 = vmatprep.subr.bf16.mxu0 %v18773_v8  ;;  %v116_v40 = vld [vmem:[%s20608_s4] sm:$0xff] }
 0x185   :  { %v19280_v38 = vpack.c.bf16 %v2055_v34, %v2048_v33  ;;  %v2438_v42 = vand.u32 4294901760, %v116_v40 }
 0x187   :  { %17424 = vmatpush3.bf16.msra.mxu0 %v19280_v38  ;;  %v19296_v53 = vpack.c.bf16 %v2441_v52, %v2438_v42  ;;  %v2518_v61 = vsub.f32 %v116_v40, %v2438_v42 }
 0x188   :  { %17431 = vmatprep.subr.bf16.mxu0 %v18773_v8 }
 0x189   :  { %v18473_v5 = vpop.eup %18472  ;;  %v19310_v3 = vpack.c.bf16 %v2525_v63, %v2518_v61 }
 0x18a   :  { %1422 = vrot.lane.b32.xlu0 %v18473_v5, %s18776_s3  ;;  %15726 = vmatmul.mubr.f32.vlgmr.msra.gmra.mrb[12].mxu0 %v18775_v46 }
 0x18b   :  { %v18475_v7 = vpop.eup %18474  ;;  %15747 = vmatprep.mubr.msk.f32.mxu0 %vm18774_vm2, %v18775_v46  ;;  %17433 = vmatpush3.bf16.msra.mxu0 %v19296_v53 }
 0x18c   :  { %v1416_v12 = vadd.f32 1.0, %v18475_v7  ;;  %17434 = vmatprep.subr.bf16.mxu0 %v18773_v8  ;;  %v2539_v7 = vsub.f32 %v119_v56, %v2447_v59 }
 0x18e   :  { %18476 = vrcp.f32 %v1416_v12  ;;  %v19314_v12 = vpack.c.bf16 %v2539_v7, %v2532_v6  ;;  %v2540_v35 = vand.u32 4294901760, %v2539_v7 }
 0x18f   :  { %17436 = vmatpush3.bf16.msra.mxu0 %v19306_v60 }
 0x190   :  { %17443 = vmatprep.subr.bf16.mxu0 %v18773_v8  ;;  %v2541_v49 = vsub.f32 %v2539_v7, %v2540_v35 }
 0x192   :  { %v2542_v40 = vand.u32 4294901760, %v2541_v49 }
 0x198   :  { %v19224_v13 = vpop.eup %18476 }
 0x199   :  { %v1420_v17 = vmul.f32 0.0, %v19224_v13 }
 0x1fc   :  { %v1423_v14 = vpop.permute.xlu0 %1422 }
 0x1fd   :  { %v1425_v16 = vmul.f32 %v19224_v13, %v1423_v14  ;;  %v2519_v14 = vand.u32 4294901760, %v2518_v61 }
 0x1ff   :  { %1427 = vrot.lane.b32.xlu0 %v1425_v16, %s18777_s19  ;;  %v2526_v16 = vand.u32 4294901760, %v2525_v63  ;;  %v2520_v39 = vsub.f32 %v2518_v61, %v2519_v14 }
 0x201   :  { %v2527_v43 = vsub.f32 %v2525_v63, %v2526_v16  ;;  %v2521_v44 = vand.u32 4294901760, %v2520_v39 }
 0x203   :  { %v2528_v45 = vand.u32 4294901760, %v2527_v43  ;;  %v2049_v43 = vsub.f32 %v19247_v25, %v2048_v33 }
 0x205   :  { %v19320_v48 = vpack.c.bf16 %v2528_v45, %v2521_v44 }
 0x22e   :  { %v19324_v42 = vpop.f32.mrb[8].mxu0 }
 0x22f   :  { %v15683_v52 = vpop.f32.mrb[9].mxu0 }
 0x255   :  { %v19326_v54 = vpop.f32.mrb[10].mxu0 }
 0x256   :  { %v15705_v56 = vpop.f32.mrb[11].mxu0 }
 0x25d   :  { %v19328_v58 = vpop.f32.mrb[12].mxu0 }
 0x25e   :  { %v15727_v59 = vpop.f32.mrb[13].mxu0 }
 0x271   :  { %v1428_v20 = vpop.permute.xlu0 %1427 }
 0x272   :  { %v19229_v26 = vadd.f32 %v1428_v20, %v1420_v17  ;;  %v19316_v17 = vpack.c.bf16 %v2526_v16, %v2519_v14  ;;  %v2533_v20 = vand.u32 4294901760, %v2532_v6  ;;  %v2035_v16 = vsub.f32 %v19237_v15, %v2034_v30 }
 0x273   :  { %v2056_v15 = vsub.f32 %v19249_v27, %v2055_v34  ;;  %v2050_v30 = vand.u32 4294901760, %v2049_v43 }
 0x274   :  { %18478 = vtanh.f32 %v19229_v26  ;;  %v19318_v36 = vpack.c.bf16 %v2540_v35, %v2533_v20  ;;  %v2036_v35 = vand.u32 4294901760, %v2035_v16 }
 0x27e   :  { %v18479_v28 = vpop.eup %18478 }
 0x27f   :  { %1433 = vrot.lane.b32.xlu1 %v18479_v28, %s18776_s3 }
 0x2f1   :  { %v1434_v1 = vpop.permute.xlu1 %1433 }
 0x2f2   :  { %v1436_v5 = vmul.f32 %v19224_v13, %v1434_v1  ;;  %v2534_v13 = vsub.f32 %v2532_v6, %v2533_v20  ;;  %v2042_v20 = vsub.f32 %v19239_v22, %v2041_v31  ;;  %v2057_v31 = vand.u32 4294901760, %v2056_v15 }
 0x2f4   :  { %1438 = vrot.lane.b32.xlu1 %v1436_v5, %s18777_s19  ;;  %v2535_v28 = vand.u32 4294901760, %v2534_v13  ;;  %v2043_v39 = vand.u32 4294901760, %v2042_v20  ;;  %v19405_v44 = vpack.c.bf16 %v2057_v31, %v2050_v30 }
 0x2f6   :  { %v19322_v41 = vpack.c.bf16 %v2542_v40, %v2535_v28  ;;  %v19400_v22 = vpack.c.bf16 %v2043_v39, %v2036_v35 }
 0x366   :  { %v1439_v61 = vpop.permute.xlu1 %1438 }
 0x367   :  { %v1440_v63 = vsel %vm923_vm3, %v1439_v61, 0 }
 0x368   :  { %v19331_v1 = vand.u32 4294901760, %v1440_v63 }
 0x36a   :  { %v1512_v5 = vsub.f32 %v1440_v63, %v19331_v1 }
 0x36c   :  { %v19334_v6 = vand.u32 4294901760, %v1512_v5 }
 0x36e   :  { %v1514_v7 = vsub.f32 %v1512_v5, %v19334_v6 }
 0x370   :  { %v1515_v14 = vand.u32 4294901760, %v1514_v7 }
 0x372   :  { %15616 = vmatmul.mubr.f32.vlgmr.msra.gmra.mrb[10].mxu1 %v1515_v14  ;;  %15748 = vmatmul.mubr.f32.vlgmr.msra.gmra.mrb[14].mxu0 %v1515_v14 }
 0x373   :  { %17367 = vmatpush3.bf16.msra.mxu1 %v19100_v47  ;;  %17445 = vmatpush3.bf16.msra.mxu0 %v19310_v3 }
 0x374   :  { %17368 = vmatprep.subr.bf16.mxu1 %v18773_v8  ;;  %17446 = vmatprep.subr.bf16.mxu0 %v18773_v8 }
 0x375   :  { %15769 = vmatprep.mubr.msk.f32.mxu0 %vm18774_vm2, %v18775_v46  ;;  %15626 = vmatprep.mubr.msk.f32.mxu1 %vm18774_vm2, %v18775_v46 }
 0x377   :  { %17370 = vmatpush3.bf16.msra.mxu1 %v19108_v51  ;;  %17448 = vmatpush3.bf16.msra.mxu0 %v19314_v12 }
 0x378   :  { %17371 = vmatprep.subr.bf16.mxu1 %v18773_v8  ;;  %17455 = vmatprep.subr.bf16.mxu0 %v18773_v8 }
 0x37a   :  { %15770 = vmatmul.mubr.f32.vlgmr.msra.gmra.mrb[16].mxu0 %v1512_v5  ;;  %15627 = vmatmul.mubr.f32.vlgmr.msra.gmra.mrb[10].mxu1 %v19331_v1 }
 0x37b   :  { %17373 = vmatpush3.bf16.msra.mxu1 %v19122_v19  ;;  %17457 = vmatpush3.bf16.msra.mxu0 %v19316_v17 }
 0x37c   :  { %17374 = vmatprep.subr.bf16.mxu1 %v18773_v8  ;;  %17458 = vmatprep.subr.bf16.mxu0 %v18773_v8 }
 0x37d   :  { %15791 = vmatprep.mubr.msk.f32.mxu0 %vm18774_vm2, %v18775_v46  ;;  %15637 = vmatprep.mubr.msk.f32.mxu1 %vm18774_vm2, %v18775_v46 }
 0x37f   :  { %17376 = vmatpush3.bf16.msra.mxu1 %v19133_v21  ;;  %17460 = vmatpush3.bf16.msra.mxu0 %v19318_v36 }
 0x380   :  { %17377 = vmatprep.subr.bf16.mxu1 %v18773_v8  ;;  %17467 = vmatprep.subr.bf16.mxu0 %v18773_v8 }
 0x382   :  { %15792 = vmatmul.mubr.f32.vlgmr.msra.gmra.mrb[18].mxu0 %v19331_v1  ;;  %15638 = vmatmul.mubr.f32.vlgmr.msra.gmra.mrb[10].mxu1 %v1512_v5 }
 0x383   :  { %17379 = vmatpush3.bf16.msra.mxu1 %v19068_v18  ;;  %15648 = vmatprep.mubr.msk.f32.mxu1 %vm18774_vm2, %v18775_v46 }
 0x384   :  { %17380 = vmatprep.subr.bf16.mxu1 %v18773_v8  ;;  %17469 = vmatpush3.bf16.msra.mxu0 %v19068_v18 }
 0x385   :  { %17470 = vmatprep.subr.bf16.mxu0 %v18773_v8  ;;  %15813 = vmatprep.mubr.msk.f32.mxu0 %vm18774_vm2, %v18775_v46 }
 0x387   :  { %17382 = vmatpush3.bf16.msra.mxu1 %v19083_v37 }
 0x388   :  { %17383 = vmatprep.subr.bf16.mxu1 %v18773_v8  ;;  %17472 = vmatpush3.bf16.msra.mxu0 %v19083_v37 }
 0x389   :  { %17473 = vmatprep.subr.bf16.mxu0 %v18773_v8 }
 0x38a   :  { %15649 = vmatmul.mubr.f32.vlgmr.msra.gmra.mrb[10].mxu1 %v19334_v6 }
 0x38b   :  { %17385 = vmatpush3.bf16.msra.mxu1 %v19161_v23  ;;  %15659 = vmatprep.mubr.msk.f32.mxu1 %vm18774_vm2, %v18775_v46 }
 0x38c   :  { %17386 = vmatprep.subr.bf16.mxu1 %v18773_v8 }
 0x38f   :  { %17388 = vmatpush3.bf16.msra.mxu1 %v19172_v9 }
 0x390   :  { %17389 = vmatprep.subr.bf16.mxu1 %v18773_v8 }
 0x392   :  { %15660 = vmatmul.mubr.f32.vlgmr.msra.gmra.mrb[10].mxu1 %v19331_v1 }
 0x393   :  { %17391 = vmatpush3.bf16.msra.mxu1 %v19068_v18  ;;  %15670 = vmatprep.mubr.msk.f32.mxu1 %vm18774_vm2, %v18775_v46 }
 0x394   :  { %17392 = vmatprep.subr.bf16.mxu1 %v18773_v8 }
 0x397   :  { %17394 = vmatpush3.bf16.msra.mxu1 %v19083_v37 }
 0x398   :  { %17401 = vmatprep.subr.bf16.mxu1 %v18773_v8 }
 0x39a   :  { %15671 = vmatmul.mubr.f32.vlgmr.msra.gmra.mrb[10].mxu1 %v19331_v1 }
 0x39b   :  { %17403 = vmatpush3.bf16.msra.mxu1 %v19400_v22  ;;  %15692 = vmatprep.mubr.msk.f32.mxu1 %vm18774_vm2, %v18775_v46 }
 0x39c   :  { %17404 = vmatprep.subr.bf16.mxu1 %v18773_v8 }
 0x39f   :  { %17406 = vmatpush3.bf16.msra.mxu1 %v19405_v44 }
 0x3a0   :  { %17413 = vmatprep.subr.bf16.mxu1 %v18773_v8 }
 0x3a2   :  { %15693 = vmatmul.mubr.f32.vlgmr.msra.gmra.mrb[12].mxu1 %v18775_v46 }
 0x3a3   :  { %17415 = vmatpush3.bf16.msra.mxu1 %v19232_v10  ;;  %15714 = vmatprep.mubr.msk.f32.mxu1 %vm18774_vm2, %v18775_v46 }
 0x3a4   :  { %17416 = vmatprep.subr.bf16.mxu1 %v18773_v8 }
 0x3a7   :  { %17418 = vmatpush3.bf16.msra.mxu1 %v19235_v11 }
 0x3a8   :  { %17425 = vmatprep.subr.bf16.mxu1 %v18773_v8 }
 0x3aa   :  { %15715 = vmatmul.mubr.f32.vlgmr.msra.gmra.mrb[14].mxu1 %v18775_v46 }
 0x3ab   :  { %17427 = vmatpush3.bf16.msra.mxu1 %v19232_v10  ;;  %15736 = vmatprep.mubr.msk.f32.mxu1 %vm18774_vm2, %v18775_v46 }
 0x3ac   :  { %17428 = vmatprep.subr.bf16.mxu1 %v18773_v8 }
 0x3af   :  { %17430 = vmatpush3.bf16.msra.mxu1 %v19235_v11 }
 0x3b0   :  { %17437 = vmatprep.subr.bf16.mxu1 %v18773_v8 }
 0x3b2   :  { %15737 = vmatmul.mubr.f32.vlgmr.msra.gmra.mrb[16].mxu1 %v18775_v46 }
 0x3b3   :  { %17439 = vmatpush3.bf16.msra.mxu1 %v19320_v48  ;;  %15758 = vmatprep.mubr.msk.f32.mxu1 %vm18774_vm2, %v18775_v46 }
 0x3b4   :  { %17440 = vmatprep.subr.bf16.mxu1 %v18773_v8 }
 0x3b7   :  { %17442 = vmatpush3.bf16.msra.mxu1 %v19322_v41 }
 0x3b8   :  { %17449 = vmatprep.subr.bf16.mxu1 %v18773_v8 }
 0x3ba   :  { %15759 = vmatmul.mubr.f32.vlgmr.msra.gmra.mrb[18].mxu1 %v19331_v1 }
 0x3bb   :  { %17451 = vmatpush3.bf16.msra.mxu1 %v19296_v53  ;;  %15780 = vmatprep.mubr.msk.f32.mxu1 %vm18774_vm2, %v18775_v46 }
 0x3bc   :  { %17452 = vmatprep.subr.bf16.mxu1 %v18773_v8 }
 0x3bf   :  { %17454 = vmatpush3.bf16.msra.mxu1 %v19306_v60 }
 0x3c0   :  { %17461 = vmatprep.subr.bf16.mxu1 %v18773_v8 }
 0x3c2   :  { %15781 = vmatmul.mubr.f32.vlgmr.msra.gmra.mrb[20].mxu1 %v19334_v6 }
 0x3c3   :  { %17463 = vmatpush3.bf16.msra.mxu1 %v19296_v53  ;;  %15802 = vmatprep.mubr.msk.f32.mxu1 %vm18774_vm2, %v18775_v46 }
 0x3c4   :  { %17464 = vmatprep.subr.bf16.mxu1 %v18773_v8 }
 0x3c7   :  { %17466 = vmatpush3.bf16.msra.mxu1 %v19306_v60 }
 0x3c8   :  { %17503 = vmatprep.subr.bf16.mxu1 %v18773_v8 }
 0x3ca   :  { %15803 = vmatmul.mubr.f32.vlgmr.msra.gmra.mrb[22].mxu1 %v19331_v1 }
 0x3cb   :  { %17505 = vmatpush3.bf16.msra.mxu1 %v19232_v10  ;;  %15879 = vmatprep.mubr.msk.f32.mxu1 %vm18774_vm2, %v18775_v46 }
 0x3cc   :  { %17506 = vmatprep.subr.bf16.mxu1 %v18773_v8 }
 0x3cf   :  { %17508 = vmatpush3.bf16.msra.mxu1 %v19235_v11 }
 0x3d0   :  { %17509 = vmatprep.subr.bf16.mxu1 %v18773_v8 }
 0x445   :  { %v2512_v25 = vpop.f32.mrb[14].mxu0 }
 0x446   :  { %v15749_v27 = vpop.f32.mrb[15].mxu0 }
 0x447   :  { %v19462_v27 = vld [vmem:[%s20610_s6] ss:$0 sm:$0xff] }
 0x44d   :  { %v2683_v33 = vpop.f32.mrb[16].mxu0 }
 0x44e   :  { %v15771_v34 = vpop.f32.mrb[17].mxu0 }
 0x455   :  { %v2843_v45 = vpop.f32.mrb[18].mxu0 }
 0x456   :  { %v15793_v13 = vpop.f32.mrb[19].mxu0 }
 0x46d   :  { %v1923_v49 = vpop.f32.mrb[10].mxu1 }
 0x46e   :  { %v1927_v28 = vadd.f32 %v19209_v50, %v1923_v49  ;;  %v15672_v40 = vpop.f32.mrb[11].mxu1 }
 0x470   :  { %18480 = vtanh.f32 %v1927_v28  ;;  %v14575_v40 = vmul.f32 -1.442695, %v1927_v28 }
 0x475   :  { %v2118_v52 = vpop.f32.mrb[12].mxu1 }
 0x476   :  { %v2119_v56 = vadd.f32 %v2118_v52, %v19324_v42  ;;  %v15694_v59 = vpop.f32.mrb[13].mxu1 }
 0x478   :  { %v2199_v61 = vadd.f32 %v19326_v54, %v2119_v56 }
 0x47a   :  { %v18481_v63 = vpop.eup %18480 }
 0x47b   :  { %1937 = vrot.lane.b32.xlu0 %v18481_v63, %s18776_s3 }
 0x47d   :  { %v2275_v1 = vpop.f32.mrb[14].mxu1 }
 0x47e   :  { %v2276_v5 = vadd.f32 %v2275_v1, %v2199_v61  ;;  %v15716_v6 = vpop.f32.mrb[15].mxu1 }
 0x480   :  { %v2359_v7 = vadd.f32 %v19328_v58, %v2276_v5 }
 0x485   :  { %v2433_v14 = vpop.f32.mrb[16].mxu1 }
 0x486   :  { %v2434_v16 = vadd.f32 %v2433_v14, %v2359_v7  ;;  %v15738_v20 = vpop.f32.mrb[17].mxu1 }
 0x488   :  { %v2513_v50 = vadd.f32 %v2512_v25, %v2434_v16 }
 0x48d   :  { %v2603_v35 = vpop.f32.mrb[18].mxu1 }
 0x48e   :  { %v2604_v39 = vadd.f32 %v2603_v35, %v2513_v50  ;;  %v15760_v43 = vpop.f32.mrb[19].mxu1 }
 0x490   :  { %v2684_v15 = vadd.f32 %v2683_v33, %v2604_v39 }
 0x495   :  { %v2760_v42 = vpop.f32.mrb[20].mxu1 }
 0x496   :  { %v2761_v30 = vadd.f32 %v2760_v42, %v2684_v15  ;;  %v15782_v31 = vpop.f32.mrb[21].mxu1 }
 0x498   :  { %v2844_v54 = vadd.f32 %v2843_v45, %v2761_v30 }
 0x49d   :  { %v2918_v34 = vpop.f32.mrb[22].mxu1 }
 0x49e   :  { %v2919_v13 = vadd.f32 %v2918_v34, %v2844_v54  ;;  %v15804_v58 = vpop.f32.mrb[23].mxu1 }
 0x4a0   :  { %v2922_v49 = vadd.f32 %v19462_v27, %v2919_v13 }
 0x4a2   :  { %18482 = vtanh.f32 %v2922_v49  ;;  %v14576_v61 = vmul.f32 -1.442695, %v2922_v49 }
 0x4a3   :  { %18484 = vpow2.f32 %v14575_v40 }
 0x4ac   :  { %v18483_v25 = vpop.eup %18482 }
 0x4ad   :  { %2932 = vrot.lane.b32.xlu1 %v18483_v25, %s18776_s3  ;;  %v18485_v33 = vpop.eup %18484 }
 0x4ae   :  { %v1931_v52 = vadd.f32 1.0, %v18485_v33 }
 0x4b0   :  { %18486 = vrcp.f32 %v1931_v52 }
 0x4b1   :  { %18488 = vpow2.f32 %v14576_v61 }
 0x4ba   :  { %v18487_v45 = vpop.eup %18486 }
 0x4bb   :  { %v18489_v63 = vpop.eup %18488  ;;  %v1935_v28 = vmul.f32 %v18487_v45, %v19229_v26 }
 0x4bc   :  { %v2926_v1 = vadd.f32 1.0, %v18489_v63 }
 0x4be   :  { %18490 = vrcp.f32 %v2926_v1 }
 0x4c8   :  { %v18491_v5 = vpop.eup %18490 }
 0x4c9   :  { %v2930_v50 = vmul.f32 0.0, %v18491_v5 }
 0x4ed   :  { %v1938_v56 = vpop.permute.xlu0 %1937 }
 0x4ee   :  { %v1940_v59 = vmul.f32 %v18487_v45, %v1938_v56 }
 0x4f0   :  { %1942 = vrot.lane.b32.xlu0 %v1940_v59, %s18777_s19 }
 0x51f   :  { %v2933_v6 = vpop.permute.xlu1 %2932 }
 0x520   :  { %v2935_v7 = vmul.f32 %v18491_v5, %v2933_v6 }
 0x522   :  { %2937 = vrot.lane.b32.xlu1 %v2935_v7, %s18777_s19 }
 0x562   :  { %v1943_v14 = vpop.permute.xlu0 %1942 }
 0x563   :  { %v19469_v16 = vadd.f32 %v1943_v14, %v1935_v28 }
 0x565   :  { %18492 = vtanh.f32 %v19469_v16 }
 0x56f   :  { %v18493_v20 = vpop.eup %18492 }
 0x570   :  { %1948 = vrot.lane.b32.xlu0 %v18493_v20, %s18776_s3 }
 0x594   :  { %v2938_v35 = vpop.permute.xlu1 %2937 }
 0x595   :  { %v19473_v39 = vadd.f32 %v2938_v35, %v2930_v50 }
 0x597   :  { %18494 = vtanh.f32 %v19473_v39 }
 0x5a1   :  { %v18495_v43 = vpop.eup %18494 }
 0x5a2   :  { %2943 = vrot.lane.b32.xlu1 %v18495_v43, %s18776_s3 }
 0x5e2   :  { %v1949_v15 = vpop.permute.xlu0 %1948 }
 0x5e3   :  { %v1951_v42 = vmul.f32 %v18487_v45, %v1949_v15 }
 0x5e5   :  { %2948 = vrot.lane.b32.xlu0 %v1951_v42, %s18777_s19 }
 0x614   :  { %v2944_v26 = vpop.permute.xlu1 %2943 }
 0x615   :  { %v2946_v30 = vmul.f32 %v18491_v5, %v2944_v26 }
 0x617   :  { %3463 = vrot.lane.b32.xlu1 %v2946_v30, %s18777_s19 }
 0x657   :  { %v2949_v31 = vpop.permute.xlu0 %2948 }
 0x658   :  { %v2950_v54 = vsel %vm923_vm3, %v2949_v31, 0 }
 0x659   :  { %v19480_v34 = vand.u32 4294901760, %v2950_v54 }
 0x65b   :  { %v3022_v13 = vsub.f32 %v2950_v54, %v19480_v34 }
 0x65d   :  { %v19483_v58 = vand.u32 4294901760, %v3022_v13 }
 0x65f   :  { %v3024_v49 = vsub.f32 %v3022_v13, %v19483_v58 }
 0x661   :  { %v3025_v25 = vand.u32 4294901760, %v3024_v49 }
 0x663   :  { %15814 = vmatmul.mubr.f32.vlgmr.msra.gmra.mrb[20].mxu0 %v3025_v25 }
 0x664   :  { %17475 = vmatpush3.bf16.msra.mxu0 %v19100_v47  ;;  %15824 = vmatprep.mubr.msk.f32.mxu0 %vm18774_vm2, %v18775_v46 }
 0x665   :  { %17476 = vmatprep.subr.bf16.mxu0 %v18773_v8 }
 0x668   :  { %17478 = vmatpush3.bf16.msra.mxu0 %v19108_v51 }
 0x669   :  { %17479 = vmatprep.subr.bf16.mxu0 %v18773_v8 }
 0x66b   :  { %15825 = vmatmul.mubr.f32.vlgmr.msra.gmra.mrb[20].mxu0 %v19480_v34 }
 0x66c   :  { %17481 = vmatpush3.bf16.msra.mxu0 %v19122_v19  ;;  %15835 = vmatprep.mubr.msk.f32.mxu0 %vm18774_vm2, %v18775_v46 }
 0x66d   :  { %17482 = vmatprep.subr.bf16.mxu0 %v18773_v8 }
 0x670   :  { %17484 = vmatpush3.bf16.msra.mxu0 %v19133_v21 }
 0x671   :  { %17485 = vmatprep.subr.bf16.mxu0 %v18773_v8 }
 0x673   :  { %15836 = vmatmul.mubr.f32.vlgmr.msra.gmra.mrb[20].mxu0 %v3022_v13 }
 0x674   :  { %17487 = vmatpush3.bf16.msra.mxu0 %v19068_v18  ;;  %15846 = vmatprep.mubr.msk.f32.mxu0 %vm18774_vm2, %v18775_v46 }
 0x675   :  { %17488 = vmatprep.subr.bf16.mxu0 %v18773_v8 }
 0x678   :  { %17490 = vmatpush3.bf16.msra.mxu0 %v19083_v37 }
 0x679   :  { %17491 = vmatprep.subr.bf16.mxu0 %v18773_v8 }
 0x67b   :  { %15847 = vmatmul.mubr.f32.vlgmr.msra.gmra.mrb[20].mxu0 %v19483_v58 }
 0x67c   :  { %17493 = vmatpush3.bf16.msra.mxu0 %v19161_v23  ;;  %15857 = vmatprep.mubr.msk.f32.mxu0 %vm18774_vm2, %v18775_v46 }
 0x67d   :  { %17494 = vmatprep.subr.bf16.mxu0 %v18773_v8 }
 0x680   :  { %17496 = vmatpush3.bf16.msra.mxu0 %v19172_v9 }
 0x681   :  { %17497 = vmatprep.subr.bf16.mxu0 %v18773_v8 }
 0x683   :  { %15858 = vmatmul.mubr.f32.vlgmr.msra.gmra.mrb[20].mxu0 %v19480_v34 }
 0x684   :  { %17499 = vmatpush3.bf16.msra.mxu0 %v19068_v18  ;;  %15868 = vmatprep.mubr.msk.f32.mxu0 %vm18774_vm2, %v18775_v46 }
 0x685   :  { %17500 = vmatprep.subr.bf16.mxu0 %v18773_v8 }
 0x688   :  { %17502 = vmatpush3.bf16.msra.mxu0 %v19083_v37 }
 0x689   :  { %v3464_v40 = vpop.permute.xlu1 %3463  ;;  %17539 = vmatprep.subr.bf16.mxu0 %v18773_v8 }
 0x68a   :  { %v3465_v33 = vsel %vm923_vm3, %v3464_v40, 0 }
 0x68b   :  { %v3536_v52 = vand.u32 4294901760, %v3465_v33  ;;  %15869 = vmatmul.mubr.f32.vlgmr.msra.gmra.mrb[20].mxu0 %v19480_v34 }
 0x68c   :  { %17541 = vmatpush3.bf16.msra.mxu0 %v19296_v53  ;;  %15945 = vmatprep.mubr.msk.f32.mxu0 %vm18774_vm2, %v18775_v46 }
 0x68d   :  { %v3537_v45 = vsub.f32 %v3465_v33, %v3536_v52  ;;  %17542 = vmatprep.subr.bf16.mxu0 %v18773_v8 }
 0x68f   :  { %v3538_v56 = vand.u32 4294901760, %v3537_v45 }
 0x690   :  { %17544 = vmatpush3.bf16.msra.mxu0 %v19306_v60 }
 0x691   :  { %v3539_v59 = vsub.f32 %v3537_v45, %v3538_v56  ;;  %17551 = vmatprep.subr.bf16.mxu0 %v18773_v8 }
 0x693   :  { %v3540_v61 = vand.u32 4294901760, %v3539_v59  ;;  %15946 = vmatmul.mubr.f32.vlgmr.msra.gmra.mrb[22].mxu0 %v3025_v25 }
 0x694   :  { %17553 = vmatpush3.bf16.msra.mxu0 %v19310_v3  ;;  %15967 = vmatprep.mubr.msk.f32.mxu0 %vm18774_vm2, %v18775_v46 }
 0x695   :  { %15880 = vmatmul.mubr.f32.vlgmr.msra.gmra.mrb[24].mxu1 %v3540_v61  ;;  %17554 = vmatprep.subr.bf16.mxu0 %v18773_v8 }
 0x696   :  { %17511 = vmatpush3.bf16.msra.mxu1 %v19400_v22  ;;  %15890 = vmatprep.mubr.msk.f32.mxu1 %vm18774_vm2, %v18775_v46 }
 0x697   :  { %17512 = vmatprep.subr.bf16.mxu1 %v18773_v8 }
 0x698   :  { %17556 = vmatpush3.bf16.msra.mxu0 %v19314_v12 }
 0x699   :  { %17563 = vmatprep.subr.bf16.mxu0 %v18773_v8 }
 0x69a   :  { %17514 = vmatpush3.bf16.msra.mxu1 %v19405_v44 }
 0x69b   :  { %15968 = vmatmul.mubr.f32.vlgmr.msra.gmra.mrb[24].mxu0 %v3022_v13  ;;  %17515 = vmatprep.subr.bf16.mxu1 %v18773_v8 }
 0x69c   :  { %17565 = vmatpush3.bf16.msra.mxu0 %v19316_v17  ;;  %15989 = vmatprep.mubr.msk.f32.mxu0 %vm18774_vm2, %v18775_v46 }
 0x69d   :  { %15891 = vmatmul.mubr.f32.vlgmr.msra.gmra.mrb[26].mxu1 %v3536_v52  ;;  %17566 = vmatprep.subr.bf16.mxu0 %v18773_v8 }
 0x69e   :  { %17517 = vmatpush3.bf16.msra.mxu1 %v19245_v24  ;;  %15901 = vmatprep.mubr.msk.f32.mxu1 %vm18774_vm2, %v18775_v46 }
 0x69f   :  { %17518 = vmatprep.subr.bf16.mxu1 %v18773_v8 }
 0x6a0   :  { %17568 = vmatpush3.bf16.msra.mxu0 %v19318_v36 }
 0x6a1   :  { %17575 = vmatprep.subr.bf16.mxu0 %v18773_v8 }
 0x6a2   :  { %17520 = vmatpush3.bf16.msra.mxu1 %v19257_v29 }
 0x6a3   :  { %15990 = vmatmul.mubr.f32.vlgmr.msra.gmra.mrb[26].mxu0 %v19480_v34  ;;  %17521 = vmatprep.subr.bf16.mxu1 %v18773_v8 }
 0x6a4   :  { %17577 = vmatpush3.bf16.msra.mxu0 %v19068_v18  ;;  %16011 = vmatprep.mubr.msk.f32.mxu0 %vm18774_vm2, %v18775_v46 }
 0x6a5   :  { %15902 = vmatmul.mubr.f32.vlgmr.msra.gmra.mrb[28].mxu1 %v3537_v45  ;;  %17578 = vmatprep.subr.bf16.mxu0 %v18773_v8 }
 0x6a6   :  { %17523 = vmatpush3.bf16.msra.mxu1 %v19232_v10  ;;  %15912 = vmatprep.mubr.msk.f32.mxu1 %vm18774_vm2, %v18775_v46 }
 0x6a7   :  { %17524 = vmatprep.subr.bf16.mxu1 %v18773_v8 }
 0x6a8   :  { %17580 = vmatpush3.bf16.msra.mxu0 %v19083_v37 }
 0x6a9   :  { %17581 = vmatprep.subr.bf16.mxu0 %v18773_v8 }
 0x6aa   :  { %17526 = vmatpush3.bf16.msra.mxu1 %v19235_v11 }
 0x6ab   :  { %17527 = vmatprep.subr.bf16.mxu1 %v18773_v8 }
 0x6ad   :  { %15913 = vmatmul.mubr.f32.vlgmr.msra.gmra.mrb[30].mxu1 %v3538_v56 }
 0x6ae   :  { %17529 = vmatpush3.bf16.msra.mxu1 %v19269_v32  ;;  %15923 = vmatprep.mubr.msk.f32.mxu1 %vm18774_vm2, %v18775_v46 }
 0x6af   :  { %17530 = vmatprep.subr.bf16.mxu1 %v18773_v8 }
 0x6b2   :  { %17532 = vmatpush3.bf16.msra.mxu1 %v19280_v38 }
 0x6b3   :  { %17533 = vmatprep.subr.bf16.mxu1 %v18773_v8 }
 0x6b5   :  { %15924 = vmatmul.mubr.f32.vlgmr.msra.gmra.mrb[32].mxu1 %v3536_v52 }
 0x6b6   :  { %17535 = vmatpush3.bf16.msra.mxu1 %v19232_v10  ;;  %15934 = vmatprep.mubr.msk.f32.mxu1 %vm18774_vm2, %v18775_v46 }
 0x6b7   :  { %17536 = vmatprep.subr.bf16.mxu1 %v18773_v8 }
 0x6ba   :  { %17538 = vmatpush3.bf16.msra.mxu1 %v19235_v11 }
 0x6bb   :  { %17545 = vmatprep.subr.bf16.mxu1 %v18773_v8 }
 0x6bd   :  { %15935 = vmatmul.mubr.f32.vlgmr.msra.gmra.mrb[34].mxu1 %v3536_v52 }
 0x6be   :  { %17547 = vmatpush3.bf16.msra.mxu1 %v19320_v48  ;;  %15956 = vmatprep.mubr.msk.f32.mxu1 %vm18774_vm2, %v18775_v46 }
 0x6bf   :  { %17548 = vmatprep.subr.bf16.mxu1 %v18773_v8 }
 0x6c2   :  { %17550 = vmatpush3.bf16.msra.mxu1 %v19322_v41 }
 0x6c3   :  { %17557 = vmatprep.subr.bf16.mxu1 %v18773_v8 }
 0x6c5   :  { %15957 = vmatmul.mubr.f32.vlgmr.msra.gmra.mrb[36].mxu1 %v19480_v34 }
 0x6c6   :  { %17559 = vmatpush3.bf16.msra.mxu1 %v19296_v53  ;;  %15978 = vmatprep.mubr.msk.f32.mxu1 %vm18774_vm2, %v18775_v46 }
 0x6c7   :  { %17560 = vmatprep.subr.bf16.mxu1 %v18773_v8 }
 0x6ca   :  { %17562 = vmatpush3.bf16.msra.mxu1 %v19306_v60 }
 0x6cb   :  { %17569 = vmatprep.subr.bf16.mxu1 %v18773_v8 }
 0x6cd   :  { %15979 = vmatmul.mubr.f32.vlgmr.msra.gmra.mrb[38].mxu1 %v19483_v58 }
 0x6ce   :  { %17571 = vmatpush3.bf16.msra.mxu1 %v19296_v53  ;;  %16000 = vmatprep.mubr.msk.f32.mxu1 %vm18774_vm2, %v18775_v46 }
 0x6cf   :  { %17572 = vmatprep.subr.bf16.mxu1 %v18773_v8 }
 0x6d2   :  { %17574 = vmatpush3.bf16.msra.mxu1 %v19306_v60 }
 0x6d3   :  { %17611 = vmatprep.subr.bf16.mxu1 %v18773_v8 }
 0x6d5   :  { %16001 = vmatmul.mubr.f32.vlgmr.msra.gmra.mrb[40].mxu1 %v19480_v34 }
 0x6d6   :  { %17613 = vmatpush3.bf16.msra.mxu1 %v19232_v10  ;;  %16077 = vmatprep.mubr.msk.f32.mxu1 %vm18774_vm2, %v18775_v46 }
 0x6d7   :  { %17614 = vmatprep.subr.bf16.mxu1 %v18773_v8 }
 0x6da   :  { %17616 = vmatpush3.bf16.msra.mxu1 %v19235_v11 }
 0x6db   :  { %17617 = vmatprep.subr.bf16.mxu1 %v18773_v8 }
 0x75e   :  { %v3433_v63 = vpop.f32.mrb[20].mxu0 }
 0x75f   :  { %v3437_v1 = vadd.f32 %v19213_v57, %v3433_v63  ;;  %v15870_v5 = vpop.f32.mrb[21].mxu0 }
 0x761   :  { %18496 = vtanh.f32 %v3437_v1 }
 0x766   :  { %v4027_v6 = vpop.f32.mrb[22].mxu0 }
 0x767   :  { %v15947_v7 = vpop.f32.mrb[23].mxu0 }
 0x768   :  { %v3542_v28 = vpop.f32.mrb[24].mxu1 }
 0x769   :  { %v15881_v14 = vpop.f32.mrb[25].mxu1 }
 0x76b   :  { %v18497_v20 = vpop.eup %18496 }
 0x76c   :  { %3447 = vrot.lane.b32.xlu0 %v18497_v20, %s18776_s3 }
 0x76e   :  { %v4198_v50 = vpop.f32.mrb[24].mxu0 }
 0x76f   :  { %v15969_v35 = vpop.f32.mrb[25].mxu0 }
 0x770   :  { %v3633_v43 = vpop.f32.mrb[26].mxu1 }
 0x771   :  { %v3634_v15 = vadd.f32 %v3633_v43, %v3542_v28  ;;  %v15892_v42 = vpop.f32.mrb[27].mxu1 }
 0x776   :  { %v4358_v26 = vpop.f32.mrb[26].mxu0 }
 0x777   :  { %v15991_v30 = vpop.f32.mrb[27].mxu0 }
 0x778   :  { %v3713_v31 = vpop.f32.mrb[28].mxu1 }
 0x779   :  { %v3714_v54 = vadd.f32 %v3713_v31, %v3634_v15  ;;  %v15903_v34 = vpop.f32.mrb[29].mxu1  ;;  %v14577_v31 = vmul.f32 -1.442695, %v3437_v1 }
 0x780   :  { %v3790_v57 = vpop.f32.mrb[30].mxu1 }
 0x781   :  { %v3791_v13 = vadd.f32 %v3790_v57, %v3714_v54  ;;  %v15914_v58 = vpop.f32.mrb[31].mxu1 }
 0x788   :  { %v3873_v49 = vpop.f32.mrb[32].mxu1 }
 0x789   :  { %v3874_v25 = vadd.f32 %v3873_v49, %v3791_v13  ;;  %v15925_v40 = vpop.f32.mrb[33].mxu1 }
 0x790   :  { %v3948_v33 = vpop.f32.mrb[34].mxu1 }
 0x791   :  { %v3949_v52 = vadd.f32 %v3948_v33, %v3874_v25  ;;  %v15936_v45 = vpop.f32.mrb[35].mxu1 }
 0x793   :  { %v4028_v56 = vadd.f32 %v4027_v6, %v3949_v52 }
 0x798   :  { %v4118_v59 = vpop.f32.mrb[36].mxu1 }
 0x799   :  { %v4119_v61 = vadd.f32 %v4118_v59, %v4028_v56  ;;  %v15958_v63 = vpop.f32.mrb[37].mxu1 }
 0x79b   :  { %v4199_v5 = vadd.f32 %v4198_v50, %v4119_v61 }
 0x7a0   :  { %v4275_v7 = vpop.f32.mrb[38].mxu1 }
 0x7a1   :  { %v4276_v28 = vadd.f32 %v4275_v7, %v4199_v5  ;;  %v15980_v14 = vpop.f32.mrb[39].mxu1 }
 0x7a3   :  { %v4359_v20 = vadd.f32 %v4358_v26, %v4276_v28 }
 0x7a8   :  { %v4433_v35 = vpop.f32.mrb[40].mxu1 }
 0x7a9   :  { %v4434_v43 = vadd.f32 %v4433_v35, %v4359_v20  ;;  %v16002_v15 = vpop.f32.mrb[41].mxu1 }
 0x7ab   :  { %v4437_v42 = vadd.f32 %v19462_v27, %v4434_v43 }
 0x7ad   :  { %18498 = vtanh.f32 %v4437_v42  ;;  %v14578_v26 = vmul.f32 -1.442695, %v4437_v42 }
 0x7ae   :  { %18500 = vpow2.f32 %v14577_v31 }
 0x7b7   :  { %v18499_v30 = vpop.eup %18498 }
 0x7b8   :  { %4447 = vrot.lane.b32.xlu1 %v18499_v30, %s18776_s3  ;;  %v18501_v6 = vpop.eup %18500 }
 0x7b9   :  { %v3441_v54 = vadd.f32 1.0, %v18501_v6 }
 0x7bb   :  { %18502 = vrcp.f32 %v3441_v54 }
 0x7bc   :  { %18504 = vpow2.f32 %v14578_v26 }
 0x7c5   :  { %v18503_v34 = vpop.eup %18502 }
 0x7c6   :  { %v18505_v13 = vpop.eup %18504  ;;  %v3445_v1 = vmul.f32 %v18503_v34, %v19469_v16 }
 0x7c7   :  { %v4441_v58 = vadd.f32 1.0, %v18505_v13 }
 0x7c9   :  { %18506 = vrcp.f32 %v4441_v58 }
 0x7d3   :  { %v18507_v49 = vpop.eup %18506 }
 0x7d4   :  { %v4445_v56 = vmul.f32 %v18507_v49, %v19473_v39 }
 0x7de   :  { %v3448_v50 = vpop.permute.xlu0 %3447 }
 0x7df   :  { %v3450_v57 = vmul.f32 %v18503_v34, %v3448_v50 }
 0x7e1   :  { %3452 = vrot.lane.b32.xlu0 %v3450_v57, %s18777_s19 }
 0x82a   :  { %v4448_v25 = vpop.permute.xlu1 %4447 }
 0x82b   :  { %v4450_v40 = vmul.f32 %v18507_v49, %v4448_v25 }
 0x82d   :  { %4452 = vrot.lane.b32.xlu1 %v4450_v40, %s18777_s19 }
 0x853   :  { %v3453_v33 = vpop.permute.xlu0 %3452 }
 0x854   :  { %v19610_v52 = vadd.f32 %v3453_v33, %v3445_v1 }
 0x856   :  { %18508 = vtanh.f32 %v19610_v52 }
 0x860   :  { %v18509_v45 = vpop.eup %18508 }
 0x861   :  { %3458 = vrot.lane.b32.xlu0 %v18509_v45, %s18776_s3 }
 0x89f   :  { %v4453_v59 = vpop.permute.xlu1 %4452 }
 0x8a0   :  { %v19615_v61 = vadd.f32 %v4453_v59, %v4445_v56 }
 0x8a2   :  { %18510 = vtanh.f32 %v19615_v61 }
 0x8ac   :  { %v18511_v63 = vpop.eup %18510 }
 0x8ad   :  { %4458 = vrot.lane.b32.xlu1 %v18511_v63, %s18776_s3 }
 0x8d3   :  { %v3459_v5 = vpop.permute.xlu0 %3458 }
 0x8d4   :  { %v3461_v16 = vmul.f32 %v18503_v34, %v3459_v5 }
 0x8d6   :  { %4463 = vrot.lane.b32.xlu0 %v3461_v16, %s18777_s19 }
 0x91f   :  { %v4459_v7 = vpop.permute.xlu1 %4458 }
 0x920   :  { %v4461_v28 = vmul.f32 %v18507_v49, %v4459_v7 }
 0x922   :  { %4978 = vrot.lane.b32.xlu1 %v4461_v28, %s18777_s19 }
 0x948   :  { %v4464_v14 = vpop.permute.xlu0 %4463 }
 0x949   :  { %v4465_v20 = vsel %vm923_vm3, %v4464_v14, 0 }
 0x94a   :  { %v19622_v39 = vand.u32 4294901760, %v4465_v20 }
 0x94c   :  { %v4537_v35 = vsub.f32 %v4465_v20, %v19622_v39 }
 0x94e   :  { %v19625_v43 = vand.u32 4294901760, %v4537_v35 }
 0x950   :  { %v4539_v15 = vsub.f32 %v4537_v35, %v19625_v43 }
 0x952   :  { %v4540_v42 = vand.u32 4294901760, %v4539_v15 }
 0x954   :  { %16012 = vmatmul.mubr.f32.vlgmr.msra.gmra.mrb[28].mxu0 %v4540_v42 }
 0x955   :  { %17583 = vmatpush3.bf16.msra.mxu0 %v19100_v47  ;;  %16022 = vmatprep.mubr.msk.f32.mxu0 %vm18774_vm2, %v18775_v46 }
 0x956   :  { %17584 = vmatprep.subr.bf16.mxu0 %v18773_v8 }
 0x959   :  { %17586 = vmatpush3.bf16.msra.mxu0 %v19108_v51 }
 0x95a   :  { %17587 = vmatprep.subr.bf16.mxu0 %v18773_v8 }
 0x95c   :  { %16023 = vmatmul.mubr.f32.vlgmr.msra.gmra.mrb[28].mxu0 %v19622_v39 }
 0x95d   :  { %17589 = vmatpush3.bf16.msra.mxu0 %v19122_v19  ;;  %16033 = vmatprep.mubr.msk.f32.mxu0 %vm18774_vm2, %v18775_v46 }
 0x95e   :  { %17590 = vmatprep.subr.bf16.mxu0 %v18773_v8 }
 0x961   :  { %17592 = vmatpush3.bf16.msra.mxu0 %v19133_v21 }
 0x962   :  { %17593 = vmatprep.subr.bf16.mxu0 %v18773_v8 }
 0x964   :  { %16034 = vmatmul.mubr.f32.vlgmr.msra.gmra.mrb[28].mxu0 %v4537_v35 }
 0x965   :  { %17595 = vmatpush3.bf16.msra.mxu0 %v19068_v18  ;;  %16044 = vmatprep.mubr.msk.f32.mxu0 %vm18774_vm2, %v18775_v46 }
 0x966   :  { %17596 = vmatprep.subr.bf16.mxu0 %v18773_v8 }
 0x969   :  { %17598 = vmatpush3.bf16.msra.mxu0 %v19083_v37 }
 0x96a   :  { %17599 = vmatprep.subr.bf16.mxu0 %v18773_v8 }
 0x96c   :  { %16045 = vmatmul.mubr.f32.vlgmr.msra.gmra.mrb[28].mxu0 %v19625_v43 }
 0x96d   :  { %17601 = vmatpush3.bf16.msra.mxu0 %v19161_v23  ;;  %16055 = vmatprep.mubr.msk.f32.mxu0 %vm18774_vm2, %v18775_v46 }
 0x96e   :  { %17602 = vmatprep.subr.bf16.mxu0 %v18773_v8 }
 0x971   :  { %17604 = vmatpush3.bf16.msra.mxu0 %v19172_v9 }
 0x972   :  { %17605 = vmatprep.subr.bf16.mxu0 %v18773_v8 }
 0x974   :  { %16056 = vmatmul.mubr.f32.vlgmr.msra.gmra.mrb[28].mxu0 %v19622_v39 }
 0x975   :  { %17607 = vmatpush3.bf16.msra.mxu0 %v19068_v18  ;;  %16066 = vmatprep.mubr.msk.f32.mxu0 %vm18774_vm2, %v18775_v46 }
 0x976   :  { %17608 = vmatprep.subr.bf16.mxu0 %v18773_v8 }
 0x979   :  { %17610 = vmatpush3.bf16.msra.mxu0 %v19083_v37 }
 0x97a   :  { %17647 = vmatprep.subr.bf16.mxu0 %v18773_v8 }
 0x97c   :  { %16067 = vmatmul.mubr.f32.vlgmr.msra.gmra.mrb[28].mxu0 %v19622_v39 }
 0x97d   :  { %17649 = vmatpush3.bf16.msra.mxu0 %v19296_v53  ;;  %16143 = vmatprep.mubr.msk.f32.mxu0 %vm18774_vm2, %v18775_v46 }
 0x97e   :  { %17650 = vmatprep.subr.bf16.mxu0 %v18773_v8 }
 0x981   :  { %17652 = vmatpush3.bf16.msra.mxu0 %v19306_v60 }
 0x982   :  { %17659 = vmatprep.subr.bf16.mxu0 %v18773_v8 }
 0x984   :  { %16144 = vmatmul.mubr.f32.vlgmr.msra.gmra.mrb[30].mxu0 %v4540_v42 }
 0x985   :  { %17661 = vmatpush3.bf16.msra.mxu0 %v19310_v3  ;;  %16165 = vmatprep.mubr.msk.f32.mxu0 %vm18774_vm2, %v18775_v46 }
 0x986   :  { %17662 = vmatprep.subr.bf16.mxu0 %v18773_v8 }
 0x989   :  { %17664 = vmatpush3.bf16.msra.mxu0 %v19314_v12 }
 0x98a   :  { %17671 = vmatprep.subr.bf16.mxu0 %v18773_v8 }
 0x98c   :  { %16166 = vmatmul.mubr.f32.vlgmr.msra.gmra.mrb[32].mxu0 %v4537_v35 }
 0x98d   :  { %17673 = vmatpush3.bf16.msra.mxu0 %v19316_v17  ;;  %16187 = vmatprep.mubr.msk.f32.mxu0 %vm18774_vm2, %v18775_v46 }
 0x98e   :  { %17674 = vmatprep.subr.bf16.mxu0 %v18773_v8 }
 0x991   :  { %17676 = vmatpush3.bf16.msra.mxu0 %v19318_v36 }
 0x992   :  { %17683 = vmatprep.subr.bf16.mxu0 %v18773_v8 }
 0x994   :  { %v4979_v30 = vpop.permute.xlu1 %4978  ;;  %16188 = vmatmul.mubr.f32.vlgmr.msra.gmra.mrb[34].mxu0 %v19622_v39 }
 0x995   :  { %v4980_v31 = vsel %vm923_vm3, %v4979_v30, 0  ;;  %17685 = vmatpush3.bf16.msra.mxu0 %v19068_v18  ;;  %16209 = vmatprep.mubr.msk.f32.mxu0 %vm18774_vm2, %v18775_v46 }
 0x996   :  { %v5051_v6 = vand.u32 4294901760, %v4980_v31  ;;  %17686 = vmatprep.subr.bf16.mxu0 %v18773_v8 }
 0x998   :  { %v5052_v54 = vsub.f32 %v4980_v31, %v5051_v6 }
 0x999   :  { %17688 = vmatpush3.bf16.msra.mxu0 %v19083_v37 }
 0x99a   :  { %v5053_v34 = vand.u32 4294901760, %v5052_v54  ;;  %17689 = vmatprep.subr.bf16.mxu0 %v18773_v8 }
 0x99c   :  { %v5054_v50 = vsub.f32 %v5052_v54, %v5053_v34 }
 0x99e   :  { %v5055_v57 = vand.u32 4294901760, %v5054_v50 }
 0x9a0   :  { %16078 = vmatmul.mubr.f32.vlgmr.msra.gmra.mrb[42].mxu1 %v5055_v57 }
 0x9a1   :  { %17619 = vmatpush3.bf16.msra.mxu1 %v19400_v22  ;;  %16088 = vmatprep.mubr.msk.f32.mxu1 %vm18774_vm2, %v18775_v46 }
 0x9a2   :  { %17620 = vmatprep.subr.bf16.mxu1 %v18773_v8 }
 0x9a5   :  { %17622 = vmatpush3.bf16.msra.mxu1 %v19405_v44 }
 0x9a6   :  { %17623 = vmatprep.subr.bf16.mxu1 %v18773_v8 }
 0x9a8   :  { %16089 = vmatmul.mubr.f32.vlgmr.msra.gmra.mrb[44].mxu1 %v5051_v6 }
 0x9a9   :  { %17625 = vmatpush3.bf16.msra.mxu1 %v19245_v24  ;;  %16099 = vmatprep.mubr.msk.f32.mxu1 %vm18774_vm2, %v18775_v46 }
 0x9aa   :  { %17626 = vmatprep.subr.bf16.mxu1 %v18773_v8 }
 0x9ad   :  { %17628 = vmatpush3.bf16.msra.mxu1 %v19257_v29 }
 0x9ae   :  { %17629 = vmatprep.subr.bf16.mxu1 %v18773_v8 }
 0x9b0   :  { %16100 = vmatmul.mubr.f32.vlgmr.msra.gmra.mrb[46].mxu1 %v5052_v54 }
 0x9b1   :  { %17631 = vmatpush3.bf16.msra.mxu1 %v19232_v10  ;;  %16110 = vmatprep.mubr.msk.f32.mxu1 %vm18774_vm2, %v18775_v46 }
 0x9b2   :  { %17632 = vmatprep.subr.bf16.mxu1 %v18773_v8 }
 0x9b5   :  { %17634 = vmatpush3.bf16.msra.mxu1 %v19235_v11 }
 0x9b6   :  { %17635 = vmatprep.subr.bf16.mxu1 %v18773_v8 }
 0x9b8   :  { %16111 = vmatmul.mubr.f32.vlgmr.msra.gmra.mrb[48].mxu1 %v5053_v34 }
 0x9b9   :  { %17637 = vmatpush3.bf16.msra.mxu1 %v19269_v32  ;;  %16121 = vmatprep.mubr.msk.f32.mxu1 %vm18774_vm2, %v18775_v46 }
 0x9ba   :  { %17638 = vmatprep.subr.bf16.mxu1 %v18773_v8 }
 0x9bd   :  { %17640 = vmatpush3.bf16.msra.mxu1 %v19280_v38 }
 0x9be   :  { %17641 = vmatprep.subr.bf16.mxu1 %v18773_v8 }
 0x9c0   :  { %16122 = vmatmul.mubr.f32.vlgmr.msra.gmra.mrb[50].mxu1 %v5051_v6 }
 0x9c1   :  { %17643 = vmatpush3.bf16.msra.mxu1 %v19232_v10  ;;  %16132 = vmatprep.mubr.msk.f32.mxu1 %vm18774_vm2, %v18775_v46 }
 0x9c2   :  { %17644 = vmatprep.subr.bf16.mxu1 %v18773_v8 }
 0x9c5   :  { %17646 = vmatpush3.bf16.msra.mxu1 %v19235_v11 }
 0x9c6   :  { %17653 = vmatprep.subr.bf16.mxu1 %v18773_v8 }
 0x9c8   :  { %16133 = vmatmul.mubr.f32.vlgmr.msra.gmra.mrb[52].mxu1 %v5051_v6 }
 0x9c9   :  { %17655 = vmatpush3.bf16.msra.mxu1 %v19320_v48  ;;  %16154 = vmatprep.mubr.msk.f32.mxu1 %vm18774_vm2, %v18775_v46 }
 0x9ca   :  { %17656 = vmatprep.subr.bf16.mxu1 %v18773_v8 }
 0x9cd   :  { %17658 = vmatpush3.bf16.msra.mxu1 %v19322_v41 }
 0x9ce   :  { %17665 = vmatprep.subr.bf16.mxu1 %v18773_v8 }
 0x9d0   :  { %16155 = vmatmul.mubr.f32.vlgmr.msra.gmra.mrb[54].mxu1 %v19622_v39 }
 0x9d1   :  { %17667 = vmatpush3.bf16.msra.mxu1 %v19296_v53  ;;  %16176 = vmatprep.mubr.msk.f32.mxu1 %vm18774_vm2, %v18775_v46 }
 0x9d2   :  { %17668 = vmatprep.subr.bf16.mxu1 %v18773_v8 }
 0x9d5   :  { %17670 = vmatpush3.bf16.msra.mxu1 %v19306_v60 }
 0x9d6   :  { %17677 = vmatprep.subr.bf16.mxu1 %v18773_v8 }
 0x9d8   :  { %16177 = vmatmul.mubr.f32.vlgmr.msra.gmra.mrb[56].mxu1 %v19625_v43 }
 0x9d9   :  { %17679 = vmatpush3.bf16.msra.mxu1 %v19296_v53  ;;  %16198 = vmatprep.mubr.msk.f32.mxu1 %vm18774_vm2, %v18775_v46 }
 0x9da   :  { %17680 = vmatprep.subr.bf16.mxu1 %v18773_v8 }
 0x9dd   :  { %17682 = vmatpush3.bf16.msra.mxu1 %v19306_v60 }
 0x9de   :  { %17719 = vmatprep.subr.bf16.mxu1 %v18773_v8 }
 0x9e0   :  { %16199 = vmatmul.mubr.f32.vlgmr.msra.gmra.mrb[58].mxu1 %v19622_v39 }
 0x9e1   :  { %17721 = vmatpush3.bf16.msra.mxu1 %v19232_v10  ;;  %16275 = vmatprep.mubr.msk.f32.mxu1 %vm18774_vm2, %v18775_v46 }
 0x9e2   :  { %17722 = vmatprep.subr.bf16.mxu1 %v18773_v8 }
 0x9e5   :  { %17724 = vmatpush3.bf16.msra.mxu1 %v19235_v11 }
 0x9e6   :  { %17725 = vmatprep.subr.bf16.mxu1 %v18773_v8 }
 0xa4f   :  { %v4948_v26 = vpop.f32.mrb[28].mxu0 }
 0xa50   :  { %v4952_v13 = vadd.f32 %v19211_v55, %v4948_v26  ;;  %v16068_v58 = vpop.f32.mrb[29].mxu0 }
 0xa52   :  { %18512 = vtanh.f32 %v4952_v13 }
 0xa57   :  { %v5542_v49 = vpop.f32.mrb[30].mxu0 }
 0xa58   :  { %v16145_v25 = vpop.f32.mrb[31].mxu0 }
 0xa5c   :  { %v18513_v40 = vpop.eup %18512 }
 0xa5d   :  { %4962 = vrot.lane.b32.xlu0 %v18513_v40, %s18776_s3 }
 0xa5f   :  { %v5713_v1 = vpop.f32.mrb[32].mxu0 }
 0xa60   :  { %v16167_v33 = vpop.f32.mrb[33].mxu0 }
 0xa67   :  { %v5873_v45 = vpop.f32.mrb[34].mxu0 }
 0xa68   :  { %v16189_v56 = vpop.f32.mrb[35].mxu0 }
 0xa69   :  { %v14579_v56 = vmul.f32 -1.442695, %v4952_v13 }
 0xa6b   :  { %18514 = vpow2.f32 %v14579_v56 }
 0xa73   :  { %v5057_v59 = vpop.f32.mrb[42].mxu1 }
 0xa74   :  { %v16079_v63 = vpop.f32.mrb[43].mxu1 }
 0xa7b   :  { %v5148_v5 = vpop.f32.mrb[44].mxu1 }
 0xa7c   :  { %v5149_v16 = vadd.f32 %v5148_v5, %v5057_v59  ;;  %v16090_v7 = vpop.f32.mrb[45].mxu1 }
 0xa7d   :  { %v18515_v7 = vpop.eup %18514 }
 0xa83   :  { %v5228_v28 = vpop.f32.mrb[46].mxu1 }
 0xa84   :  { %v5229_v14 = vadd.f32 %v5228_v28, %v5149_v16  ;;  %v16101_v20 = vpop.f32.mrb[47].mxu1  ;;  %v4956_v28 = vadd.f32 1.0, %v18515_v7 }
 0xa8b   :  { %v5305_v55 = vpop.f32.mrb[48].mxu1 }
 0xa8c   :  { %v5306_v39 = vadd.f32 %v5305_v55, %v5229_v14  ;;  %v16112_v35 = vpop.f32.mrb[49].mxu1 }
 0xa93   :  { %v5388_v43 = vpop.f32.mrb[50].mxu1 }
 0xa94   :  { %v5389_v15 = vadd.f32 %v5388_v43, %v5306_v39  ;;  %v16123_v42 = vpop.f32.mrb[51].mxu1 }
 0xa9b   :  { %v5463_v30 = vpop.f32.mrb[52].mxu1 }
 0xa9c   :  { %v5464_v31 = vadd.f32 %v5463_v30, %v5389_v15  ;;  %v16134_v6 = vpop.f32.mrb[53].mxu1 }
 0xa9e   :  { %v5543_v54 = vadd.f32 %v5542_v49, %v5464_v31 }
 0xaa3   :  { %v5633_v34 = vpop.f32.mrb[54].mxu1 }
 0xaa4   :  { %v5634_v50 = vadd.f32 %v5633_v34, %v5543_v54  ;;  %v16156_v57 = vpop.f32.mrb[55].mxu1 }
 0xaa6   :  { %v5714_v26 = vadd.f32 %v5713_v1, %v5634_v50 }
 0xaab   :  { %v5790_v58 = vpop.f32.mrb[56].mxu1 }
 0xaac   :  { %v5791_v25 = vadd.f32 %v5790_v58, %v5714_v26  ;;  %v16178_v40 = vpop.f32.mrb[57].mxu1 }
 0xaae   :  { %v5874_v33 = vadd.f32 %v5873_v45, %v5791_v25 }
 0xab3   :  { %v5948_v59 = vpop.f32.mrb[58].mxu1 }
 0xab4   :  { %v5949_v63 = vadd.f32 %v5948_v59, %v5874_v33  ;;  %v16200_v5 = vpop.f32.mrb[59].mxu1 }
 0xab6   :  { %v5952_v16 = vadd.f32 %v19462_v27, %v5949_v63 }
 0xab8   :  { %18516 = vtanh.f32 %v5952_v16  ;;  %v14580_v45 = vmul.f32 -1.442695, %v5952_v16 }
 0xab9   :  { %18518 = vrcp.f32 %v4956_v28 }
 0xaba   :  { %18520 = vpow2.f32 %v14580_v45 }
 0xac2   :  { %v18517_v14 = vpop.eup %18516 }
 0xac3   :  { %5962 = vrot.lane.b32.xlu1 %v18517_v14, %s18776_s3  ;;  %v18519_v49 = vpop.eup %18518 }
 0xac4   :  { %v18521_v13 = vpop.eup %18520  ;;  %v4960_v43 = vmul.f32 %v18519_v49, %v19610_v52 }
 0xac5   :  { %v5956_v55 = vadd.f32 1.0, %v18521_v13 }
 0xac7   :  { %18522 = vrcp.f32 %v5956_v55 }
 0xacf   :  { %v4963_v1 = vpop.permute.xlu0 %4962 }
 0xad0   :  { %v4965_v20 = vmul.f32 %v18519_v49, %v4963_v1 }
 0xad1   :  { %v18523_v39 = vpop.eup %18522 }
 0xad2   :  { %4967 = vrot.lane.b32.xlu0 %v4965_v20, %s18777_s19  ;;  %v5960_v31 = vmul.f32 %v18523_v39, %v19615_v61 }
 0xb35   :  { %v5963_v35 = vpop.permute.xlu1 %5962 }
 0xb36   :  { %v5965_v27 = vmul.f32 %v18523_v39, %v5963_v35 }
 0xb38   :  { %5967 = vrot.lane.b32.xlu1 %v5965_v27, %s18777_s19 }
 0xb44   :  { %v4968_v15 = vpop.permute.xlu0 %4967 }
 0xb45   :  { %v19752_v42 = vadd.f32 %v4968_v15, %v4960_v43 }
 0xb47   :  { %18524 = vtanh.f32 %v19752_v42 }
 0xb51   :  { %v18525_v30 = vpop.eup %18524 }
 0xb52   :  { %4973 = vrot.lane.b32.xlu0 %v18525_v30, %s18776_s3 }
 0xbaa   :  { %v5968_v6 = vpop.permute.xlu1 %5967 }
 0xbab   :  { %v19757_v54 = vadd.f32 %v5968_v6, %v5960_v31 }
 0xbad   :  { %18526 = vtanh.f32 %v19757_v54 }
 0xbb7   :  { %v18527_v34 = vpop.eup %18526 }
 0xbb8   :  { %5973 = vrot.lane.b32.xlu1 %v18527_v34, %s18776_s3 }
 0xbc4   :  { %v4974_v50 = vpop.permute.xlu0 %4973 }
 0xbc5   :  { %v4976_v52 = vmul.f32 %v18519_v49, %v4974_v50 }
 0xbc7   :  { %5978 = vrot.lane.b32.xlu0 %v4976_v52, %s18777_s19 }
 0xc2a   :  { %v5974_v57 = vpop.permute.xlu1 %5973 }
 0xc2b   :  { %v5976_v26 = vmul.f32 %v18523_v39, %v5974_v57 }
 0xc2d   :  { %6493 = vrot.lane.b32.xlu1 %v5976_v26, %s18777_s19 }
 0xc39   :  { %v5979_v58 = vpop.permute.xlu0 %5978 }
 0xc3a   :  { %v5980_v25 = vsel %vm923_vm3, %v5979_v58, 0 }
 0xc3b   :  { %v19764_v61 = vand.u32 4294901760, %v5980_v25 }
 0xc3d   :  { %v6052_v40 = vsub.f32 %v5980_v25, %v19764_v61 }
 0xc3f   :  { %v19767_v33 = vand.u32 4294901760, %v6052_v40 }
 0xc41   :  { %v6054_v56 = vsub.f32 %v6052_v40, %v19767_v33 }
 0xc43   :  { %v6055_v59 = vand.u32 4294901760, %v6054_v56 }
 0xc45   :  { %16210 = vmatmul.mubr.f32.vlgmr.msra.gmra.mrb[36].mxu0 %v6055_v59 }
 0xc46   :  { %17691 = vmatpush3.bf16.msra.mxu0 %v19100_v47  ;;  %16220 = vmatprep.mubr.msk.f32.mxu0 %vm18774_vm2, %v18775_v46 }
 0xc47   :  { %17692 = vmatprep.subr.bf16.mxu0 %v18773_v8 }
 0xc4a   :  { %17694 = vmatpush3.bf16.msra.mxu0 %v19108_v51 }
 0xc4b   :  { %17695 = vmatprep.subr.bf16.mxu0 %v18773_v8 }
 0xc4d   :  { %16221 = vmatmul.mubr.f32.vlgmr.msra.gmra.mrb[36].mxu0 %v19764_v61 }
 0xc4e   :  { %17697 = vmatpush3.bf16.msra.mxu0 %v19122_v19  ;;  %16231 = vmatprep.mubr.msk.f32.mxu0 %vm18774_vm2, %v18775_v46 }
 0xc4f   :  { %17698 = vmatprep.subr.bf16.mxu0 %v18773_v8 }
 0xc52   :  { %17700 = vmatpush3.bf16.msra.mxu0 %v19133_v21 }
 0xc53   :  { %17701 = vmatprep.subr.bf16.mxu0 %v18773_v8 }
 0xc55   :  { %16232 = vmatmul.mubr.f32.vlgmr.msra.gmra.mrb[36].mxu0 %v6052_v40 }
 0xc56   :  { %17703 = vmatpush3.bf16.msra.mxu0 %v19068_v18  ;;  %16242 = vmatprep.mubr.msk.f32.mxu0 %vm18774_vm2, %v18775_v46 }
 0xc57   :  { %17704 = vmatprep.subr.bf16.mxu0 %v18773_v8 }
 0xc5a   :  { %17706 = vmatpush3.bf16.msra.mxu0 %v19083_v37 }
 0xc5b   :  { %17707 = vmatprep.subr.bf16.mxu0 %v18773_v8 }
 0xc5d   :  { %16243 = vmatmul.mubr.f32.vlgmr.msra.gmra.mrb[36].mxu0 %v19767_v33 }
 0xc5e   :  { %17709 = vmatpush3.bf16.msra.mxu0 %v19161_v23  ;;  %16253 = vmatprep.mubr.msk.f32.mxu0 %vm18774_vm2, %v18775_v46 }
 0xc5f   :  { %17710 = vmatprep.subr.bf16.mxu0 %v18773_v8 }
 0xc62   :  { %17712 = vmatpush3.bf16.msra.mxu0 %v19172_v9 }
 0xc63   :  { %17713 = vmatprep.subr.bf16.mxu0 %v18773_v8 }
 0xc65   :  { %16254 = vmatmul.mubr.f32.vlgmr.msra.gmra.mrb[36].mxu0 %v19764_v61 }
 0xc66   :  { %17715 = vmatpush3.bf16.msra.mxu0 %v19068_v18  ;;  %16264 = vmatprep.mubr.msk.f32.mxu0 %vm18774_vm2, %v18775_v46 }
 0xc67   :  { %17716 = vmatprep.subr.bf16.mxu0 %v18773_v8 }
 0xc6a   :  { %17718 = vmatpush3.bf16.msra.mxu0 %v19083_v37 }
 0xc6b   :  { %17755 = vmatprep.subr.bf16.mxu0 %v18773_v8 }
 0xc6d   :  { %16265 = vmatmul.mubr.f32.vlgmr.msra.gmra.mrb[36].mxu0 %v19764_v61 }
 0xc6e   :  { %17757 = vmatpush3.bf16.msra.mxu0 %v19296_v53  ;;  %16341 = vmatprep.mubr.msk.f32.mxu0 %vm18774_vm2, %v18775_v46 }
 0xc6f   :  { %17758 = vmatprep.subr.bf16.mxu0 %v18773_v8 }
 0xc72   :  { %17760 = vmatpush3.bf16.msra.mxu0 %v19306_v60 }
 0xc73   :  { %17767 = vmatprep.subr.bf16.mxu0 %v18773_v8 }
 0xc75   :  { %16342 = vmatmul.mubr.f32.vlgmr.msra.gmra.mrb[38].mxu0 %v6055_v59 }
 0xc76   :  { %17769 = vmatpush3.bf16.msra.mxu0 %v19310_v3  ;;  %16363 = vmatprep.mubr.msk.f32.mxu0 %vm18774_vm2, %v18775_v46 }
 0xc77   :  { %17770 = vmatprep.subr.bf16.mxu0 %v18773_v8 }
 0xc7a   :  { %17772 = vmatpush3.bf16.msra.mxu0 %v19314_v12 }
 0xc7b   :  { %17779 = vmatprep.subr.bf16.mxu0 %v18773_v8 }
 0xc7d   :  { %16364 = vmatmul.mubr.f32.vlgmr.msra.gmra.mrb[40].mxu0 %v6052_v40 }
 0xc7e   :  { %17781 = vmatpush3.bf16.msra.mxu0 %v19316_v17  ;;  %16385 = vmatprep.mubr.msk.f32.mxu0 %vm18774_vm2, %v18775_v46 }
 0xc7f   :  { %17782 = vmatprep.subr.bf16.mxu0 %v18773_v8 }
 0xc82   :  { %17784 = vmatpush3.bf16.msra.mxu0 %v19318_v36 }
 0xc83   :  { %17791 = vmatprep.subr.bf16.mxu0 %v18773_v8 }
 0xc85   :  { %16386 = vmatmul.mubr.f32.vlgmr.msra.gmra.mrb[42].mxu0 %v19764_v61 }
 0xc86   :  { %17793 = vmatpush3.bf16.msra.mxu0 %v19068_v18  ;;  %16407 = vmatprep.mubr.msk.f32.mxu0 %vm18774_vm2, %v18775_v46 }
 0xc87   :  { %17794 = vmatprep.subr.bf16.mxu0 %v18773_v8 }
 0xc8a   :  { %17796 = vmatpush3.bf16.msra.mxu0 %v19083_v37 }
 0xc8b   :  { %17797 = vmatprep.subr.bf16.mxu0 %v18773_v8 }
 0xc9f   :  { %v6494_v63 = vpop.permute.xlu1 %6493 }
 0xca0   :  { %v6495_v5 = vsel %vm923_vm3, %v6494_v63, 0 }
 0xca1   :  { %v6566_v16 = vand.u32 4294901760, %v6495_v5 }
 0xca3   :  { %v6567_v7 = vsub.f32 %v6495_v5, %v6566_v16 }
 0xca5   :  { %v6568_v28 = vand.u32 4294901760, %v6567_v7 }
 0xca7   :  { %v6569_v14 = vsub.f32 %v6567_v7, %v6568_v28 }
 0xca9   :  { %v6570_v49 = vand.u32 4294901760, %v6569_v14 }
 0xcab   :  { %16276 = vmatmul.mubr.f32.vlgmr.msra.gmra.mrb[60].mxu1 %v6570_v49 }
 0xcac   :  { %17727 = vmatpush3.bf16.msra.mxu1 %v19400_v22  ;;  %16286 = vmatprep.mubr.msk.f32.mxu1 %vm18774_vm2, %v18775_v46 }
 0xcad   :  { %17728 = vmatprep.subr.bf16.mxu1 %v18773_v8 }
 0xcb0   :  { %17730 = vmatpush3.bf16.msra.mxu1 %v19405_v44 }
 0xcb1   :  { %17731 = vmatprep.subr.bf16.mxu1 %v18773_v8 }
 0xcb3   :  { %16287 = vmatmul.mubr.f32.vlgmr.msra.gmra.mrb[62].mxu1 %v6566_v16 }
 0xcb4   :  { %17733 = vmatpush3.bf16.msra.mxu1 %v19245_v24  ;;  %16297 = vmatprep.mubr.msk.f32.mxu1 %vm18774_vm2, %v18775_v46 }
 0xcb5   :  { %17734 = vmatprep.subr.bf16.mxu1 %v18773_v8 }
 0xcb8   :  { %17736 = vmatpush3.bf16.msra.mxu1 %v19257_v29 }
 0xcb9   :  { %17737 = vmatprep.subr.bf16.mxu1 %v18773_v8 }
 0xcbb   :  { %16298 = vmatmul.mubr.f32.vlgmr.msra.gmra.mrb[64].mxu1 %v6567_v7 }
 0xcbc   :  { %17739 = vmatpush3.bf16.msra.mxu1 %v19232_v10  ;;  %16308 = vmatprep.mubr.msk.f32.mxu1 %vm18774_vm2, %v18775_v46 }
 0xcbd   :  { %17740 = vmatprep.subr.bf16.mxu1 %v18773_v8 }
 0xcc0   :  { %17742 = vmatpush3.bf16.msra.mxu1 %v19235_v11 }
 0xcc1   :  { %17743 = vmatprep.subr.bf16.mxu1 %v18773_v8 }
 0xcc3   :  { %16309 = vmatmul.mubr.f32.vlgmr.msra.gmra.mrb[66].mxu1 %v6568_v28 }
 0xcc4   :  { %17745 = vmatpush3.bf16.msra.mxu1 %v19269_v32  ;;  %16319 = vmatprep.mubr.msk.f32.mxu1 %vm18774_vm2, %v18775_v46 }
 0xcc5   :  { %17746 = vmatprep.subr.bf16.mxu1 %v18773_v8 }
 0xcc8   :  { %17748 = vmatpush3.bf16.msra.mxu1 %v19280_v38 }
 0xcc9   :  { %17749 = vmatprep.subr.bf16.mxu1 %v18773_v8 }
 0xccb   :  { %16320 = vmatmul.mubr.f32.vlgmr.msra.gmra.mrb[68].mxu1 %v6566_v16 }
 0xccc   :  { %17751 = vmatpush3.bf16.msra.mxu1 %v19232_v10  ;;  %16330 = vmatprep.mubr.msk.f32.mxu1 %vm18774_vm2, %v18775_v46 }
 0xccd   :  { %17752 = vmatprep.subr.bf16.mxu1 %v18773_v8 }
 0xcd0   :  { %17754 = vmatpush3.bf16.msra.mxu1 %v19235_v11 }
 0xcd1   :  { %17761 = vmatprep.subr.bf16.mxu1 %v18773_v8 }
 0xcd3   :  { %16331 = vmatmul.mubr.f32.vlgmr.msra.gmra.mrb[70].mxu1 %v6566_v16 }
 0xcd4   :  { %17763 = vmatpush3.bf16.msra.mxu1 %v19320_v48  ;;  %16352 = vmatprep.mubr.msk.f32.mxu1 %vm18774_vm2, %v18775_v46 }
 0xcd5   :  { %17764 = vmatprep.subr.bf16.mxu1 %v18773_v8 }
 0xcd8   :  { %17766 = vmatpush3.bf16.msra.mxu1 %v19322_v41 }
 0xcd9   :  { %17773 = vmatprep.subr.bf16.mxu1 %v18773_v8 }
 0xcdb   :  { %16353 = vmatmul.mubr.f32.vlgmr.msra.gmra.mrb[72].mxu1 %v19764_v61 }
 0xcdc   :  { %17775 = vmatpush3.bf16.msra.mxu1 %v19296_v53  ;;  %16374 = vmatprep.mubr.msk.f32.mxu1 %vm18774_vm2, %v18775_v46 }
 0xcdd   :  { %17776 = vmatprep.subr.bf16.mxu1 %v18773_v8 }
 0xce0   :  { %17778 = vmatpush3.bf16.msra.mxu1 %v19306_v60 }
 0xce1   :  { %17785 = vmatprep.subr.bf16.mxu1 %v18773_v8 }
 0xce3   :  { %16375 = vmatmul.mubr.f32.vlgmr.msra.gmra.mrb[74].mxu1 %v19767_v33 }
 0xce4   :  { %17787 = vmatpush3.bf16.msra.mxu1 %v19296_v53  ;;  %16396 = vmatprep.mubr.msk.f32.mxu1 %vm18774_vm2, %v18775_v46 }
 0xce5   :  { %17788 = vmatprep.subr.bf16.mxu1 %v18773_v8 }
 0xce8   :  { %17790 = vmatpush3.bf16.msra.mxu1 %v19306_v60 }
 0xce9   :  { %17827 = vmatprep.subr.bf16.mxu1 %v18773_v8 }
 0xceb   :  { %16397 = vmatmul.mubr.f32.vlgmr.msra.gmra.mrb[76].mxu1 %v19764_v61 }
 0xcec   :  { %17829 = vmatpush3.bf16.msra.mxu1 %v19232_v10  ;;  %16473 = vmatprep.mubr.msk.f32.mxu1 %vm18774_vm2, %v18775_v46 }
 0xced   :  { %17830 = vmatprep.subr.bf16.mxu1 %v18773_v8 }
 0xcf0   :  { %17832 = vmatpush3.bf16.msra.mxu1 %v19235_v11 }
 0xcf1   :  { %17833 = vmatprep.subr.bf16.mxu1 %v18773_v8 }
 0xd40   :  { %v6463_v1 = vpop.f32.mrb[36].mxu0 }
 0xd41   :  { %v6467_v20 = vadd.f32 %v19217_v0, %v6463_v1  ;;  %v16266_v45 = vpop.f32.mrb[37].mxu0 }
 0xd43   :  { %18528 = vtanh.f32 %v6467_v20  ;;  %v14581_v56 = vmul.f32 -1.442695, %v6467_v20 }
 0xd45   :  { %18530 = vpow2.f32 %v14581_v56 }
 0xd48   :  { %v7057_v13 = vpop.f32.mrb[38].mxu0 }
 0xd49   :  { %v16343_v55 = vpop.f32.mrb[39].mxu0 }
 0xd4d   :  { %v18529_v39 = vpop.eup %18528 }
 0xd4e   :  { %6477 = vrot.lane.b32.xlu0 %v18529_v39, %s18776_s3 }
 0xd4f   :  { %v18531_v28 = vpop.eup %18530 }
 0xd50   :  { %v7228_v35 = vpop.f32.mrb[40].mxu0  ;;  %v6471_v45 = vadd.f32 1.0, %v18531_v28 }
 0xd51   :  { %v16365_v27 = vpop.f32.mrb[41].mxu0 }
 0xd52   :  { %18532 = vrcp.f32 %v6471_v45 }
 0xd58   :  { %v7388_v43 = vpop.f32.mrb[42].mxu0 }
 0xd59   :  { %v16387_v15 = vpop.f32.mrb[43].mxu0 }
 0xd5c   :  { %v18533_v20 = vpop.eup %18532 }
 0xd7e   :  { %v6572_v30 = vpop.f32.mrb[60].mxu1 }
 0xd7f   :  { %v16277_v31 = vpop.f32.mrb[61].mxu1 }
 0xd86   :  { %v6663_v6 = vpop.f32.mrb[62].mxu1 }
 0xd87   :  { %v6664_v34 = vadd.f32 %v6663_v6, %v6572_v30  ;;  %v16288_v50 = vpop.f32.mrb[63].mxu1 }
 0xd8e   :  { %v6743_v52 = vpop.f32.mrb[64].mxu1 }
 0xd8f   :  { %v6744_v57 = vadd.f32 %v6743_v52, %v6664_v34  ;;  %v16299_v26 = vpop.f32.mrb[65].mxu1 }
 0xd96   :  { %v6820_v0 = vpop.f32.mrb[66].mxu1 }
 0xd97   :  { %v6821_v58 = vadd.f32 %v6820_v0, %v6744_v57  ;;  %v16310_v25 = vpop.f32.mrb[67].mxu1  ;;  %v6475_v0 = vmul.f32 %v18533_v20, %v19752_v42 }
 0xd9e   :  { %v6903_v61 = vpop.f32.mrb[68].mxu1 }
 0xd9f   :  { %v6904_v40 = vadd.f32 %v6903_v61, %v6821_v58  ;;  %v16321_v33 = vpop.f32.mrb[69].mxu1 }
 0xda6   :  { %v6978_v59 = vpop.f32.mrb[70].mxu1 }
 0xda7   :  { %v6979_v63 = vadd.f32 %v6978_v59, %v6904_v40  ;;  %v16332_v5 = vpop.f32.mrb[71].mxu1 }
 0xda9   :  { %v7058_v16 = vadd.f32 %v7057_v13, %v6979_v63  ;;  %v19892_v13 = vld [vmem:[%s20610_s6] ss:$0 sm:$0xff] }
 0xdae   :  { %v7148_v7 = vpop.f32.mrb[72].mxu1 }
 0xdaf   :  { %v7149_v14 = vadd.f32 %v7148_v7, %v7058_v16  ;;  %v16354_v49 = vpop.f32.mrb[73].mxu1 }
 0xdb1   :  { %v7229_v1 = vadd.f32 %v7228_v35, %v7149_v14 }
 0xdb6   :  { %v7305_v55 = vpop.f32.mrb[74].mxu1 }
 0xdb7   :  { %v7306_v39 = vadd.f32 %v7305_v55, %v7229_v1  ;;  %v16376_v27 = vpop.f32.mrb[75].mxu1 }
 0xdb9   :  { %v7389_v15 = vadd.f32 %v7388_v43, %v7306_v39 }
 0xdbe   :  { %v7463_v30 = vpop.f32.mrb[76].mxu1 }
 0xdbf   :  { %v7464_v31 = vadd.f32 %v7463_v30, %v7389_v15  ;;  %v16398_v6 = vpop.f32.mrb[77].mxu1 }
 0xdc0   :  { %v6478_v34 = vpop.permute.xlu0 %6477 }
 0xdc1   :  { %v7467_v50 = vadd.f32 %v19892_v13, %v7464_v31  ;;  %v6480_v52 = vmul.f32 %v18533_v20, %v6478_v34 }
 0xdc3   :  { %18534 = vtanh.f32 %v7467_v50  ;;  %6482 = vrot.lane.b32.xlu0 %v6480_v52, %s18777_s19  ;;  %v14582_v43 = vmul.f32 -1.442695, %v7467_v50 }
 0xdc5   :  { %18536 = vpow2.f32 %v14582_v43 }
 0xdcd   :  { %v18535_v35 = vpop.eup %18534 }
 0xdce   :  { %7477 = vrot.lane.b32.xlu1 %v18535_v35, %s18776_s3 }
 0xdcf   :  { %v18537_v57 = vpop.eup %18536 }
 0xdd0   :  { %v7471_v26 = vadd.f32 1.0, %v18537_v57 }
 0xdd2   :  { %18538 = vrcp.f32 %v7471_v26 }
 0xddc   :  { %v18539_v61 = vpop.eup %18538 }
 0xddd   :  { %v7475_v59 = vmul.f32 %v18539_v61, %v19757_v54 }
 0xe35   :  { %v6483_v58 = vpop.permute.xlu0 %6482 }
 0xe36   :  { %v19898_v25 = vadd.f32 %v6483_v58, %v6475_v0 }
 0xe38   :  { %18540 = vtanh.f32 %v19898_v25 }
 0xe40   :  { %v7478_v40 = vpop.permute.xlu1 %7477 }
 0xe41   :  { %v7480_v33 = vmul.f32 %v18539_v61, %v7478_v40 }
 0xe42   :  { %v18541_v56 = vpop.eup %18540 }
 0xe43   :  { %7482 = vrot.lane.b32.xlu1 %v7480_v33, %s18777_s19  ;;  %6488 = vrot.lane.b32.xlu0 %v18541_v56, %s18776_s3 }
 0xeb5   :  { %v7483_v63 = vpop.permute.xlu1 %7482  ;;  %v6489_v5 = vpop.permute.xlu0 %6488 }
 0xeb6   :  { %v19904_v16 = vadd.f32 %v7483_v63, %v7475_v59  ;;  %v6491_v42 = vmul.f32 %v18533_v20, %v6489_v5 }
 0xeb8   :  { %18542 = vtanh.f32 %v19904_v16  ;;  %7493 = vrot.lane.b32.xlu0 %v6491_v42, %s18777_s19 }
 0xec2   :  { %v18543_v7 = vpop.eup %18542 }
 0xec3   :  { %7488 = vrot.lane.b32.xlu1 %v18543_v7, %s18776_s3 }
 0xf2a   :  { %v7494_v28 = vpop.permute.xlu0 %7493 }
 0xf2b   :  { %v7495_v14 = vsel %vm923_vm3, %v7494_v28, 0 }
 0xf2c   :  { %v19910_v49 = vand.u32 4294901760, %v7495_v14 }
 0xf2e   :  { %v7567_v1 = vsub.f32 %v7495_v14, %v19910_v49 }
 0xf30   :  { %v19913_v54 = vand.u32 4294901760, %v7567_v1 }
 0xf32   :  { %v7569_v45 = vsub.f32 %v7567_v1, %v19913_v54 }
 0xf34   :  { %v7570_v55 = vand.u32 4294901760, %v7569_v45 }
 0xf35   :  { %v7489_v39 = vpop.permute.xlu1 %7488 }
 0xf36   :  { %v7491_v27 = vmul.f32 %v18539_v61, %v7489_v39  ;;  %16408 = vmatmul.mubr.f32.vlgmr.msra.gmra.mrb[44].mxu0 %v7570_v55 }
 0xf37   :  { %17799 = vmatpush3.bf16.msra.mxu0 %v19100_v47  ;;  %16418 = vmatprep.mubr.msk.f32.mxu0 %vm18774_vm2, %v18775_v46 }
 0xf38   :  { %8008 = vrot.lane.b32.xlu1 %v7491_v27, %s18777_s19  ;;  %17800 = vmatprep.subr.bf16.mxu0 %v18773_v8 }
 0xf3b   :  { %17802 = vmatpush3.bf16.msra.mxu0 %v19108_v51 }
 0xf3c   :  { %17803 = vmatprep.subr.bf16.mxu0 %v18773_v8 }
 0xf3e   :  { %16419 = vmatmul.mubr.f32.vlgmr.msra.gmra.mrb[44].mxu0 %v19910_v49 }
 0xf3f   :  { %17805 = vmatpush3.bf16.msra.mxu0 %v19122_v19  ;;  %16429 = vmatprep.mubr.msk.f32.mxu0 %vm18774_vm2, %v18775_v46 }
 0xf40   :  { %17806 = vmatprep.subr.bf16.mxu0 %v18773_v8 }
 0xf43   :  { %17808 = vmatpush3.bf16.msra.mxu0 %v19133_v21 }
 0xf44   :  { %17809 = vmatprep.subr.bf16.mxu0 %v18773_v8 }
 0xf46   :  { %16430 = vmatmul.mubr.f32.vlgmr.msra.gmra.mrb[44].mxu0 %v7567_v1 }
 0xf47   :  { %17811 = vmatpush3.bf16.msra.mxu0 %v19068_v18  ;;  %16440 = vmatprep.mubr.msk.f32.mxu0 %vm18774_vm2, %v18775_v46 }
 0xf48   :  { %17812 = vmatprep.subr.bf16.mxu0 %v18773_v8 }
 0xf4b   :  { %17814 = vmatpush3.bf16.msra.mxu0 %v19083_v37 }
 0xf4c   :  { %17815 = vmatprep.subr.bf16.mxu0 %v18773_v8 }
 0xf4e   :  { %16441 = vmatmul.mubr.f32.vlgmr.msra.gmra.mrb[44].mxu0 %v19913_v54 }
 0xf4f   :  { %17817 = vmatpush3.bf16.msra.mxu0 %v19161_v23  ;;  %16451 = vmatprep.mubr.msk.f32.mxu0 %vm18774_vm2, %v18775_v46 }
 0xf50   :  { %17818 = vmatprep.subr.bf16.mxu0 %v18773_v8 }
 0xf53   :  { %17820 = vmatpush3.bf16.msra.mxu0 %v19172_v9 }
 0xf54   :  { %17821 = vmatprep.subr.bf16.mxu0 %v18773_v8 }
 0xf56   :  { %16452 = vmatmul.mubr.f32.vlgmr.msra.gmra.mrb[44].mxu0 %v19910_v49 }
 0xf57   :  { %17823 = vmatpush3.bf16.msra.mxu0 %v19068_v18  ;;  %16462 = vmatprep.mubr.msk.f32.mxu0 %vm18774_vm2, %v18775_v46 }
 0xf58   :  { %17824 = vmatprep.subr.bf16.mxu0 %v18773_v8 }
 0xf5b   :  { %17826 = vmatpush3.bf16.msra.mxu0 %v19083_v37 }
 0xf5c   :  { %17863 = vmatprep.subr.bf16.mxu0 %v18773_v8 }
 0xf5e   :  { %16463 = vmatmul.mubr.f32.vlgmr.msra.gmra.mrb[44].mxu0 %v19910_v49 }
 0xf5f   :  { %17865 = vmatpush3.bf16.msra.mxu0 %v19296_v53  ;;  %16539 = vmatprep.mubr.msk.f32.mxu0 %vm18774_vm2, %v18775_v46 }
 0xf60   :  { %17866 = vmatprep.subr.bf16.mxu0 %v18773_v8 }
 0xf63   :  { %17868 = vmatpush3.bf16.msra.mxu0 %v19306_v60 }
 0xf64   :  { %17875 = vmatprep.subr.bf16.mxu0 %v18773_v8 }
 0xf66   :  { %16540 = vmatmul.mubr.f32.vlgmr.msra.gmra.mrb[46].mxu0 %v7570_v55 }
 0xf67   :  { %17877 = vmatpush3.bf16.msra.mxu0 %v19310_v3  ;;  %16561 = vmatprep.mubr.msk.f32.mxu0 %vm18774_vm2, %v18775_v46 }
 0xf68   :  { %17878 = vmatprep.subr.bf16.mxu0 %v18773_v8 }
 0xf6b   :  { %17880 = vmatpush3.bf16.msra.mxu0 %v19314_v12 }
 0xf6c   :  { %17887 = vmatprep.subr.bf16.mxu0 %v18773_v8 }
 0xf6e   :  { %16562 = vmatmul.mubr.f32.vlgmr.msra.gmra.mrb[48].mxu0 %v7567_v1 }
 0xf6f   :  { %17889 = vmatpush3.bf16.msra.mxu0 %v19316_v17  ;;  %16583 = vmatprep.mubr.msk.f32.mxu0 %vm18774_vm2, %v18775_v46 }
 0xf70   :  { %17890 = vmatprep.subr.bf16.mxu0 %v18773_v8 }
 0xf73   :  { %17892 = vmatpush3.bf16.msra.mxu0 %v19318_v36 }
 0xf74   :  { %17899 = vmatprep.subr.bf16.mxu0 %v18773_v8 }
 0xf76   :  { %16584 = vmatmul.mubr.f32.vlgmr.msra.gmra.mrb[50].mxu0 %v19910_v49 }
 0xf77   :  { %17901 = vmatpush3.bf16.msra.mxu0 %v19068_v18  ;;  %16605 = vmatprep.mubr.msk.f32.mxu0 %vm18774_vm2, %v18775_v46 }
 0xf78   :  { %17902 = vmatprep.subr.bf16.mxu0 %v18773_v8 }
 0xf7b   :  { %17904 = vmatpush3.bf16.msra.mxu0 %v19083_v37 }
 0xf7c   :  { %17905 = vmatprep.subr.bf16.mxu0 %v18773_v8 }
 0xfaa   :  { %v8009_v15 = vpop.permute.xlu1 %8008 }
 0xfab   :  { %v8010_v30 = vsel %vm923_vm3, %v8009_v15, 0 }
 0xfac   :  { %v8081_v31 = vand.u32 4294901760, %v8010_v30 }
 0xfae   :  { %v8082_v6 = vsub.f32 %v8010_v30, %v8081_v31 }
 0xfb0   :  { %v8083_v20 = vand.u32 4294901760, %v8082_v6 }
 0xfb2   :  { %v8084_v34 = vsub.f32 %v8082_v6, %v8083_v20 }
 0xfb4   :  { %v8085_v50 = vand.u32 4294901760, %v8084_v34 }
 0xfb6   :  { %16474 = vmatmul.mubr.f32.vlgmr.msra.gmra.mrb[78].mxu1 %v8085_v50 }
 0xfb7   :  { %17835 = vmatpush3.bf16.msra.mxu1 %v19400_v22  ;;  %16484 = vmatprep.mubr.msk.f32.mxu1 %vm18774_vm2, %v18775_v46 }
 0xfb8   :  { %17836 = vmatprep.subr.bf16.mxu1 %v18773_v8 }
 0xfbb   :  { %17838 = vmatpush3.bf16.msra.mxu1 %v19405_v44 }
 0xfbc   :  { %17839 = vmatprep.subr.bf16.mxu1 %v18773_v8 }
 0xfbe   :  { %16485 = vmatmul.mubr.f32.vlgmr.msra.gmra.mrb[80].mxu1 %v8081_v31 }
 0xfbf   :  { %17841 = vmatpush3.bf16.msra.mxu1 %v19245_v24  ;;  %16495 = vmatprep.mubr.msk.f32.mxu1 %vm18774_vm2, %v18775_v46 }
 0xfc0   :  { %17842 = vmatprep.subr.bf16.mxu1 %v18773_v8 }
 0xfc3   :  { %17844 = vmatpush3.bf16.msra.mxu1 %v19257_v29 }
 0xfc4   :  { %17845 = vmatprep.subr.bf16.mxu1 %v18773_v8 }
 0xfc6   :  { %16496 = vmatmul.mubr.f32.vlgmr.msra.gmra.mrb[82].mxu1 %v8082_v6 }
 0xfc7   :  { %17847 = vmatpush3.bf16.msra.mxu1 %v19232_v10  ;;  %16506 = vmatprep.mubr.msk.f32.mxu1 %vm18774_vm2, %v18775_v46 }
 0xfc8   :  { %17848 = vmatprep.subr.bf16.mxu1 %v18773_v8 }
 0xfcb   :  { %17850 = vmatpush3.bf16.msra.mxu1 %v19235_v11 }
 0xfcc   :  { %17851 = vmatprep.subr.bf16.mxu1 %v18773_v8 }
 0xfce   :  { %16507 = vmatmul.mubr.f32.vlgmr.msra.gmra.mrb[84].mxu1 %v8083_v20 }
 0xfcf   :  { %17853 = vmatpush3.bf16.msra.mxu1 %v19269_v32  ;;  %16517 = vmatprep.mubr.msk.f32.mxu1 %vm18774_vm2, %v18775_v46 }
 0xfd0   :  { %17854 = vmatprep.subr.bf16.mxu1 %v18773_v8 }
 0xfd3   :  { %17856 = vmatpush3.bf16.msra.mxu1 %v19280_v38 }
 0xfd4   :  { %17857 = vmatprep.subr.bf16.mxu1 %v18773_v8 }
 0xfd6   :  { %16518 = vmatmul.mubr.f32.vlgmr.msra.gmra.mrb[86].mxu1 %v8081_v31 }
 0xfd7   :  { %17859 = vmatpush3.bf16.msra.mxu1 %v19232_v10  ;;  %16528 = vmatprep.mubr.msk.f32.mxu1 %vm18774_vm2, %v18775_v46 }
 0xfd8   :  { %17860 = vmatprep.subr.bf16.mxu1 %v18773_v8 }
 0xfdb   :  { %17862 = vmatpush3.bf16.msra.mxu1 %v19235_v11 }
 0xfdc   :  { %17869 = vmatprep.subr.bf16.mxu1 %v18773_v8 }
 0xfde   :  { %16529 = vmatmul.mubr.f32.vlgmr.msra.gmra.mrb[88].mxu1 %v8081_v31 }
 0xfdf   :  { %17871 = vmatpush3.bf16.msra.mxu1 %v19320_v48  ;;  %16550 = vmatprep.mubr.msk.f32.mxu1 %vm18774_vm2, %v18775_v46 }
 0xfe0   :  { %17872 = vmatprep.subr.bf16.mxu1 %v18773_v8 }
 0xfe3   :  { %17874 = vmatpush3.bf16.msra.mxu1 %v19322_v41 }
 0xfe4   :  { %17881 = vmatprep.subr.bf16.mxu1 %v18773_v8 }
 0xfe6   :  { %16551 = vmatmul.mubr.f32.vlgmr.msra.gmra.mrb[90].mxu1 %v19910_v49 }
 0xfe7   :  { %17883 = vmatpush3.bf16.msra.mxu1 %v19296_v53  ;;  %16572 = vmatprep.mubr.msk.f32.mxu1 %vm18774_vm2, %v18775_v46 }
 0xfe8   :  { %17884 = vmatprep.subr.bf16.mxu1 %v18773_v8 }
 0xfeb   :  { %17886 = vmatpush3.bf16.msra.mxu1 %v19306_v60 }
 0xfec   :  { %17893 = vmatprep.subr.bf16.mxu1 %v18773_v8 }
 0xfee   :  { %16573 = vmatmul.mubr.f32.vlgmr.msra.gmra.mrb[92].mxu1 %v19913_v54 }
 0xfef   :  { %17895 = vmatpush3.bf16.msra.mxu1 %v19296_v53  ;;  %16594 = vmatprep.mubr.msk.f32.mxu1 %vm18774_vm2, %v18775_v46 }
 0xff0   :  { %17896 = vmatprep.subr.bf16.mxu1 %v18773_v8 }
 0xff3   :  { %17898 = vmatpush3.bf16.msra.mxu1 %v19306_v60 }
 0xff4   :  { %17935 = vmatprep.subr.bf16.mxu1 %v18773_v8 }
 0xff6   :  { %16595 = vmatmul.mubr.f32.vlgmr.msra.gmra.mrb[94].mxu1 %v19910_v49 }
 0xff7   :  { %17937 = vmatpush3.bf16.msra.mxu1 %v19232_v10  ;;  %16671 = vmatprep.mubr.msk.f32.mxu1 %vm18774_vm2, %v18775_v46 }
 0xff8   :  { %17938 = vmatprep.subr.bf16.mxu1 %v18773_v8 }
 0xffb   :  { %17940 = vmatpush3.bf16.msra.mxu1 %v19235_v11 }
 0xffc   :  { %17941 = vmatprep.subr.bf16.mxu1 %v18773_v8 }
0x1031   :  { %v7978_v52 = vpop.f32.mrb[44].mxu0 }
0x1032   :  { %v7982_v35 = vadd.f32 %v19215_v62, %v7978_v52  ;;  %v16464_v43 = vpop.f32.mrb[45].mxu0 }
0x1034   :  { %18544 = vtanh.f32 %v7982_v35  ;;  %v14583_v5 = vmul.f32 -1.442695, %v7982_v35 }
0x1036   :  { %18546 = vpow2.f32 %v14583_v5 }
0x1039   :  { %v8572_v57 = vpop.f32.mrb[46].mxu0 }
0x103a   :  { %v16541_v26 = vpop.f32.mrb[47].mxu0 }
0x103e   :  { %v18545_v0 = vpop.eup %18544 }
0x103f   :  { %7992 = vrot.lane.b32.xlu0 %v18545_v0, %s18776_s3 }
0x1040   :  { %v18547_v49 = vpop.eup %18546 }
0x1041   :  { %v8743_v58 = vpop.f32.mrb[48].mxu0  ;;  %v7986_v55 = vadd.f32 1.0, %v18547_v49 }
0x1042   :  { %v16563_v61 = vpop.f32.mrb[49].mxu0 }
0x1043   :  { %18548 = vrcp.f32 %v7986_v55 }
0x1049   :  { %v8903_v40 = vpop.f32.mrb[50].mxu0 }
0x104a   :  { %v16585_v33 = vpop.f32.mrb[51].mxu0 }
0x104d   :  { %v18549_v30 = vpop.eup %18548 }
0x1089   :  { %v8087_v56 = vpop.f32.mrb[78].mxu1 }
0x108a   :  { %v16475_v59 = vpop.f32.mrb[79].mxu1 }
0x1091   :  { %v8178_v63 = vpop.f32.mrb[80].mxu1 }
0x1092   :  { %v8179_v42 = vadd.f32 %v8178_v63, %v8087_v56  ;;  %v16486_v7 = vpop.f32.mrb[81].mxu1 }
0x1099   :  { %v8258_v28 = vpop.f32.mrb[82].mxu1 }
0x109a   :  { %v8259_v62 = vadd.f32 %v8258_v28, %v8179_v42  ;;  %v16497_v14 = vpop.f32.mrb[83].mxu1 }
0x10a1   :  { %v8335_v1 = vpop.f32.mrb[84].mxu1 }
0x10a2   :  { %v8336_v54 = vadd.f32 %v8335_v1, %v8259_v62  ;;  %v16508_v45 = vpop.f32.mrb[85].mxu1  ;;  %v7990_v62 = vmul.f32 %v18549_v30, %v19898_v25 }
0x10a9   :  { %v8418_v39 = vpop.f32.mrb[86].mxu1 }
0x10aa   :  { %v8419_v27 = vadd.f32 %v8418_v39, %v8336_v54  ;;  %v16519_v15 = vpop.f32.mrb[87].mxu1 }
0x10b1   :  { %v8493_v31 = vpop.f32.mrb[88].mxu1  ;;  %v7993_v6 = vpop.permute.xlu0 %7992 }
0x10b2   :  { %v8494_v20 = vadd.f32 %v8493_v31, %v8419_v27  ;;  %v16530_v34 = vpop.f32.mrb[89].mxu1  ;;  %v7995_v50 = vmul.f32 %v18549_v30, %v7993_v6 }
0x10b4   :  { %7997 = vrot.lane.b32.xlu0 %v7995_v50, %s18777_s19  ;;  %v8573_v52 = vadd.f32 %v8572_v57, %v8494_v20 }
0x10b9   :  { %v8663_v35 = vpop.f32.mrb[90].mxu1 }
0x10ba   :  { %v8664_v43 = vadd.f32 %v8663_v35, %v8573_v52  ;;  %v16552_v26 = vpop.f32.mrb[91].mxu1 }
0x10bc   :  { %v8744_v0 = vadd.f32 %v8743_v58, %v8664_v43 }
0x10c1   :  { %v8820_v61 = vpop.f32.mrb[92].mxu1 }
0x10c2   :  { %v8821_v33 = vadd.f32 %v8820_v61, %v8744_v0  ;;  %v16574_v56 = vpop.f32.mrb[93].mxu1 }
0x10c4   :  { %v8904_v59 = vadd.f32 %v8903_v40, %v8821_v33 }
0x10c9   :  { %v8978_v63 = vpop.f32.mrb[94].mxu1 }
0x10ca   :  { %v8979_v5 = vadd.f32 %v8978_v63, %v8904_v59  ;;  %v16596_v42 = vpop.f32.mrb[95].mxu1 }
0x10cc   :  { %v8982_v7 = vadd.f32 %v19892_v13, %v8979_v5 }
0x10ce   :  { %18550 = vtanh.f32 %v8982_v7  ;;  %v14584_v58 = vmul.f32 -1.442695, %v8982_v7 }
0x10d8   :  { %v18551_v28 = vpop.eup %18550 }
0x10d9   :  { %8992 = vrot.lane.b32.xlu1 %v18551_v28, %s18776_s3 }
0x1126   :  { %v7998_v57 = vpop.permute.xlu0 %7997 }
0x1127   :  { %v20040_v14 = vadd.f32 %v7998_v57, %v7990_v62 }
0x1129   :  { %18552 = vtanh.f32 %v20040_v14 }
0x112a   :  { %18554 = vpow2.f32 %v14584_v58 }
0x1133   :  { %v18553_v49 = vpop.eup %18552 }
0x1134   :  { %8003 = vrot.lane.b32.xlu0 %v18553_v49, %s18776_s3  ;;  %v18555_v40 = vpop.eup %18554 }
0x1135   :  { %v8986_v1 = vadd.f32 1.0, %v18555_v40 }
0x1137   :  { %18556 = vrcp.f32 %v8986_v1 }
0x1141   :  { %v18557_v54 = vpop.eup %18556 }
0x1142   :  { %v8990_v27 = vmul.f32 %v18557_v54, %v19904_v16 }
0x114b   :  { %v8993_v45 = vpop.permute.xlu1 %8992 }
0x114c   :  { %v8995_v55 = vmul.f32 %v18557_v54, %v8993_v45 }
0x114e   :  { %8997 = vrot.lane.b32.xlu1 %v8995_v55, %s18777_s19 }
0x11a6   :  { %v8004_v39 = vpop.permute.xlu0 %8003 }
0x11a7   :  { %v8006_v25 = vmul.f32 %v18549_v30, %v8004_v39 }
0x11a9   :  { %9008 = vrot.lane.b32.xlu0 %v8006_v25, %s18777_s19 }
0x11c0   :  { %v8998_v15 = vpop.permute.xlu1 %8997 }
0x11c1   :  { %v20047_v31 = vadd.f32 %v8998_v15, %v8990_v27 }
0x11c3   :  { %18558 = vtanh.f32 %v20047_v31 }
0x11cd   :  { %v18559_v6 = vpop.eup %18558 }
0x11ce   :  { %9003 = vrot.lane.b32.xlu1 %v18559_v6, %s18776_s3 }
0x121b   :  { %v9009_v20 = vpop.permute.xlu0 %9008 }
0x121c   :  { %v9010_v34 = vsel %vm923_vm3, %v9009_v20, 0 }
0x121d   :  { %v20052_v50 = vand.u32 4294901760, %v9010_v34 }
0x121f   :  { %v9082_v52 = vsub.f32 %v9010_v34, %v20052_v50 }
0x1221   :  { %v20055_v30 = vand.u32 4294901760, %v9082_v52 }
0x1223   :  { %v9084_v35 = vsub.f32 %v9082_v52, %v20055_v30 }
0x1225   :  { %v9085_v16 = vand.u32 4294901760, %v9084_v35 }
0x1227   :  { %16606 = vmatmul.mubr.f32.vlgmr.msra.gmra.mrb[52].mxu0 %v9085_v16 }
0x1228   :  { %17907 = vmatpush3.bf16.msra.mxu0 %v19100_v47  ;;  %16616 = vmatprep.mubr.msk.f32.mxu0 %vm18774_vm2, %v18775_v46 }
0x1229   :  { %17908 = vmatprep.subr.bf16.mxu0 %v18773_v8 }
0x122c   :  { %17910 = vmatpush3.bf16.msra.mxu0 %v19108_v51 }
0x122d   :  { %17911 = vmatprep.subr.bf16.mxu0 %v18773_v8 }
0x122f   :  { %16617 = vmatmul.mubr.f32.vlgmr.msra.gmra.mrb[52].mxu0 %v20052_v50 }
0x1230   :  { %17913 = vmatpush3.bf16.msra.mxu0 %v19122_v19  ;;  %16627 = vmatprep.mubr.msk.f32.mxu0 %vm18774_vm2, %v18775_v46 }
0x1231   :  { %17914 = vmatprep.subr.bf16.mxu0 %v18773_v8 }
0x1234   :  { %17916 = vmatpush3.bf16.msra.mxu0 %v19133_v21 }
0x1235   :  { %17917 = vmatprep.subr.bf16.mxu0 %v18773_v8 }
0x1237   :  { %16628 = vmatmul.mubr.f32.vlgmr.msra.gmra.mrb[52].mxu0 %v9082_v52 }
0x1238   :  { %17919 = vmatpush3.bf16.msra.mxu0 %v19068_v18  ;;  %16638 = vmatprep.mubr.msk.f32.mxu0 %vm18774_vm2, %v18775_v46 }
0x1239   :  { %17920 = vmatprep.subr.bf16.mxu0 %v18773_v8 }
0x123c   :  { %17922 = vmatpush3.bf16.msra.mxu0 %v19083_v37 }
0x123d   :  { %17923 = vmatprep.subr.bf16.mxu0 %v18773_v8 }
0x123f   :  { %16639 = vmatmul.mubr.f32.vlgmr.msra.gmra.mrb[52].mxu0 %v20055_v30 }
0x1240   :  { %v9004_v43 = vpop.permute.xlu1 %9003  ;;  %17925 = vmatpush3.bf16.msra.mxu0 %v19161_v23  ;;  %16649 = vmatprep.mubr.msk.f32.mxu0 %vm18774_vm2, %v18775_v46 }
0x1241   :  { %v9006_v26 = vmul.f32 %v18557_v54, %v9004_v43  ;;  %17926 = vmatprep.subr.bf16.mxu0 %v18773_v8 }
0x1243   :  { %9523 = vrot.lane.b32.xlu1 %v9006_v26, %s18777_s19 }
0x1244   :  { %17928 = vmatpush3.bf16.msra.mxu0 %v19172_v9 }
0x1245   :  { %17929 = vmatprep.subr.bf16.mxu0 %v18773_v8 }
0x1247   :  { %16650 = vmatmul.mubr.f32.vlgmr.msra.gmra.mrb[52].mxu0 %v20052_v50 }
0x1248   :  { %17931 = vmatpush3.bf16.msra.mxu0 %v19068_v18  ;;  %16660 = vmatprep.mubr.msk.f32.mxu0 %vm18774_vm2, %v18775_v46 }
0x1249   :  { %17932 = vmatprep.subr.bf16.mxu0 %v18773_v8 }
0x124c   :  { %17934 = vmatpush3.bf16.msra.mxu0 %v19083_v37 }
0x124d   :  { %17971 = vmatprep.subr.bf16.mxu0 %v18773_v8 }
0x124f   :  { %16661 = vmatmul.mubr.f32.vlgmr.msra.gmra.mrb[52].mxu0 %v20052_v50 }
0x1250   :  { %17973 = vmatpush3.bf16.msra.mxu0 %v19296_v53  ;;  %16737 = vmatprep.mubr.msk.f32.mxu0 %vm18774_vm2, %v18775_v46 }
0x1251   :  { %17974 = vmatprep.subr.bf16.mxu0 %v18773_v8 }
0x1254   :  { %17976 = vmatpush3.bf16.msra.mxu0 %v19306_v60 }
0x1255   :  { %17983 = vmatprep.subr.bf16.mxu0 %v18773_v8 }
0x1257   :  { %16738 = vmatmul.mubr.f32.vlgmr.msra.gmra.mrb[54].mxu0 %v9085_v16 }
0x1258   :  { %17985 = vmatpush3.bf16.msra.mxu0 %v19310_v3  ;;  %16759 = vmatprep.mubr.msk.f32.mxu0 %vm18774_vm2, %v18775_v46 }
0x1259   :  { %17986 = vmatprep.subr.bf16.mxu0 %v18773_v8 }
0x125c   :  { %17988 = vmatpush3.bf16.msra.mxu0 %v19314_v12 }
0x125d   :  { %17995 = vmatprep.subr.bf16.mxu0 %v18773_v8 }
0x125f   :  { %16760 = vmatmul.mubr.f32.vlgmr.msra.gmra.mrb[56].mxu0 %v9082_v52 }
0x1260   :  { %17997 = vmatpush3.bf16.msra.mxu0 %v19316_v17  ;;  %16781 = vmatprep.mubr.msk.f32.mxu0 %vm18774_vm2, %v18775_v46 }
0x1261   :  { %17998 = vmatprep.subr.bf16.mxu0 %v18773_v8 }
0x1264   :  { %18000 = vmatpush3.bf16.msra.mxu0 %v19318_v36 }
0x1265   :  { %18007 = vmatprep.subr.bf16.mxu0 %v18773_v8 }
0x1267   :  { %16782 = vmatmul.mubr.f32.vlgmr.msra.gmra.mrb[58].mxu0 %v20052_v50 }
0x1268   :  { %18009 = vmatpush3.bf16.msra.mxu0 %v19068_v18  ;;  %16803 = vmatprep.mubr.msk.f32.mxu0 %vm18774_vm2, %v18775_v46 }
0x1269   :  { %18010 = vmatprep.subr.bf16.mxu0 %v18773_v8 }
0x126c   :  { %18012 = vmatpush3.bf16.msra.mxu0 %v19083_v37 }
0x126d   :  { %18013 = vmatprep.subr.bf16.mxu0 %v18773_v8 }
0x12b5   :  { %v9524_v0 = vpop.permute.xlu1 %9523 }
0x12b6   :  { %v9525_v61 = vsel %vm923_vm3, %v9524_v0, 0 }
0x12b7   :  { %v9596_v33 = vand.u32 4294901760, %v9525_v61 }
0x12b9   :  { %v9597_v56 = vsub.f32 %v9525_v61, %v9596_v33 }
0x12bb   :  { %v9598_v59 = vand.u32 4294901760, %v9597_v56 }
0x12bd   :  { %v9599_v63 = vsub.f32 %v9597_v56, %v9598_v59 }
0x12bf   :  { %v9600_v5 = vand.u32 4294901760, %v9599_v63 }
0x12c1   :  { %16672 = vmatmul.mubr.f32.vlgmr.msra.gmra.mrb[96].mxu1 %v9600_v5 }
0x12c2   :  { %17943 = vmatpush3.bf16.msra.mxu1 %v19400_v22  ;;  %16682 = vmatprep.mubr.msk.f32.mxu1 %vm18774_vm2, %v18775_v46 }
0x12c3   :  { %17944 = vmatprep.subr.bf16.mxu1 %v18773_v8 }
0x12c6   :  { %17946 = vmatpush3.bf16.msra.mxu1 %v19405_v44 }
0x12c7   :  { %17947 = vmatprep.subr.bf16.mxu1 %v18773_v8 }
0x12c9   :  { %16683 = vmatmul.mubr.f32.vlgmr.msra.gmra.mrb[98].mxu1 %v9596_v33 }
0x12ca   :  { %17949 = vmatpush3.bf16.msra.mxu1 %v19245_v24  ;;  %16693 = vmatprep.mubr.msk.f32.mxu1 %vm18774_vm2, %v18775_v46 }
0x12cb   :  { %17950 = vmatprep.subr.bf16.mxu1 %v18773_v8 }
0x12ce   :  { %17952 = vmatpush3.bf16.msra.mxu1 %v19257_v29 }
0x12cf   :  { %17953 = vmatprep.subr.bf16.mxu1 %v18773_v8 }
0x12d1   :  { %16694 = vmatmul.mubr.f32.vlgmr.msra.gmra.mrb[100].mxu1 %v9597_v56 }
0x12d2   :  { %17955 = vmatpush3.bf16.msra.mxu1 %v19232_v10  ;;  %16704 = vmatprep.mubr.msk.f32.mxu1 %vm18774_vm2, %v18775_v46 }
0x12d3   :  { %17956 = vmatprep.subr.bf16.mxu1 %v18773_v8 }
0x12d6   :  { %17958 = vmatpush3.bf16.msra.mxu1 %v19235_v11 }
0x12d7   :  { %17959 = vmatprep.subr.bf16.mxu1 %v18773_v8 }
0x12d9   :  { %16705 = vmatmul.mubr.f32.vlgmr.msra.gmra.mrb[102].mxu1 %v9598_v59 }
0x12da   :  { %17961 = vmatpush3.bf16.msra.mxu1 %v19269_v32  ;;  %16715 = vmatprep.mubr.msk.f32.mxu1 %vm18774_vm2, %v18775_v46 }
0x12db   :  { %17962 = vmatprep.subr.bf16.mxu1 %v18773_v8 }
0x12de   :  { %17964 = vmatpush3.bf16.msra.mxu1 %v19280_v38 }
0x12df   :  { %17965 = vmatprep.subr.bf16.mxu1 %v18773_v8 }
0x12e1   :  { %16716 = vmatmul.mubr.f32.vlgmr.msra.gmra.mrb[104].mxu1 %v9596_v33 }
0x12e2   :  { %17967 = vmatpush3.bf16.msra.mxu1 %v19232_v10  ;;  %16726 = vmatprep.mubr.msk.f32.mxu1 %vm18774_vm2, %v18775_v46 }
0x12e3   :  { %17968 = vmatprep.subr.bf16.mxu1 %v18773_v8 }
0x12e6   :  { %17970 = vmatpush3.bf16.msra.mxu1 %v19235_v11 }
0x12e7   :  { %17977 = vmatprep.subr.bf16.mxu1 %v18773_v8 }
0x12e9   :  { %16727 = vmatmul.mubr.f32.vlgmr.msra.gmra.mrb[106].mxu1 %v9596_v33 }
0x12ea   :  { %17979 = vmatpush3.bf16.msra.mxu1 %v19320_v48  ;;  %16748 = vmatprep.mubr.msk.f32.mxu1 %vm18774_vm2, %v18775_v46 }
0x12eb   :  { %17980 = vmatprep.subr.bf16.mxu1 %v18773_v8 }
0x12ee   :  { %17982 = vmatpush3.bf16.msra.mxu1 %v19322_v41 }
0x12ef   :  { %17989 = vmatprep.subr.bf16.mxu1 %v18773_v8 }
0x12f1   :  { %16749 = vmatmul.mubr.f32.vlgmr.msra.gmra.mrb[108].mxu1 %v20052_v50 }
0x12f2   :  { %17991 = vmatpush3.bf16.msra.mxu1 %v19296_v53  ;;  %16770 = vmatprep.mubr.msk.f32.mxu1 %vm18774_vm2, %v18775_v46 }
0x12f3   :  { %17992 = vmatprep.subr.bf16.mxu1 %v18773_v8 }
0x12f6   :  { %17994 = vmatpush3.bf16.msra.mxu1 %v19306_v60 }
0x12f7   :  { %18001 = vmatprep.subr.bf16.mxu1 %v18773_v8 }
0x12f9   :  { %16771 = vmatmul.mubr.f32.vlgmr.msra.gmra.mrb[110].mxu1 %v20055_v30 }
0x12fa   :  { %18003 = vmatpush3.bf16.msra.mxu1 %v19296_v53  ;;  %16792 = vmatprep.mubr.msk.f32.mxu1 %vm18774_vm2, %v18775_v46 }
0x12fb   :  { %18004 = vmatprep.subr.bf16.mxu1 %v18773_v8 }
0x12fe   :  { %18006 = vmatpush3.bf16.msra.mxu1 %v19306_v60 }
0x12ff   :  { %18043 = vmatprep.subr.bf16.mxu1 %v18773_v8 }
0x1301   :  { %16793 = vmatmul.mubr.f32.vlgmr.msra.gmra.mrb[112].mxu1 %v20052_v50 }
0x1302   :  { %18045 = vmatpush3.bf16.msra.mxu1 %v19232_v10  ;;  %16869 = vmatprep.mubr.msk.f32.mxu1 %vm18774_vm2, %v18775_v46 }
0x1303   :  { %18046 = vmatprep.subr.bf16.mxu1 %v18773_v8 }
0x1306   :  { %18048 = vmatpush3.bf16.msra.mxu1 %v19235_v11 }
0x1307   :  { %18049 = vmatprep.subr.bf16.mxu1 %v18773_v8 }
0x1322   :  { %v9493_v42 = vpop.f32.mrb[52].mxu0 }
0x1323   :  { %v9497_v7 = vadd.f32 %v19221_v4, %v9493_v42  ;;  %v16662_v28 = vpop.f32.mrb[53].mxu0 }
0x1325   :  { %18560 = vtanh.f32 %v9497_v7  ;;  %v14585_v45 = vmul.f32 -1.442695, %v9497_v7 }
0x1327   :  { %18562 = vpow2.f32 %v14585_v45 }
0x132a   :  { %v10087_v62 = vpop.f32.mrb[54].mxu0 }
0x132b   :  { %v16739_v57 = vpop.f32.mrb[55].mxu0 }
0x132f   :  { %v18561_v58 = vpop.eup %18560 }
0x1330   :  { %9507 = vrot.lane.b32.xlu0 %v18561_v58, %s18776_s3 }
0x1331   :  { %v18563_v55 = vpop.eup %18562 }
0x1332   :  { %v10258_v49 = vpop.f32.mrb[56].mxu0  ;;  %v9501_v39 = vadd.f32 1.0, %v18563_v55 }
0x1333   :  { %v16761_v40 = vpop.f32.mrb[57].mxu0 }
0x1334   :  { %18564 = vrcp.f32 %v9501_v39 }
0x133a   :  { %v10418_v1 = vpop.f32.mrb[58].mxu0 }
0x133b   :  { %v16783_v54 = vpop.f32.mrb[59].mxu0 }
0x133e   :  { %v18565_v20 = vpop.eup %18564 }
0x1394   :  { %v9602_v25 = vpop.f32.mrb[96].mxu1 }
0x1395   :  { %v16673_v27 = vpop.f32.mrb[97].mxu1 }
0x139c   :  { %v9693_v15 = vpop.f32.mrb[98].mxu1 }
0x139d   :  { %v9694_v4 = vadd.f32 %v9693_v15, %v9602_v25  ;;  %v16684_v6 = vpop.f32.mrb[99].mxu1 }
0x13a2   :  { %v9508_v34 = vpop.permute.xlu0 %9507 }
0x13a3   :  { %v9510_v50 = vmul.f32 %v18565_v20, %v9508_v34 }
0x13a4   :  { %v9773_v52 = vpop.f32.mrb[100].mxu1 }
0x13a5   :  { %v9774_v30 = vadd.f32 %v9773_v52, %v9694_v4  ;;  %v16695_v35 = vpop.f32.mrb[101].mxu1  ;;  %9512 = vrot.lane.b32.xlu0 %v9510_v50, %s18777_s19  ;;  %v9505_v4 = vmul.f32 %v18565_v20, %v20040_v14 }
0x13ac   :  { %v9850_v16 = vpop.f32.mrb[102].mxu1 }
0x13ad   :  { %v9851_v43 = vadd.f32 %v9850_v16, %v9774_v30  ;;  %v16706_v26 = vpop.f32.mrb[103].mxu1 }
0x13b4   :  { %v9933_v0 = vpop.f32.mrb[104].mxu1 }
0x13b5   :  { %v9934_v61 = vadd.f32 %v9933_v0, %v9851_v43  ;;  %v16717_v33 = vpop.f32.mrb[105].mxu1 }
0x13bc   :  { %v10008_v56 = vpop.f32.mrb[106].mxu1 }
0x13bd   :  { %v10009_v59 = vadd.f32 %v10008_v56, %v9934_v61  ;;  %v16728_v63 = vpop.f32.mrb[107].mxu1 }
0x13bf   :  { %v10088_v5 = vadd.f32 %v10087_v62, %v10009_v59 }
0x13c4   :  { %v10178_v42 = vpop.f32.mrb[108].mxu1 }
0x13c5   :  { %v10179_v7 = vadd.f32 %v10178_v42, %v10088_v5  ;;  %v16750_v28 = vpop.f32.mrb[109].mxu1 }
0x13c7   :  { %v10259_v57 = vadd.f32 %v10258_v49, %v10179_v7 }
0x13cc   :  { %v10335_v58 = vpop.f32.mrb[110].mxu1 }
0x13cd   :  { %v10336_v40 = vadd.f32 %v10335_v58, %v10259_v57  ;;  %v16772_v54 = vpop.f32.mrb[111].mxu1 }
0x13cf   :  { %v10419_v45 = vadd.f32 %v10418_v1, %v10336_v40 }
0x13d4   :  { %v10493_v55 = vpop.f32.mrb[112].mxu1 }
0x13d5   :  { %v10494_v39 = vadd.f32 %v10493_v55, %v10419_v45  ;;  %v16794_v25 = vpop.f32.mrb[113].mxu1 }
0x13d7   :  { %v10497_v27 = vadd.f32 %v19892_v13, %v10494_v39 }
0x13d9   :  { %18566 = vtanh.f32 %v10497_v27  ;;  %v14586_v1 = vmul.f32 -1.442695, %v10497_v27 }
0x13e3   :  { %v18567_v15 = vpop.eup %18566 }
0x13e4   :  { %10507 = vrot.lane.b32.xlu1 %v18567_v15, %s18776_s3 }
0x1417   :  { %v9513_v62 = vpop.permute.xlu0 %9512 }
0x1418   :  { %v20182_v6 = vadd.f32 %v9513_v62, %v9505_v4 }
0x141a   :  { %18568 = vtanh.f32 %v20182_v6 }
0x141b   :  { %18570 = vpow2.f32 %v14586_v1 }
0x1424   :  { %v18569_v49 = vpop.eup %18568 }
0x1425   :  { %9518 = vrot.lane.b32.xlu0 %v18569_v49, %s18776_s3  ;;  %v18571_v34 = vpop.eup %18570 }
0x1426   :  { %v10501_v50 = vadd.f32 1.0, %v18571_v34 }
0x1428   :  { %18572 = vrcp.f32 %v10501_v50 }
0x1432   :  { %v18573_v13 = vpop.eup %18572 }
0x1433   :  { %v10505_v16 = vmul.f32 %v18573_v13, %v20047_v31 }
0x1456   :  { %v10508_v52 = vpop.permute.xlu1 %10507 }
0x1457   :  { %v10510_v30 = vmul.f32 %v18573_v13, %v10508_v52 }
0x1459   :  { %10512 = vrot.lane.b32.xlu1 %v10510_v30, %s18777_s19 }
0x1497   :  { %v9519_v35 = vpop.permute.xlu0 %9518 }
0x1498   :  { %v9521_v14 = vmul.f32 %v18565_v20, %v9519_v35 }
0x149a   :  { %10523 = vrot.lane.b32.xlu0 %v9521_v14, %s18777_s19 }
0x14cb   :  { %v10513_v43 = vpop.permute.xlu1 %10512 }
0x14cc   :  { %v20189_v26 = vadd.f32 %v10513_v43, %v10505_v16 }
0x14ce   :  { %18574 = vtanh.f32 %v20189_v26 }
0x14d8   :  { %v18575_v0 = vpop.eup %18574 }
0x14d9   :  { %10518 = vrot.lane.b32.xlu1 %v18575_v0, %s18776_s3 }
0x150c   :  { %v10524_v61 = vpop.permute.xlu0 %10523 }
0x150d   :  { %v10525_v33 = vsel %vm923_vm3, %v10524_v61, 0 }
0x150e   :  { %v20194_v56 = vand.u32 4294901760, %v10525_v33 }
0x1510   :  { %v10597_v59 = vsub.f32 %v10525_v33, %v20194_v56 }
0x1512   :  { %v20197_v20 = vand.u32 4294901760, %v10597_v59 }
0x1514   :  { %v10599_v63 = vsub.f32 %v10597_v59, %v20197_v20 }
0x1516   :  { %v10600_v31 = vand.u32 4294901760, %v10599_v63 }
0x1518   :  { %16804 = vmatmul.mubr.f32.vlgmr.msra.gmra.mrb[60].mxu0 %v10600_v31 }
0x1519   :  { %18015 = vmatpush3.bf16.msra.mxu0 %v19100_v47  ;;  %16814 = vmatprep.mubr.msk.f32.mxu0 %vm18774_vm2, %v18775_v46 }
0x151a   :  { %18016 = vmatprep.subr.bf16.mxu0 %v18773_v8 }
0x151d   :  { %18018 = vmatpush3.bf16.msra.mxu0 %v19108_v51 }
0x151e   :  { %18019 = vmatprep.subr.bf16.mxu0 %v18773_v8 }
0x1520   :  { %16815 = vmatmul.mubr.f32.vlgmr.msra.gmra.mrb[60].mxu0 %v20194_v56 }
0x1521   :  { %18021 = vmatpush3.bf16.msra.mxu0 %v19122_v19  ;;  %16825 = vmatprep.mubr.msk.f32.mxu0 %vm18774_vm2, %v18775_v46 }
0x1522   :  { %18022 = vmatprep.subr.bf16.mxu0 %v18773_v8 }
0x1525   :  { %18024 = vmatpush3.bf16.msra.mxu0 %v19133_v21 }
0x1526   :  { %18025 = vmatprep.subr.bf16.mxu0 %v18773_v8 }
0x1528   :  { %16826 = vmatmul.mubr.f32.vlgmr.msra.gmra.mrb[60].mxu0 %v10597_v59 }
0x1529   :  { %18027 = vmatpush3.bf16.msra.mxu0 %v19068_v18  ;;  %16836 = vmatprep.mubr.msk.f32.mxu0 %vm18774_vm2, %v18775_v46 }
0x152a   :  { %18028 = vmatprep.subr.bf16.mxu0 %v18773_v8 }
0x152d   :  { %18030 = vmatpush3.bf16.msra.mxu0 %v19083_v37 }
0x152e   :  { %18031 = vmatprep.subr.bf16.mxu0 %v18773_v8 }
0x1530   :  { %16837 = vmatmul.mubr.f32.vlgmr.msra.gmra.mrb[60].mxu0 %v20197_v20 }
0x1531   :  { %18033 = vmatpush3.bf16.msra.mxu0 %v19161_v23  ;;  %16847 = vmatprep.mubr.msk.f32.mxu0 %vm18774_vm2, %v18775_v46 }
0x1532   :  { %18034 = vmatprep.subr.bf16.mxu0 %v18773_v8 }
0x1535   :  { %18036 = vmatpush3.bf16.msra.mxu0 %v19172_v9 }
0x1536   :  { %18037 = vmatprep.subr.bf16.mxu0 %v18773_v8 }
0x1538   :  { %16848 = vmatmul.mubr.f32.vlgmr.msra.gmra.mrb[60].mxu0 %v20194_v56 }
0x1539   :  { %18039 = vmatpush3.bf16.msra.mxu0 %v19068_v18  ;;  %16858 = vmatprep.mubr.msk.f32.mxu0 %vm18774_vm2, %v18775_v46 }
0x153a   :  { %18040 = vmatprep.subr.bf16.mxu0 %v18773_v8 }
0x153d   :  { %18042 = vmatpush3.bf16.msra.mxu0 %v19083_v37 }
0x153e   :  { %18079 = vmatprep.subr.bf16.mxu0 %v18773_v8 }
0x1540   :  { %16859 = vmatmul.mubr.f32.vlgmr.msra.gmra.mrb[60].mxu0 %v20194_v56 }
0x1541   :  { %18081 = vmatpush3.bf16.msra.mxu0 %v19296_v53  ;;  %16935 = vmatprep.mubr.msk.f32.mxu0 %vm18774_vm2, %v18775_v46 }
0x1542   :  { %18082 = vmatprep.subr.bf16.mxu0 %v18773_v8 }
0x1545   :  { %18084 = vmatpush3.bf16.msra.mxu0 %v19306_v60 }
0x1546   :  { %18091 = vmatprep.subr.bf16.mxu0 %v18773_v8 }
0x1548   :  { %16936 = vmatmul.mubr.f32.vlgmr.msra.gmra.mrb[62].mxu0 %v10600_v31 }
0x1549   :  { %18093 = vmatpush3.bf16.msra.mxu0 %v19310_v3  ;;  %16957 = vmatprep.mubr.msk.f32.mxu0 %vm18774_vm2, %v18775_v46 }
0x154a   :  { %18094 = vmatprep.subr.bf16.mxu0 %v18773_v8 }
0x154b   :  { %v10519_v18 = vpop.permute.xlu1 %10518 }
0x154c   :  { %v10521_v37 = vmul.f32 %v18573_v13, %v10519_v18 }
0x154d   :  { %18096 = vmatpush3.bf16.msra.mxu0 %v19314_v12 }
0x154e   :  { %11038 = vrot.lane.b32.xlu1 %v10521_v37, %s18777_s19  ;;  %18103 = vmatprep.subr.bf16.mxu0 %v18773_v8 }
0x1550   :  { %16958 = vmatmul.mubr.f32.vlgmr.msra.gmra.mrb[64].mxu0 %v10597_v59 }
0x1551   :  { %18105 = vmatpush3.bf16.msra.mxu0 %v19316_v17  ;;  %16979 = vmatprep.mubr.msk.f32.mxu0 %vm18774_vm2, %v18775_v46 }
0x1552   :  { %18106 = vmatprep.subr.bf16.mxu0 %v18773_v8 }
0x1555   :  { %18108 = vmatpush3.bf16.msra.mxu0 %v19318_v36 }
0x1556   :  { %18115 = vmatprep.subr.bf16.mxu0 %v18773_v8 }
0x1558   :  { %16980 = vmatmul.mubr.f32.vlgmr.msra.gmra.mrb[66].mxu0 %v20194_v56 }
0x1559   :  { %18117 = vmatpush3.bf16.msra.mxu0 %v19232_v10  ;;  %17001 = vmatprep.mubr.msk.f32.mxu0 %vm18774_vm2, %v18775_v46 }
0x155a   :  { %18118 = vmatprep.subr.bf16.mxu0 %v18773_v8 }
0x155d   :  { %18120 = vmatpush3.bf16.msra.mxu0 %v19235_v11 }
0x155e   :  { %18127 = vmatprep.subr.bf16.mxu0 %v18773_v8 }
0x15c0   :  { %v11039_v47 = vpop.permute.xlu1 %11038 }
0x15c1   :  { %v11040_v51 = vsel %vm923_vm3, %v11039_v47, 0 }
0x15c2   :  { %v11111_v19 = vand.u32 4294901760, %v11040_v51 }
0x15c4   :  { %v11112_v21 = vsub.f32 %v11040_v51, %v11111_v19 }
0x15c6   :  { %v11113_v23 = vand.u32 4294901760, %v11112_v21 }
0x15c8   :  { %v11114_v9 = vsub.f32 %v11112_v21, %v11113_v23 }
0x15ca   :  { %v11115_v5 = vand.u32 4294901760, %v11114_v9 }
0x15cc   :  { %16870 = vmatmul.mubr.f32.vlgmr.msra.gmra.mrb[114].mxu1 %v11115_v5  ;;  %v20324_v5 = vld [vmem:[%s20610_s6] ss:$0 sm:$0xff] }
0x15cd   :  { %18051 = vmatpush3.bf16.msra.mxu1 %v19400_v22  ;;  %16880 = vmatprep.mubr.msk.f32.mxu1 %vm18774_vm2, %v18775_v46 }
0x15ce   :  { %18052 = vmatprep.subr.bf16.mxu1 %v18773_v8 }
0x15d1   :  { %18054 = vmatpush3.bf16.msra.mxu1 %v19405_v44 }
0x15d2   :  { %18055 = vmatprep.subr.bf16.mxu1 %v18773_v8 }
0x15d4   :  { %16881 = vmatmul.mubr.f32.vlgmr.msra.gmra.mrb[116].mxu1 %v11111_v19 }
0x15d5   :  { %18057 = vmatpush3.bf16.msra.mxu1 %v19245_v24  ;;  %16891 = vmatprep.mubr.msk.f32.mxu1 %vm18774_vm2, %v18775_v46 }
0x15d6   :  { %18058 = vmatprep.subr.bf16.mxu1 %v18773_v8 }
0x15d9   :  { %18060 = vmatpush3.bf16.msra.mxu1 %v19257_v29 }
0x15da   :  { %18061 = vmatprep.subr.bf16.mxu1 %v18773_v8 }
0x15dc   :  { %16892 = vmatmul.mubr.f32.vlgmr.msra.gmra.mrb[118].mxu1 %v11112_v21 }
0x15dd   :  { %18063 = vmatpush3.bf16.msra.mxu1 %v19232_v10  ;;  %16902 = vmatprep.mubr.msk.f32.mxu1 %vm18774_vm2, %v18775_v46 }
0x15de   :  { %18064 = vmatprep.subr.bf16.mxu1 %v18773_v8 }
0x15e1   :  { %18066 = vmatpush3.bf16.msra.mxu1 %v19235_v11 }
0x15e2   :  { %18067 = vmatprep.subr.bf16.mxu1 %v18773_v8 }
0x15e4   :  { %16903 = vmatmul.mubr.f32.vlgmr.msra.gmra.mrb[120].mxu1 %v11113_v23 }
0x15e5   :  { %18069 = vmatpush3.bf16.msra.mxu1 %v19269_v32  ;;  %16913 = vmatprep.mubr.msk.f32.mxu1 %vm18774_vm2, %v18775_v46 }
0x15e6   :  { %18070 = vmatprep.subr.bf16.mxu1 %v18773_v8 }
0x15e9   :  { %18072 = vmatpush3.bf16.msra.mxu1 %v19280_v38 }
0x15ea   :  { %18073 = vmatprep.subr.bf16.mxu1 %v18773_v8 }
0x15ec   :  { %16914 = vmatmul.mubr.f32.vlgmr.msra.gmra.mrb[122].mxu1 %v11111_v19 }
0x15ed   :  { %18075 = vmatpush3.bf16.msra.mxu1 %v19232_v10  ;;  %16924 = vmatprep.mubr.msk.f32.mxu1 %vm18774_vm2, %v18775_v46 }
0x15ee   :  { %18076 = vmatprep.subr.bf16.mxu1 %v18773_v8 }
0x15f1   :  { %18078 = vmatpush3.bf16.msra.mxu1 %v19235_v11 }
0x15f2   :  { %18085 = vmatprep.subr.bf16.mxu1 %v18773_v8 }
0x15f4   :  { %16925 = vmatmul.mubr.f32.vlgmr.msra.gmra.mrb[124].mxu1 %v11111_v19 }
0x15f5   :  { %18087 = vmatpush3.bf16.msra.mxu1 %v19320_v48  ;;  %16946 = vmatprep.mubr.msk.f32.mxu1 %vm18774_vm2, %v18775_v46 }
0x15f6   :  { %18088 = vmatprep.subr.bf16.mxu1 %v18773_v8 }
0x15f9   :  { %18090 = vmatpush3.bf16.msra.mxu1 %v19322_v41 }
0x15fa   :  { %18097 = vmatprep.subr.bf16.mxu1 %v18773_v8 }
0x15fc   :  { %16947 = vmatmul.mubr.f32.vlgmr.msra.gmra.mrb[126].mxu1 %v20194_v56 }
0x15fd   :  { %18099 = vmatpush3.bf16.msra.mxu1 %v19296_v53  ;;  %16968 = vmatprep.mubr.msk.f32.mxu1 %vm18774_vm2, %v18775_v46 }
0x15fe   :  { %18100 = vmatprep.subr.bf16.mxu1 %v18773_v8 }
0x1601   :  { %18102 = vmatpush3.bf16.msra.mxu1 %v19306_v60 }
0x1602   :  { %18109 = vmatprep.subr.bf16.mxu1 %v18773_v8 }
0x1604   :  { %16969 = vmatmul.mubr.f32.vlgmr.msra.gmra.mrb[128].mxu1 %v20197_v20 }
0x1605   :  { %18111 = vmatpush3.bf16.msra.mxu1 %v19296_v53  ;;  %16990 = vmatprep.mubr.msk.f32.mxu1 %vm18774_vm2, %v18775_v46 }
0x1606   :  { %18112 = vmatprep.subr.bf16.mxu1 %v18773_v8 }
0x1609   :  { %18114 = vmatpush3.bf16.msra.mxu1 %v19306_v60 }
0x160a   :  { %18121 = vmatprep.subr.bf16.mxu1 %v18773_v8 }
0x160c   :  { %16991 = vmatmul.mubr.f32.vlgmr.msra.gmra.mrb[130].mxu1 %v20194_v56 }
0x160d   :  { %18123 = vmatpush3.bf16.msra.mxu1 %v19400_v22  ;;  %17012 = vmatprep.mubr.msk.f32.mxu1 %vm18774_vm2, %v18775_v46 }
0x160e   :  { %18124 = vmatprep.subr.bf16.mxu1 %v18773_v8 }
0x1611   :  { %18126 = vmatpush3.bf16.msra.mxu1 %v19405_v44 }
0x1612   :  { %18133 = vmatprep.subr.bf16.mxu1 %v18773_v8 }
0x1613   :  { %v11008_v42 = vpop.f32.mrb[60].mxu0 }
0x1614   :  { %v11012_v7 = vadd.f32 %v19219_v2, %v11008_v42  ;;  %v16860_v28 = vpop.f32.mrb[61].mxu0 }
0x1616   :  { %18576 = vtanh.f32 %v11012_v7  ;;  %v14587_v39 = vmul.f32 -1.442695, %v11012_v7 }
0x1618   :  { %18578 = vpow2.f32 %v14587_v39 }
0x161b   :  { %v11602_v57 = vpop.f32.mrb[62].mxu0 }
0x161c   :  { %v16937_v58 = vpop.f32.mrb[63].mxu0 }
0x1620   :  { %v18577_v40 = vpop.eup %18576 }
0x1621   :  { %11022 = vrot.lane.b32.xlu1 %v18577_v40, %s18776_s3 }
0x1622   :  { %v18579_v25 = vpop.eup %18578 }
0x1623   :  { %v11773_v22 = vpop.f32.mrb[64].mxu0  ;;  %v11016_v44 = vadd.f32 1.0, %v18579_v25 }
0x1624   :  { %v16959_v54 = vpop.f32.mrb[65].mxu0 }
0x1625   :  { %18580 = vrcp.f32 %v11016_v44 }
0x162b   :  { %v11933_v45 = vpop.f32.mrb[66].mxu0 }
0x162c   :  { %v16981_v55 = vpop.f32.mrb[67].mxu0 }
0x162f   :  { %v18581_v27 = vpop.eup %18580 }
0x1630   :  { %v11020_v28 = vmul.f32 %v18581_v27, %v20182_v6 }
0x1693   :  { %v11023_v15 = vpop.permute.xlu1 %11022 }
0x1694   :  { %v11025_v4 = vmul.f32 %v18581_v27, %v11023_v15 }
0x1696   :  { %11027 = vrot.lane.b32.xlu1 %v11025_v4, %s18777_s19 }
0x169f   :  { %v11117_v2 = vpop.f32.mrb[114].mxu1 }
0x16a0   :  { %v16871_v62 = vpop.f32.mrb[115].mxu1 }
0x16a7   :  { %v11208_v49 = vpop.f32.mrb[116].mxu1 }
0x16a8   :  { %v11209_v1 = vadd.f32 %v11208_v49, %v11117_v2  ;;  %v16882_v34 = vpop.f32.mrb[117].mxu1 }
0x16af   :  { %v11288_v50 = vpop.f32.mrb[118].mxu1 }
0x16b0   :  { %v11289_v13 = vadd.f32 %v11288_v50, %v11209_v1  ;;  %v16893_v52 = vpop.f32.mrb[119].mxu1 }
0x16b7   :  { %v11365_v30 = vpop.f32.mrb[120].mxu1 }
0x16b8   :  { %v11366_v35 = vadd.f32 %v11365_v30, %v11289_v13  ;;  %v16904_v14 = vpop.f32.mrb[121].mxu1 }
0x16bf   :  { %v11448_v16 = vpop.f32.mrb[122].mxu1 }
0x16c0   :  { %v11449_v43 = vadd.f32 %v11448_v16, %v11366_v35  ;;  %v16915_v0 = vpop.f32.mrb[123].mxu1 }
0x16c7   :  { %v11523_v61 = vpop.f32.mrb[124].mxu1 }
0x16c8   :  { %v11524_v33 = vadd.f32 %v11523_v61, %v11449_v43  ;;  %v16926_v56 = vpop.f32.mrb[125].mxu1 }
0x16ca   :  { %v11603_v59 = vadd.f32 %v11602_v57, %v11524_v33 }
0x16cf   :  { %v11693_v20 = vpop.f32.mrb[126].mxu1 }
0x16d0   :  { %v11694_v63 = vadd.f32 %v11693_v20, %v11603_v59  ;;  %v16948_v31 = vpop.f32.mrb[127].mxu1 }
0x16d2   :  { %v11774_v18 = vadd.f32 %v11773_v22, %v11694_v63 }
0x16d7   :  { %v11850_v37 = vpop.f32.mrb[128].mxu1 }
0x16d8   :  { %v11851_v47 = vadd.f32 %v11850_v37, %v11774_v18  ;;  %v16970_v51 = vpop.f32.mrb[129].mxu1 }
0x16da   :  { %v11934_v19 = vadd.f32 %v11933_v45, %v11851_v47 }
0x16df   :  { %v12008_v21 = vpop.f32.mrb[130].mxu1 }
0x16e0   :  { %v12009_v23 = vadd.f32 %v12008_v21, %v11934_v19  ;;  %v16992_v9 = vpop.f32.mrb[131].mxu1 }
0x16e2   :  { %v12012_v42 = vadd.f32 %v20324_v5, %v12009_v23 }
0x16e4   :  { %18582 = vtanh.f32 %v12012_v42  ;;  %v14588_v22 = vmul.f32 -1.442695, %v12012_v42 }
0x16ee   :  { %v18583_v7 = vpop.eup %18582 }
0x16ef   :  { %12022 = vrot.lane.b32.xlu0 %v18583_v7, %s18776_s3 }
0x1708   :  { %v11028_v57 = vpop.permute.xlu1 %11027 }
0x1709   :  { %v11030_v58 = vadd.f32 %v11028_v57, %v11020_v28 }
0x170b   :  { %18584 = vtanh.f32 %v11030_v58 }
0x170c   :  { %18586 = vpow2.f32 %v14588_v22 }
0x1715   :  { %v18585_v40 = vpop.eup %18584 }
0x1716   :  { %11033 = vrot.lane.b32.xlu1 %v18585_v40, %s18776_s3  ;;  %v18587_v54 = vpop.eup %18586 }
0x1717   :  { %v12016_v45 = vadd.f32 1.0, %v18587_v54 }
0x1719   :  { %18588 = vrcp.f32 %v12016_v45 }
0x1723   :  { %v18589_v55 = vpop.eup %18588 }
0x1724   :  { %v12020_v6 = vmul.f32 %v18589_v55, %v20189_v26 }
0x1761   :  { %v12023_v39 = vpop.permute.xlu0 %12022 }
0x1762   :  { %v12025_v25 = vmul.f32 %v18589_v55, %v12023_v39 }
0x1764   :  { %12027 = vrot.lane.b32.xlu0 %v12025_v25, %s18777_s19 }
0x1788   :  { %v11034_v44 = vpop.permute.xlu1 %11033 }
0x1789   :  { %v11036_v15 = vmul.f32 %v18581_v27, %v11034_v44 }
0x178b   :  { %12528 = vrot.lane.b32.xlu1 %v11036_v15, %s18777_s19 }
0x17d6   :  { %v12028_v4 = vpop.permute.xlu0 %12027 }
0x17d7   :  { %v20333_v2 = vadd.f32 %v12028_v4, %v12020_v6 }
0x17d9   :  { %18590 = vtanh.f32 %v20333_v2 }
0x17e3   :  { %v18591_v62 = vpop.eup %18590 }
0x17e4   :  { %12033 = vrot.lane.b32.xlu0 %v18591_v62, %s18776_s3 }
0x17fd   :  { %v12529_v35 = vpop.permute.xlu1 %12528 }
0x17fe   :  { %v12530_v14 = vsel %vm923_vm3, %v12529_v35, 0 }
0x17ff   :  { %v12601_v16 = vand.u32 4294901760, %v12530_v14 }
0x1856   :  { %v12034_v49 = vpop.permute.xlu0 %12033 }
0x1857   :  { %v12036_v1 = vmul.f32 %v18589_v55, %v12034_v49 }
0x1859   :  { %12038 = vrot.lane.b32.xlu0 %v12036_v1, %s18777_s19 }
0x18cb   :  { %v12039_v34 = vpop.permute.xlu0 %12038 }
0x18cc   :  { %v12040_v50 = vsel %vm923_vm3, %v12039_v34, 0  ;;  %v13544_v34 = vld [vmem:[%s20613_s9] sm:$0xff] }
0x18cd   :  { %v12111_v27 = vand.u32 4294901760, %v12040_v50 }
0x18cf   :  { %v12112_v13 = vsub.f32 %v12040_v50, %v12111_v27  ;;  %17013 = vmatmul.mubr.f32.vlgmr.msra.gmra.mrb[132].mxu1 %v12111_v27  ;;  %v13545_v50 = vld [vmem:[%s20613_s9 + $0x8] sm:$0xff] }
0x18d0   :  { %18135 = vmatpush3.bf16.msra.mxu1 %v19232_v10  ;;  %17034 = vmatprep.mubr.msk.f32.mxu1 %vm18774_vm2, %v18775_v46 }
0x18d1   :  { %v12113_v26 = vand.u32 4294901760, %v12112_v13  ;;  %18136 = vmatprep.subr.bf16.mxu1 %v18773_v8 }
0x18d3   :  { %v12114_v52 = vsub.f32 %v12112_v13, %v12113_v26 }
0x18d4   :  { %18138 = vmatpush3.bf16.msra.mxu1 %v19235_v11 }
0x18d5   :  { %v12115_v30 = vand.u32 4294901760, %v12114_v52  ;;  %18145 = vmatprep.subr.bf16.mxu1 %v18773_v8  ;;  %v13043_v52 = vld [vmem:[#allocation7 + $0x8] sm:$0xff] }
0x18d7   :  { %17035 = vmatmul.mubr.f32.vlgmr.msra.gmra.mrb[134].mxu1 %v12113_v26  ;;  %17002 = vmatmul.mubr.f32.vlgmr.msra.gmra.mrb[68].mxu0 %v12115_v30  ;;  %v13559_v26 = vand.u32 4294901760, %v13545_v50 }
0x18d8   :  { %18129 = vmatpush3.bf16.msra.mxu0 %v19245_v24  ;;  %18147 = vmatpush3.bf16.msra.mxu1 %v19232_v10  ;;  %v12602_v10 = vsub.f32 %v12530_v14, %v12601_v16 }
0x18d9   :  { %18130 = vmatprep.subr.bf16.mxu0 %v18773_v8  ;;  %18148 = vmatprep.subr.bf16.mxu1 %v18773_v8 }
0x18da   :  { %17023 = vmatprep.mubr.msk.f32.mxu0 %vm18774_vm2, %v18775_v46  ;;  %17056 = vmatprep.mubr.msk.f32.mxu1 %vm18774_vm2, %v18775_v46 }
0x18dc   :  { %18132 = vmatpush3.bf16.msra.mxu0 %v19257_v29  ;;  %18150 = vmatpush3.bf16.msra.mxu1 %v19235_v11  ;;  %v12603_v11 = vand.u32 4294901760, %v12602_v10 }
0x18dd   :  { %18139 = vmatprep.subr.bf16.mxu0 %v18773_v8  ;;  %18157 = vmatprep.subr.bf16.mxu1 %v18773_v8 }
0x18de   :  { %v12604_v24 = vsub.f32 %v12602_v10, %v12603_v11 }
0x18df   :  { %17024 = vmatmul.mubr.f32.vlgmr.msra.gmra.mrb[70].mxu0 %v12112_v13  ;;  %17057 = vmatmul.mubr.f32.vlgmr.msra.gmra.mrb[136].mxu1 %v12111_v27  ;;  %v13556_v13 = vand.u32 4294901760, %v13544_v34 }
0x18e0   :  { %18141 = vmatpush3.bf16.msra.mxu0 %v19269_v32  ;;  %18159 = vmatpush3.bf16.msra.mxu1 %v19320_v48  ;;  %v12605_v29 = vand.u32 4294901760, %v12604_v24 }
0x18e1   :  { %18142 = vmatprep.subr.bf16.mxu0 %v18773_v8  ;;  %18160 = vmatprep.subr.bf16.mxu1 %v18773_v8  ;;  %v20419_v35 = vpack.c.bf16 %v13559_v26, %v13556_v13  ;;  %v20421_v14 = vsub.f32 %v13544_v34, %v13556_v13 }
0x18e2   :  { %17045 = vmatprep.mubr.msk.f32.mxu0 %vm18774_vm2, %v18775_v46  ;;  %17078 = vmatprep.mubr.msk.f32.mxu1 %vm18774_vm2, %v18775_v46 }
0x18e4   :  { %18144 = vmatpush3.bf16.msra.mxu0 %v19280_v38  ;;  %18162 = vmatpush3.bf16.msra.mxu1 %v19322_v41 }
0x18e5   :  { %18151 = vmatprep.subr.bf16.mxu0 %v18773_v8  ;;  %18169 = vmatprep.subr.bf16.mxu1 %v18773_v8 }
0x18e7   :  { %17046 = vmatmul.mubr.f32.vlgmr.msra.gmra.mrb[72].mxu0 %v12111_v27  ;;  %17079 = vmatmul.mubr.f32.vlgmr.msra.gmra.mrb[138].mxu1 %v12601_v16  ;;  %v13042_v27 = vld [vmem:[#allocation7] sm:$0xff] }
0x18e8   :  { %18153 = vmatpush3.bf16.msra.mxu0 %v19296_v53  ;;  %18171 = vmatpush3.bf16.msra.mxu1 %v19296_v53  ;;  %v13059_v30 = vand.u32 4294901760, %v13042_v27 }
0x18e9   :  { %18154 = vmatprep.subr.bf16.mxu0 %v18773_v8  ;;  %18172 = vmatprep.subr.bf16.mxu1 %v18773_v8 }
0x18ea   :  { %17067 = vmatprep.mubr.msk.f32.mxu0 %vm18774_vm2, %v18775_v46  ;;  %17100 = vmatprep.mubr.msk.f32.mxu1 %vm18774_vm2, %v18775_v46 }
0x18ec   :  { %18156 = vmatpush3.bf16.msra.mxu0 %v19306_v60  ;;  %18174 = vmatpush3.bf16.msra.mxu1 %v19306_v60 }
0x18ed   :  { %18163 = vmatprep.subr.bf16.mxu0 %v18773_v8  ;;  %18181 = vmatprep.subr.bf16.mxu1 %v18773_v8 }
0x18ef   :  { %17068 = vmatmul.mubr.f32.vlgmr.msra.gmra.mrb[74].mxu0 %v12605_v29  ;;  %17101 = vmatmul.mubr.f32.vlgmr.msra.gmra.mrb[140].mxu1 %v12603_v11  ;;  %v13546_v29 = vld [vmem:[%s20613_s9 + $0x10] sm:$0xff] }
0x18f0   :  { %18165 = vmatpush3.bf16.msra.mxu0 %v19310_v3  ;;  %18183 = vmatpush3.bf16.msra.mxu1 %v19296_v53 }
0x18f1   :  { %18166 = vmatprep.subr.bf16.mxu0 %v18773_v8  ;;  %18184 = vmatprep.subr.bf16.mxu1 %v18773_v8 }
0x18f2   :  { %17089 = vmatprep.mubr.msk.f32.mxu0 %vm18774_vm2, %v18775_v46  ;;  %17122 = vmatprep.mubr.msk.f32.mxu1 %vm18774_vm2, %v18775_v46 }
0x18f4   :  { %18168 = vmatpush3.bf16.msra.mxu0 %v19314_v12  ;;  %18186 = vmatpush3.bf16.msra.mxu1 %v19306_v60 }
0x18f5   :  { %18175 = vmatprep.subr.bf16.mxu0 %v18773_v8  ;;  %18223 = vmatprep.subr.bf16.mxu1 %v18773_v8 }
0x18f7   :  { %17090 = vmatmul.mubr.f32.vlgmr.msra.gmra.mrb[76].mxu0 %v12602_v10  ;;  %17123 = vmatmul.mubr.f32.vlgmr.msra.gmra.mrb[142].mxu1 %v12601_v16  ;;  %v20425_v10 = vsub.f32 %v13042_v27, %v13059_v30 }
0x18f8   :  { %18177 = vmatpush3.bf16.msra.mxu0 %v19316_v17  ;;  %17111 = vmatprep.mubr.msk.f32.mxu0 %vm18774_vm2, %v18775_v46 }
0x18f9   :  { %18178 = vmatprep.subr.bf16.mxu0 %v18773_v8  ;;  %17199 = vmatprep.mubr.msk.f32.mxu1 %vm18774_vm2, %v18775_v46 }
0x18fa   :  { %18225 = vmatpush3.bf16.msra.mxu1 %v20419_v35 }
0x18fb   :  { %18226 = vmatprep.subr.bf16.mxu1 %v18773_v8 }
0x18fc   :  { %18180 = vmatpush3.bf16.msra.mxu0 %v19318_v36 }
0x18fd   :  { %18187 = vmatprep.subr.bf16.mxu0 %v18773_v8 }
0x18ff   :  { %17112 = vmatmul.mubr.f32.vlgmr.msra.gmra.mrb[78].mxu0 %v12601_v16  ;;  %v20423_v16 = vsub.f32 %v13545_v50, %v13559_v26 }
0x1900   :  { %17133 = vmatprep.mubr.msk.f32.mxu0 %vm18774_vm2, %v18775_v46 }
0x19a2   :  { %v12208_v32 = vpop.f32.mrb[132].mxu1 }
0x19a3   :  { %v17014_v38 = vpop.f32.mrb[133].mxu1 }
0x19a4   :  { %v13044_v38 = vld [vmem:[#allocation7 + $0x10] sm:$0xff] }
0x19aa   :  { %v12365_v53 = vpop.f32.mrb[134].mxu1  ;;  %v12117_v60 = vpop.f32.mrb[68].mxu0 }
0x19ab   :  { %v12209_v3 = vadd.f32 %v12208_v32, %v12117_v60  ;;  %v17036_v12 = vpop.f32.mrb[135].mxu1  ;;  %v17003_v17 = vpop.f32.mrb[69].mxu0  ;;  %v13547_v32 = vld [vmem:[%s20613_s9 + $0x18] sm:$0xff] }
0x19ac   :  { %v13565_v60 = vand.u32 4294901760, %v13547_v32  ;;  %v13065_v12 = vand.u32 4294901760, %v13044_v38  ;;  %v13637_v17 = vand.u32 4294901760, %v20421_v14 }
0x19b2   :  { %v12288_v48 = vpop.f32.mrb[70].mxu0  ;;  %v12523_v41 = vpop.f32.mrb[136].mxu1 }
0x19b3   :  { %v12289_v43 = vadd.f32 %v12288_v48, %v12209_v3  ;;  %v17025_v0 = vpop.f32.mrb[71].mxu0  ;;  %v17058_v61 = vpop.f32.mrb[137].mxu1  ;;  %v13045_v3 = vld [vmem:[#allocation7 + $0x18] sm:$0xff] }
0x19b4   :  { %v13068_v48 = vand.u32 4294901760, %v13045_v3 }
0x19b5   :  { %v12366_v33 = vadd.f32 %v12365_v53, %v12289_v43  ;;  %v13562_v53 = vand.u32 4294901760, %v13546_v29  ;;  %v13140_v43 = vand.u32 4294901760, %v20425_v10 }
0x19b7   :  { %v20445_v61 = vpack.c.bf16 %v13565_v60, %v13562_v53 }
0x19b9   :  { %18228 = vmatpush3.bf16.msra.mxu1 %v20445_v61 }
0x19ba   :  { %v12448_v36 = vpop.f32.mrb[72].mxu0  ;;  %v12698_v56 = vpop.f32.mrb[138].mxu1  ;;  %18229 = vmatprep.subr.bf16.mxu1 %v18773_v8 }
0x19bb   :  { %v12449_v59 = vadd.f32 %v12448_v36, %v12366_v33  ;;  %v17047_v20 = vpop.f32.mrb[73].mxu0  ;;  %v17080_v63 = vpop.f32.mrb[139].mxu1  ;;  %v20447_v33 = vsub.f32 %v13546_v29, %v13562_v53  ;;  %v20449_v36 = vsub.f32 %v13547_v32, %v13565_v60  ;;  %v14043_v60 = vld [vmem:[#allocation10 + $0x10] sm:$0xff] }
0x19bc   :  { %v20455_v20 = vsub.f32 %v13045_v3, %v13068_v48  ;;  %v13638_v63 = vsub.f32 %v20421_v14, %v13637_v17  ;;  %v14044_v3 = vld [vmem:[#allocation10 + $0x18] sm:$0xff] }
0x19bd   :  { %v12524_v31 = vadd.f32 %v12523_v41, %v12449_v59  ;;  %v13644_v41 = vand.u32 4294901760, %v20423_v16  ;;  %v20453_v59 = vpack.c.bf16 %v13068_v48, %v13065_v12 }
0x19bf   :  { %v18248_v34 = vpack.c.bf16 %v13644_v41, %v13637_v17  ;;  %v14065_v17 = vand.u32 4294901760, %v14044_v3 }
0x19c2   :  { %v12607_v18 = vpop.f32.mrb[74].mxu0  ;;  %v12855_v37 = vpop.f32.mrb[140].mxu1 }
0x19c3   :  { %v12608_v47 = vadd.f32 %v12607_v18, %v12524_v31  ;;  %v17069_v51 = vpop.f32.mrb[75].mxu0  ;;  %v17102_v19 = vpop.f32.mrb[141].mxu1  ;;  %v13645_v31 = vsub.f32 %v20423_v16, %v13644_v41  ;;  %v13141_v18 = vsub.f32 %v20425_v10, %v13140_v43 }
0x19c4   :  { %v13658_v51 = vand.u32 4294901760, %v20449_v36  ;;  %v13639_v19 = vand.u32 4294901760, %v13638_v63 }
0x19c5   :  { %v12699_v21 = vadd.f32 %v12698_v56, %v12608_v47  ;;  %v20451_v56 = vsub.f32 %v13044_v38, %v13065_v12  ;;  %v13651_v47 = vand.u32 4294901760, %v20447_v33  ;;  %v14062_v12 = vand.u32 4294901760, %v14043_v60 }
0x19c7   :  { %v18251_v27 = vpack.c.bf16 %v13658_v51, %v13651_v47 }
0x19ca   :  { %v12778_v23 = vpop.f32.mrb[76].mxu0  ;;  %v13013_v9 = vpop.f32.mrb[142].mxu1 }
0x19cb   :  { %v12779_v42 = vadd.f32 %v12778_v23, %v12699_v21  ;;  %v17091_v7 = vpop.f32.mrb[77].mxu0  ;;  %v17124_v28 = vpop.f32.mrb[143].mxu1  ;;  %v13646_v21 = vand.u32 4294901760, %v13645_v31  ;;  %v13154_v23 = vand.u32 4294901760, %v20451_v56 }
0x19cc   :  { %v13142_v7 = vand.u32 4294901760, %v13141_v18 }
0x19cd   :  { %v12856_v57 = vadd.f32 %v12855_v37, %v12779_v42 }
0x19d2   :  { %v12938_v58 = vpop.f32.mrb[78].mxu0 }
0x19d3   :  { %v12939_v40 = vadd.f32 %v12938_v58, %v12856_v57  ;;  %v17113_v22 = vpop.f32.mrb[79].mxu0  ;;  %v13652_v57 = vsub.f32 %v20447_v33, %v13651_v47  ;;  %v13659_v58 = vsub.f32 %v20449_v36, %v13658_v51 }
0x19d4   :  { %v18230_v22 = vpack.c.bf16 %v13646_v21, %v13639_v19 }
0x19d5   :  { %v13014_v54 = vadd.f32 %v13013_v9, %v12939_v40  ;;  %v13161_v9 = vand.u32 4294901760, %v20455_v20 }
0x19d7   :  { %v13017_v45 = vadd.f32 %v20324_v5, %v13014_v54  ;;  %v13155_v54 = vsub.f32 %v20451_v56, %v13154_v23  ;;  %v18215_v13 = vpack.c.bf16 %v13161_v9, %v13154_v23 }
0x19d9   :  { %18592 = vtanh.f32 %v13017_v45  ;;  %v14589_v39 = vmul.f32 -1.442695, %v13017_v45  ;;  %v13162_v45 = vsub.f32 %v20455_v20, %v13161_v9 }
0x19db   :  { %18594 = vpow2.f32 %v14589_v39  ;;  %v13653_v39 = vand.u32 4294901760, %v13652_v57 }
0x19e3   :  { %v18593_v55 = vpop.eup %18592 }
0x19e4   :  { %13027 = vrot.lane.b32.xlu0 %v18593_v55, %s18776_s3 }
0x19e5   :  { %v18595_v25 = vpop.eup %18594 }
0x19e6   :  { %v13021_v44 = vadd.f32 1.0, %v18595_v25  ;;  %v13660_v25 = vand.u32 4294901760, %v13659_v58 }
0x19e8   :  { %18596 = vrcp.f32 %v13021_v44  ;;  %v13156_v44 = vand.u32 4294901760, %v13155_v54 }
0x19f2   :  { %v20406_v15 = vpop.eup %18596 }
0x19f3   :  { %v13025_v62 = vmul.f32 %v20406_v15, %v20333_v2  ;;  %v13062_v2 = vand.u32 4294901760, %v13043_v52 }
0x19f5   :  { %v20427_v11 = vpack.c.bf16 %v13062_v2, %v13059_v30  ;;  %v20429_v24 = vsub.f32 %v13043_v52, %v13062_v2 }
0x19f7   :  { %18189 = vmatpush3.bf16.msra.mxu0 %v20427_v11  ;;  %v13147_v0 = vand.u32 4294901760, %v20429_v24 }
0x19f8   :  { %18190 = vmatprep.subr.bf16.mxu0 %v18773_v8 }
0x19f9   :  { %v13148_v37 = vsub.f32 %v20429_v24, %v13147_v0  ;;  %v18212_v50 = vpack.c.bf16 %v13147_v0, %v13140_v43  ;;  %v20546_v43 = vpack.c.bf16 %v14065_v17, %v14062_v12  ;;  %v14150_v0 = vsub.f32 %v14043_v60, %v14062_v12 }
0x19fb   :  { %18192 = vmatpush3.bf16.msra.mxu0 %v20453_v59  ;;  %v13149_v28 = vand.u32 4294901760, %v13148_v37 }
0x19fc   :  { %18193 = vmatprep.subr.bf16.mxu0 %v18773_v8 }
0x19fd   :  { %v18194_v55 = vpack.c.bf16 %v13149_v28, %v13142_v7  ;;  %v14590_v7 = vld [vmem:[#allocation8] ss:$0 sm:$0xff]  ;;  %v14591_v28 = vld [vmem:[%s20614_s10] ss:$0 sm:$0xff]  ;;  %s18778_s10 = smov [#allocation11]  }
0x19fe   :  { %s14547_s18 = sshll.u32 %s18778_s10, 4  ;;  %s14548_s18 = int_to_ptr.vmem [resolvable:$true] %s14547_s18 }
0x19ff   :  { %p18717_p13 = scmp.lt.s32.totalorder %s14548_s18, %s14548_s18 }
0x1a56   :  { %v13028_v6 = vpop.permute.xlu0 %13027 }
0x1a57   :  { %v13030_v4 = vmul.f32 %v20406_v15, %v13028_v6  ;;  %v13163_v6 = vand.u32 4294901760, %v13162_v45 }
0x1a59   :  { %13032 = vrot.lane.b32.xlu1 %v13030_v4, %s18777_s19  ;;  %v18233_v4 = vpack.c.bf16 %v13660_v25, %v13653_v39 }
0x1acb   :  { %v13033_v5 = vpop.permute.xlu1 %13032 }
0x1acc   :  { %v13035_v49 = vadd.f32 %v13033_v5, %v13025_v62  ;;  %v18197_v62 = vpack.c.bf16 %v13163_v6, %v13156_v44  ;;  %v18236_v5 = vpack.c.bf16 %v20423_v16, %v20421_v14 }
0x1ace   :  { %18598 = vtanh.f32 %v13035_v49  ;;  %v18239_v49 = vpack.c.bf16 %v20449_v36, %v20447_v33 }
0x1ad8   :  { %v18599_v1 = vpop.eup %18598 }
0x1ad9   :  { %13038 = vrot.lane.b32.xlu0 %v18599_v1, %s18776_s3  ;;  %v18203_v1 = vpack.c.bf16 %v20455_v20, %v20451_v56  ;;  %s18712_s3 = scalar_lea.vmem %s14548_s18, 128 }
0x1ada   :  { %p18713_p12 = scmp.ne.s32.totalorder %s14548_s18, %s18712_s3  ;;  %p18718_p0 = scmp.lt.s32.totalorder %s18712_s3, %s18712_s3 }
0x1adc   :  { %p18719_p1 = por %p18718_p0, %p18717_p13 }
0x1ade   :  { %p18720_p2 = pnand %p18719_p1, %p18713_p12 }
0x1b4b   :  { %v13039_v42 = vpop.permute.xlu0 %13038 }
0x1b4c   :  { %v13041_v40 = vmul.f32 %v20406_v15, %v13039_v42  ;;  %v18200_v15 = vpack.c.bf16 %v20429_v24, %v20425_v10 }
0x1b4e   :  { %13054 = vrot.lane.b32.xlu1 %v13041_v40, %s18777_s19 }
0x1bc0   :  { %v13055_v26 = vpop.permute.xlu1 %13054 }
0x1bc1   :  { %v13056_v52 = vsel %vm923_vm3, %v13055_v26, 0 }
0x1bc2   :  { %v20484_v30 = vand.u32 4294901760, %v13056_v52 }
0x1bc4   :  { %v13128_v2 = vsub.f32 %v13056_v52, %v20484_v30 }
0x1bc6   :  { %v13129_v14 = vand.u32 4294901760, %v13128_v2 }
0x1bc8   :  { %v13130_v16 = vsub.f32 %v13128_v2, %v13129_v14 }
0x1bca   :  { %v13131_v10 = vand.u32 4294901760, %v13130_v16 }
0x1bcc   :  { %17134 = vmatmul.mubr.f32.vlgmr.msra.gmra.mrb[80].mxu0 %v13131_v10  ;;  %17200 = vmatmul.mubr.f32.vlgmr.msra.gmra.mrb[144].mxu1 %v13131_v10 }
0x1bcd   :  { %18231 = vmatpush3.bf16.msra.mxu1 %v18230_v22  ;;  %18195 = vmatpush3.bf16.msra.mxu0 %v18194_v55 }
0x1bce   :  { %18232 = vmatprep.subr.bf16.mxu1 %v18773_v8  ;;  %18196 = vmatprep.subr.bf16.mxu0 %v18773_v8 }
0x1bcf   :  { %17144 = vmatprep.mubr.msk.f32.mxu0 %vm18774_vm2, %v18775_v46  ;;  %17210 = vmatprep.mubr.msk.f32.mxu1 %vm18774_vm2, %v18775_v46 }
0x1bd1   :  { %18234 = vmatpush3.bf16.msra.mxu1 %v18233_v4  ;;  %18198 = vmatpush3.bf16.msra.mxu0 %v18197_v62 }
0x1bd2   :  { %18235 = vmatprep.subr.bf16.mxu1 %v18773_v8  ;;  %18199 = vmatprep.subr.bf16.mxu0 %v18773_v8 }
0x1bd4   :  { %17145 = vmatmul.mubr.f32.vlgmr.msra.gmra.mrb[80].mxu0 %v20484_v30  ;;  %17211 = vmatmul.mubr.f32.vlgmr.msra.gmra.mrb[144].mxu1 %v20484_v30 }
0x1bd5   :  { %18237 = vmatpush3.bf16.msra.mxu1 %v18236_v5  ;;  %18201 = vmatpush3.bf16.msra.mxu0 %v18200_v15 }
0x1bd6   :  { %18238 = vmatprep.subr.bf16.mxu1 %v18773_v8  ;;  %18202 = vmatprep.subr.bf16.mxu0 %v18773_v8 }
0x1bd7   :  { %17155 = vmatprep.mubr.msk.f32.mxu0 %vm18774_vm2, %v18775_v46  ;;  %17221 = vmatprep.mubr.msk.f32.mxu1 %vm18774_vm2, %v18775_v46 }
0x1bd9   :  { %18240 = vmatpush3.bf16.msra.mxu1 %v18239_v49  ;;  %18204 = vmatpush3.bf16.msra.mxu0 %v18203_v1 }
0x1bda   :  { %18241 = vmatprep.subr.bf16.mxu1 %v18773_v8  ;;  %18205 = vmatprep.subr.bf16.mxu0 %v18773_v8 }
0x1bdc   :  { %17156 = vmatmul.mubr.f32.vlgmr.msra.gmra.mrb[80].mxu0 %v13128_v2  ;;  %17222 = vmatmul.mubr.f32.vlgmr.msra.gmra.mrb[144].mxu1 %v13128_v2 }
0x1bdd   :  { %18243 = vmatpush3.bf16.msra.mxu1 %v20419_v35  ;;  %18207 = vmatpush3.bf16.msra.mxu0 %v20427_v11 }
0x1bde   :  { %18244 = vmatprep.subr.bf16.mxu1 %v18773_v8  ;;  %18208 = vmatprep.subr.bf16.mxu0 %v18773_v8 }
0x1bdf   :  { %17166 = vmatprep.mubr.msk.f32.mxu0 %vm18774_vm2, %v18775_v46  ;;  %17232 = vmatprep.mubr.msk.f32.mxu1 %vm18774_vm2, %v18775_v46 }
0x1be1   :  { %18246 = vmatpush3.bf16.msra.mxu1 %v20445_v61  ;;  %18210 = vmatpush3.bf16.msra.mxu0 %v20453_v59 }
0x1be2   :  { %18247 = vmatprep.subr.bf16.mxu1 %v18773_v8  ;;  %18211 = vmatprep.subr.bf16.mxu0 %v18773_v8 }
0x1be4   :  { %17167 = vmatmul.mubr.f32.vlgmr.msra.gmra.mrb[80].mxu0 %v13129_v14  ;;  %17233 = vmatmul.mubr.f32.vlgmr.msra.gmra.mrb[144].mxu1 %v13129_v14 }
0x1be5   :  { %18249 = vmatpush3.bf16.msra.mxu1 %v18248_v34  ;;  %18213 = vmatpush3.bf16.msra.mxu0 %v18212_v50 }
0x1be6   :  { %18250 = vmatprep.subr.bf16.mxu1 %v18773_v8  ;;  %18214 = vmatprep.subr.bf16.mxu0 %v18773_v8 }
0x1be7   :  { %17177 = vmatprep.mubr.msk.f32.mxu0 %vm18774_vm2, %v18775_v46  ;;  %17243 = vmatprep.mubr.msk.f32.mxu1 %vm18774_vm2, %v18775_v46 }
0x1be9   :  { %18252 = vmatpush3.bf16.msra.mxu1 %v18251_v27  ;;  %18216 = vmatpush3.bf16.msra.mxu0 %v18215_v13 }
0x1bea   :  { %18253 = vmatprep.subr.bf16.mxu1 %v18773_v8  ;;  %18217 = vmatprep.subr.bf16.mxu0 %v18773_v8 }
0x1bec   :  { %17178 = vmatmul.mubr.f32.vlgmr.msra.gmra.mrb[80].mxu0 %v20484_v30  ;;  %17244 = vmatmul.mubr.f32.vlgmr.msra.gmra.mrb[144].mxu1 %v20484_v30 }
0x1bed   :  { %18255 = vmatpush3.bf16.msra.mxu1 %v20419_v35  ;;  %18219 = vmatpush3.bf16.msra.mxu0 %v20427_v11  ;;  %v14041_v35 = vld [vmem:[#allocation10] sm:$0xff]  ;;  %v14042_v11 = vld [vmem:[#allocation10 + $0x8] sm:$0xff] }
0x1bee   :  { %18256 = vmatprep.subr.bf16.mxu1 %v18773_v8  ;;  %18220 = vmatprep.subr.bf16.mxu0 %v18773_v8  ;;  %v14056_v24 = vand.u32 4294901760, %v14041_v35  ;;  %v14059_v29 = vand.u32 4294901760, %v14042_v11 }
0x1bef   :  { %17188 = vmatprep.mubr.msk.f32.mxu0 %vm18774_vm2, %v18775_v46  ;;  %17254 = vmatprep.mubr.msk.f32.mxu1 %vm18774_vm2, %v18775_v46 }
0x1bf0   :  { %v20542_v32 = vpack.c.bf16 %v14059_v29, %v14056_v24  ;;  %v14136_v38 = vsub.f32 %v14041_v35, %v14056_v24  ;;  %v14143_v53 = vsub.f32 %v14042_v11, %v14059_v29 }
0x1bf1   :  { %18258 = vmatpush3.bf16.msra.mxu1 %v20445_v61  ;;  %18222 = vmatpush3.bf16.msra.mxu0 %v20453_v59  ;;  %v14157_v61 = vsub.f32 %v14044_v3, %v14065_v17  ;;  %v14151_v59 = vand.u32 4294901760, %v14150_v0 }
0x1bf2   :  { %18259 = vmatprep.subr.bf16.mxu0 %v18773_v8  ;;  %v14137_v48 = vand.u32 4294901760, %v14136_v38  ;;  %v14144_v41 = vand.u32 4294901760, %v14143_v53  ;;  %v18272_v21 = vpack.c.bf16 %v14143_v53, %v14136_v38 }
0x1bf3   :  { %v14158_v20 = vand.u32 4294901760, %v14157_v61  ;;  %v14152_v31 = vsub.f32 %v14150_v0, %v14151_v59  ;;  %v18275_v23 = vpack.c.bf16 %v14157_v61, %v14150_v0 }
0x1bf4   :  { %17189 = vmatmul.mubr.f32.vlgmr.msra.gmra.mrb[80].mxu0 %v20484_v30  ;;  %17255 = vmatmul.mubr.f32.vlgmr.msra.gmra.mrb[144].mxu1 %v20484_v30  ;;  %v14138_v33 = vsub.f32 %v14136_v38, %v14137_v48  ;;  %v14145_v36 = vsub.f32 %v14143_v53, %v14144_v41  ;;  %v18284_v9 = vpack.c.bf16 %v14144_v41, %v14137_v48 }
0x1bf5   :  { %17265 = vmatprep.mubr.msk.f32.mxu0 %vm18774_vm2, %v18775_v46  ;;  %18261 = vmatpush3.bf16.msra.mxu0 %v20542_v32  ;;  %v14159_v18 = vsub.f32 %v14157_v61, %v14158_v20  ;;  %v14153_v47 = vand.u32 4294901760, %v14152_v31  ;;  %v18287_v42 = vpack.c.bf16 %v14158_v20, %v14151_v59 }
0x1bf6   :  { %18262 = vmatprep.subr.bf16.mxu0 %v18773_v8  ;;  %v14139_v56 = vand.u32 4294901760, %v14138_v33  ;;  %v14146_v63 = vand.u32 4294901760, %v14145_v36 }
0x1bf7   :  { %v14160_v51 = vand.u32 4294901760, %v14159_v18 }
0x1bf8   :  { %v18266_v37 = vpack.c.bf16 %v14146_v63, %v14139_v56 }
0x1bf9   :  { %18264 = vmatpush3.bf16.msra.mxu0 %v20546_v43  ;;  %v18269_v19 = vpack.c.bf16 %v14160_v51, %v14153_v47 }
0x1bfa   :  { %18265 = vmatprep.subr.bf16.mxu0 %v18773_v8 }
0x1cc7   :  { %v13539_v57 = vpop.f32.mrb[80].mxu0  ;;  %v14036_v58 = vpop.f32.mrb[144].mxu1 }
0x1cc8   :  { %v18313_v40 = vadd.f32 %v14590_v7, %v13539_v57  ;;  %v18314_v22 = vadd.f32 %v14591_v28, %v14036_v58  ;;  %v17190_v54 = vpop.f32.mrb[81].mxu0  ;;  %v17256_v45 = vpop.f32.mrb[145].mxu1 }
0x1cca   :  { %13543 = vst [vmem:[#allocation11] sm:$0xff] %v18313_v40  ;;  %v14040_v55 = vmax.f32 %v18314_v22, 0.0 }
0x1ccc   :  { %v14053_v39 = vsel %vm923_vm3, %v14040_v55, 0 }
0x1ccd   :  { %v14124_v25 = vand.u32 4294901760, %v14053_v39 }
0x1ccf   :  { %v14125_v44 = vsub.f32 %v14053_v39, %v14124_v25 }
0x1cd1   :  { %v14126_v6 = vand.u32 4294901760, %v14125_v44 }
0x1cd3   :  { %v14127_v4 = vsub.f32 %v14125_v44, %v14126_v6 }
0x1cd5   :  { %v14128_v62 = vand.u32 4294901760, %v14127_v4 }
0x1cd7   :  { %17266 = vmatmul.mubr.f32.vlgmr.msra.gmra.mrb[82].mxu0 %v14128_v62 }
0x1cd8   :  { %18267 = vmatpush3.bf16.msra.mxu0 %v18266_v37  ;;  %17276 = vmatprep.mubr.msk.f32.mxu0 %vm18774_vm2, %v18775_v46 }
0x1cd9   :  { %18268 = vmatprep.subr.bf16.mxu0 %v18773_v8 }
0x1cdc   :  { %18270 = vmatpush3.bf16.msra.mxu0 %v18269_v19 }
0x1cdd   :  { %18271 = vmatprep.subr.bf16.mxu0 %v18773_v8 }
0x1cdf   :  { %17277 = vmatmul.mubr.f32.vlgmr.msra.gmra.mrb[82].mxu0 %v14124_v25 }
0x1ce0   :  { %18273 = vmatpush3.bf16.msra.mxu0 %v18272_v21  ;;  %17287 = vmatprep.mubr.msk.f32.mxu0 %vm18774_vm2, %v18775_v46 }
0x1ce1   :  { %18274 = vmatprep.subr.bf16.mxu0 %v18773_v8 }
0x1ce4   :  { %18276 = vmatpush3.bf16.msra.mxu0 %v18275_v23 }
0x1ce5   :  { %18277 = vmatprep.subr.bf16.mxu0 %v18773_v8 }
0x1ce7   :  { %17288 = vmatmul.mubr.f32.vlgmr.msra.gmra.mrb[82].mxu0 %v14125_v44 }
0x1ce8   :  { %18279 = vmatpush3.bf16.msra.mxu0 %v20542_v32  ;;  %17298 = vmatprep.mubr.msk.f32.mxu0 %vm18774_vm2, %v18775_v46 }
0x1ce9   :  { %18280 = vmatprep.subr.bf16.mxu0 %v18773_v8 }
0x1cec   :  { %18282 = vmatpush3.bf16.msra.mxu0 %v20546_v43 }
0x1ced   :  { %18283 = vmatprep.subr.bf16.mxu0 %v18773_v8 }
0x1cef   :  { %17299 = vmatmul.mubr.f32.vlgmr.msra.gmra.mrb[82].mxu0 %v14126_v6 }
0x1cf0   :  { %18285 = vmatpush3.bf16.msra.mxu0 %v18284_v9  ;;  %17309 = vmatprep.mubr.msk.f32.mxu0 %vm18774_vm2, %v18775_v46 }
0x1cf1   :  { %18286 = vmatprep.subr.bf16.mxu0 %v18773_v8 }
0x1cf4   :  { %18288 = vmatpush3.bf16.msra.mxu0 %v18287_v42 }
0x1cf5   :  { %18289 = vmatprep.subr.bf16.mxu0 %v18773_v8 }
0x1cf7   :  { %17310 = vmatmul.mubr.f32.vlgmr.msra.gmra.mrb[82].mxu0 %v14124_v25 }
0x1cf8   :  { %18291 = vmatpush3.bf16.msra.mxu0 %v20542_v32  ;;  %17320 = vmatprep.mubr.msk.f32.mxu0 %vm18774_vm2, %v18775_v46 }
0x1cf9   :  { %18292 = vmatprep.subr.bf16.mxu0 %v18773_v8 }
0x1cfc   :  { %18294 = vmatpush3.bf16.msra.mxu0 %v20546_v43 }
0x1cff   :  { %17321 = vmatmul.mubr.f32.vlgmr.msra.gmra.mrb[82].mxu0 %v14124_v25 }
0x1d00   :  { %18723 = shalt.err (!%p18720_p2)
}
0x1d01   :  { %s18724_s23 = scalar_lea.hbm %s20617_s13, 128 }
0x1d02   :  { %p18725_p3 = scmp.ne.s32.totalorder %s20617_s13, %s18724_s23  ;;  %p18728_p4 = scmp.lt.u32.totalorder %s18724_s23, %s20617_s13 }
0x1d04   :  { %p18730_p5 = pnand %p18728_p4, %p18725_p3 }
0x1d06   :  { %18733 = shalt.err (!%p18730_p5)
}
0x1d07   :  { %14550 = dma.vmem_to_hbm [thread:$0]  %s14548_s18, 128, %s20617_s13, [#allocation4]   ;;  %v14592_v8 = vld [vmem:[%s20616_s12] ss:$0 sm:$0xff] }
0x1d08   :  { %s18779_s28 = smov [#allocation12]  }
0x1d09   :  { %s14557_s22 = sshll.u32 %s18779_s28, 4  ;;  %s14558_s22 = int_to_ptr.vmem [resolvable:$true] %s14557_s22 }
0x1d0a   :  { %s18734_s30 = scalar_lea.vmem %s14558_s22, 128  ;;  %p18739_p7 = scmp.lt.s32.totalorder %s14558_s22, %s14558_s22 }
0x1d0b   :  { %p18735_p6 = scmp.ne.s32.totalorder %s14558_s22, %s18734_s30  ;;  %p18740_p8 = scmp.lt.s32.totalorder %s18734_s30, %s18734_s30 }
0x1d0d   :  { %p18741_p9 = por %p18740_p8, %p18739_p7 }
0x1d0f   :  { %p18742_p10 = pnand %p18741_p9, %p18735_p6 }
0x1dd2   :  { %v14536_v46 = vpop.f32.mrb[82].mxu0 }
0x1dd3   :  { %v18315_v5 = vadd.f32 %v14592_v8, %v14536_v46  ;;  %v17322_v15 = vpop.f32.mrb[83].mxu0 }
0x1dd5   :  { %14540 = vst [vmem:[#allocation12] sm:$0xff] %v18315_v5 }
0x1dd6   :  { %18745 = shalt.err (!%p18742_p10)
}
0x1dd7   :  { %s18746_s6 = scalar_lea.hbm %s20618_s14, 128 }
0x1dd8   :  { %p18747_p11 = scmp.ne.s32.totalorder %s20618_s14, %s18746_s6  ;;  %p18750_p12 = scmp.lt.u32.totalorder %s18746_s6, %s20618_s14 }
0x1dda   :  { %p18752_p13 = pnand %p18750_p12, %p18747_p11 }
0x1ddc   :  { %18755 = shalt.err (!%p18752_p13)
}
0x1ddd   :  { %14560 = dma.vmem_to_hbm [thread:$0]  %s14558_s22, 128, %s20618_s14, [#allocation13]  }
0x1dde   :  { %18762 = dma.done.wait [#allocation4], 128  }
0x1ddf   :  { %18763 = vsyncadd [#allocation4], 4294967168 }
0x1de0   :  { %18764 = dma.done.wait [#allocation13], 128  }
0x1de1   :  { %18765 = vsyncadd [#allocation13], 4294967168 }
0x1de2   :  { %14567 = vsyncpa [#allocation3], 1 }
0x1de3   :  { %14568 = vsyncpa [#allocation6], 1 }
0x1de4   :  { %14569 = vsyncpa [#allocation9], 1 }
0x1de5   :  { %14570 = vsyncpa [#allocation4], 1 }
0x1de6   :  { %14571 = vsyncpa [#allocation13], 1 }

</bundles_post_ra>
